<compile_context>
chip_gen: v5e
topology: v5e:2x2
jax: 0.10.0
libtpu: 0.0.40
codegen_flags: <defaults>
</compile_context>

<pallas_src>
import functools

import jax
import jax.numpy as jnp
from jax import lax
from jax.experimental import pallas as pl
from jax.experimental.pallas import tpu as pltpu

_VMEM_LIMIT = 32 * 1024 * 1024   # sized against v7x's 64 MiB physical VMEM


# ----------------------- fused linear (GEMM) kernel family -------------------
def _make_linear_kernel(n_parts, *, leaky, split2):
    """y = sum_i x_i @ w_i + b ; optional LeakyReLU(0.1) ; optional column split."""

    def kernel(*refs):
        x_refs = refs[:n_parts]
        w_refs = refs[n_parts:2 * n_parts]
        b_ref = refs[2 * n_parts]
        outs = refs[2 * n_parts + 1:]
        acc = None
        for x_ref, w_ref in zip(x_refs, w_refs):
            d = jnp.dot(x_ref[...], w_ref[...], preferred_element_type=jnp.float32)
            acc = d if acc is None else acc + d
        y = acc + b_ref[...]
        if leaky:
            y = jnp.where(y > 0, y, 0.1 * y)          # LeakyReLU(negative_slope=0.1)
        if split2:
            half = outs[0].shape[-1]                  # 4H (128-lane aligned split)
            outs[0][...] = y[:, :half].astype(outs[0].dtype)
            outs[1][...] = y[:, half:].astype(outs[1].dtype)
        else:
            outs[0][...] = y.astype(outs[0].dtype)

    return kernel


def fused_linear(x_parts, w_parts, bias, *, leaky, split2,
                 out_dtype=jnp.float32, max_row_tile=256):
    """Row-tiled GEMM over N = sum-of-parts inputs; optional 2-way column split."""
    N = x_parts[0].shape[0]
    d_out = bias.shape[-1]
    tile = min(N, max_row_tile)
    n_blocks = pl.cdiv(N, tile)
    n_pad = n_blocks * tile
    if n_pad != N:
        x_parts = [jnp.pad(x, ((0, n_pad - N), (0, 0))) for x in x_parts]
    n_parts = len(x_parts)

    in_specs = [pl.BlockSpec((tile, x.shape[1]), lambda i: (i, 0)) for x in x_parts]
    in_specs += [pl.BlockSpec(w.shape, lambda i: (0, 0)) for w in w_parts]
    in_specs += [pl.BlockSpec(bias.shape, lambda i: (0, 0))]

    if split2:
        half = d_out // 2
        out_shape = (jax.ShapeDtypeStruct((n_pad, half), out_dtype),
                     jax.ShapeDtypeStruct((n_pad, half), out_dtype))
        out_specs = (pl.BlockSpec((tile, half), lambda i: (i, 0)),
                     pl.BlockSpec((tile, half), lambda i: (i, 0)))
    else:
        out_shape = jax.ShapeDtypeStruct((n_pad, d_out), out_dtype)
        out_specs = pl.BlockSpec((tile, d_out), lambda i: (i, 0))

    out = pl.pallas_call(
        _make_linear_kernel(n_parts, leaky=leaky, split2=split2),
        out_shape=out_shape,
        grid=(n_blocks,),
        in_specs=in_specs,
        out_specs=out_specs,
        compiler_params=pltpu.CompilerParams(
            dimension_semantics=("parallel",),
            vmem_limit_bytes=_VMEM_LIMIT),
    )(*x_parts, *w_parts, bias)

    if n_pad != N:
        out = (out[0][:N], out[1][:N]) if split2 else out[:N]
    return out


# ----------------- fused bidirectional LSTM recurrence (time-blocked) --------
def _bilstm_rec_kernel(gf_ref, gb_ref, mf_ref, mb_ref, whf_ref, whb_ref,
                       hf_out_ref, hb_out_ref, hf_sc, cf_sc, hb_sc, cb_sc):
    @pl.when(pl.program_id(0) == 0)
    def _():
        hf_sc[...] = jnp.zeros_like(hf_sc)
        cf_sc[...] = jnp.zeros_like(cf_sc)
        hb_sc[...] = jnp.zeros_like(hb_sc)
        cb_sc[...] = jnp.zeros_like(cb_sc)

    tb = gf_ref.shape[0]                 # static time-block length
    h_dim = hf_sc.shape[-1]
    whf = whf_ref[...]
    whb = whb_ref[...]

    def cell(g_pre, m, h, c, w_hh):
        gates = g_pre + jnp.dot(h, w_hh, preferred_element_type=jnp.float32)
        i = jax.nn.sigmoid(gates[:, 0 * h_dim:1 * h_dim])
        f = jax.nn.sigmoid(gates[:, 1 * h_dim:2 * h_dim])
        g = jnp.tanh(gates[:, 2 * h_dim:3 * h_dim])
        o = jax.nn.sigmoid(gates[:, 3 * h_dim:4 * h_dim])
        c_new = f * c + i * g
        h_new = o * jnp.tanh(c_new)
        # pack_padded semantics: padded steps neither advance state nor emit output
        h_keep = m * h_new + (1.0 - m) * h
        c_keep = m * c_new + (1.0 - m) * c
        return m * h_new, h_keep, c_keep

    # statically unrolled time block: fwd processes local step s, bwd processes
    # local step tb-1-s of the (already reverse-indexed) backward block.
    for s in range(tb):
        out_f, hf_new, cf_new = cell(gf_ref[s], mf_ref[s], hf_sc[...], cf_sc[...], whf)
        hf_sc[...] = hf_new
        cf_sc[...] = cf_new
        hf_out_ref[s] = out_f.astype(hf_out_ref.dtype)

        sb = tb - 1 - s
        out_b, hb_new, cb_new = cell(gb_ref[sb], mb_ref[sb], hb_sc[...], cb_sc[...], whb)
        hb_sc[...] = hb_new
        cb_sc[...] = cb_new
        hb_out_ref[sb] = out_b.astype(hb_out_ref.dtype)


def bilstm_recurrence(gates_f, gates_b, mask_tb1, w_hh_f, w_hh_b, *,
                      max_time_block=16):
    T, B, G4 = gates_f.shape
    H = w_hh_f.shape[0]
    TB = min(T, max_time_block)
    while T % TB != 0:
        TB -= 1
    nblk = T // TB

    fwd = lambda t: (t, 0, 0)
    rev = lambda t: (nblk - 1 - t, 0, 0)

    return pl.pallas_call(
        _bilstm_rec_kernel,
        out_shape=(jax.ShapeDtypeStruct((T, B, H), jnp.bfloat16),
                   jax.ShapeDtypeStruct((T, B, H), jnp.bfloat16)),
        grid=(nblk,),
        in_specs=[
            pl.BlockSpec((TB, B, G4), fwd),
            pl.BlockSpec((TB, B, G4), rev),
            pl.BlockSpec((TB, B, 1), fwd),
            pl.BlockSpec((TB, B, 1), rev),
            pl.BlockSpec((H, G4), lambda t: (0, 0)),
            pl.BlockSpec((H, G4), lambda t: (0, 0)),
        ],
        out_specs=(pl.BlockSpec((TB, B, H), fwd),
                   pl.BlockSpec((TB, B, H), rev)),
        scratch_shapes=[pltpu.VMEM((B, H), jnp.float32),
                        pltpu.VMEM((B, H), jnp.float32),
                        pltpu.VMEM((B, H), jnp.float32),
                        pltpu.VMEM((B, H), jnp.float32)],
        compiler_params=pltpu.CompilerParams(
            dimension_semantics=("arbitrary",),
            vmem_limit_bytes=_VMEM_LIMIT),
    )(gates_f, gates_b, mask_tb1, mask_tb1, w_hh_f, w_hh_b)


# ------------------ fused arc + rel biaffine (+ head mask) -------------------
def _make_biaffine_kernel(n_arc, n_rel):
    A, R = n_arc, n_rel

    def kernel(feat_ref, mask_ref, a_arc_ref, brow_ref, a_relf_ref, vrowf_ref,
               ucol_ref, crow_ref, s_arc_ref, s_rel_ref):
        feat = feat_ref[0]                              # (T, 2A + 2R)
        arc_h = feat[:, 0:A]
        arc_d = feat[:, A:2 * A]
        rel_h = feat[:, 2 * A:2 * A + R]
        rel_d = feat[:, 2 * A + R:2 * A + 2 * R]
        m = mask_ref[0]                                 # (1, T) head-position mask

        # --- arc biaffine (bias_x=True, bias_y=False, n_out=1), bias row folded
        xa = (jnp.dot(arc_d, a_arc_ref[...], preferred_element_type=jnp.float32)
              + brow_ref[...])                          # (T, A)
        s_arc = lax.dot_general(xa, arc_h, (((1,), (1,)), ((), ())),
                                preferred_element_type=jnp.float32)   # (T, T)
        s_arc_ref[0] = jnp.where(m > 0.5, s_arc, -jnp.inf)

        # --- rel biaffine (bias_x & bias_y, n_out = n_rels)
        # lane-dense first contraction for all outputs at once: (T,R)x(R,O*R)
        xr_all = (jnp.dot(rel_d, a_relf_ref[...], preferred_element_type=jnp.float32)
                  + vrowf_ref[...])                     # (T, O*R)
        cols = (jnp.dot(rel_d, ucol_ref[...], preferred_element_type=jnp.float32)
                + crow_ref[...])                        # (T, O)  bias-column terms
        n_out = s_rel_ref.shape[1]
        for o in range(n_out):                          # static unroll (n_rels small)
            xr = xr_all[:, o * R:(o + 1) * R]
            so = lax.dot_general(xr, rel_h, (((1,), (1,)), ((), ())),
                                 preferred_element_type=jnp.float32)  # (T, T)
            s_rel_ref[0, o] = so + cols[:, o:o + 1]

    return kernel


def biaffine_scores(feat, mask_b1t, w_arc, w_rel, *, n_arc, n_rel):
    B, T, d_feat = feat.shape
    O = w_rel.shape[0]
    A, R = n_arc, n_rel

    # fold the bias augmentation ("concat ones") into weight rows/columns
    a_arc = w_arc[0, :A, :]                                           # (A, A)
    brow_arc = w_arc[0, A:A + 1, :]                                   # (1, A)
    a_rel_flat = jnp.transpose(w_rel[:, :R, :R], (1, 0, 2)).reshape(R, O * R)
    vrow_flat = w_rel[:, R, :R].reshape(1, O * R)
    ucol = jnp.transpose(w_rel[:, :R, R])                             # (R, O)
    crow = w_rel[:, R, R].reshape(1, O)                               # (1, O)

    return pl.pallas_call(
        _make_biaffine_kernel(A, R),
        out_shape=(jax.ShapeDtypeStruct((B, T, T), jnp.float32),
                   jax.ShapeDtypeStruct((B, O, T, T), jnp.float32)),
        grid=(B,),
        in_specs=[
            pl.BlockSpec((1, T, d_feat), lambda b: (b, 0, 0)),
            pl.BlockSpec((1, 1, T), lambda b: (b, 0, 0)),
            pl.BlockSpec((A, A), lambda b: (0, 0)),
            pl.BlockSpec((1, A), lambda b: (0, 0)),
            pl.BlockSpec((R, O * R), lambda b: (0, 0)),
            pl.BlockSpec((1, O * R), lambda b: (0, 0)),
            pl.BlockSpec((R, O), lambda b: (0, 0)),
            pl.BlockSpec((1, O), lambda b: (0, 0)),
        ],
        out_specs=(pl.BlockSpec((1, T, T), lambda b: (b, 0, 0)),
                   pl.BlockSpec((1, O, T, T), lambda b: (b, 0, 0, 0))),
        compiler_params=pltpu.CompilerParams(
            dimension_semantics=("parallel",),
            vmem_limit_bytes=_VMEM_LIMIT),
    )(feat, mask_b1t, a_arc, brow_arc, a_rel_flat, vrow_flat, ucol, crow)


# ----------------------------- WordParser.forward ----------------------------
def word_parser_forward(params, words, tags, *, pad_index):
    # `tags` is accepted but unused, exactly like the PyTorch forward.
    del tags
    B, T = words.shape
    mask = words != pad_index                                   # (B, T) bool
    maskf = mask.astype(jnp.float32)

    n_hidden = params["lstm"][0]["w_hh_f"].shape[0]

    # embedding lookup directly in time-major layout (glue op)
    x0 = jnp.take(params["embed"], words.T, axis=0).astype(jnp.bfloat16)   # (T, B, E)
    m_tb1 = maskf.T[:, :, None]                                            # (T, B, 1)

    parts = [x0.reshape(T * B, -1)]                  # current layer input (bf16 parts)
    for layer in params["lstm"]:
        # hoisted input projection for both directions: one fused GEMM
        w_cat = jnp.concatenate([layer["w_ih_f"], layer["w_ih_b"]],
                                axis=1).astype(jnp.bfloat16)               # (Din, 8H)
        b_cat = jnp.concatenate([layer["b_f"], layer["b_b"]], axis=1)      # (1, 8H)
        w_parts = [w_cat] if len(parts) == 1 else [w_cat[:n_hidden], w_cat[n_hidden:]]
        gates_f, gates_b = fused_linear(parts, w_parts, b_cat,
                                        leaky=False, split2=True)
        gates_f = gates_f.reshape(T, B, 4 * n_hidden)
        gates_b = gates_b.reshape(T, B, 4 * n_hidden)

        h_f, h_b = bilstm_recurrence(gates_f, gates_b, m_tb1,
                                     layer["w_hh_f"], layer["w_hh_b"])
        parts = [h_f.reshape(T * B, n_hidden), h_b.reshape(T * B, n_hidden)]

    # 4 MLPs (Linear + LeakyReLU(0.1)) fused into one lane-dense GEMM
    n_arc = params["mlp_arc_h"]["w"].shape[1]
    n_rel = params["mlp_rel_h"]["w"].shape[1]
    w_mlp = jnp.concatenate([params["mlp_arc_h"]["w"], params["mlp_arc_d"]["w"],
                             params["mlp_rel_h"]["w"], params["mlp_rel_d"]["w"]],
                            axis=1).astype(jnp.bfloat16)                   # (2H, 2A+2R)
    b_mlp = jnp.concatenate([params["mlp_arc_h"]["b"], params["mlp_arc_d"]["b"],
                             params["mlp_rel_h"]["b"], params["mlp_rel_d"]["b"]],
                            axis=1)                                        # (1, 2A+2R)
    w_parts = [w_mlp[:n_hidden], w_mlp[n_hidden:]]
    feat = fused_linear(parts, w_parts, b_mlp, leaky=True, split2=False)   # (T*B, 2A+2R)
    feat = jnp.transpose(feat.reshape(T, B, -1), (1, 0, 2))                # (B, T, 2A+2R)

    s_arc, s_rel = biaffine_scores(feat, maskf[:, None, :],
                                   params["w_arc"], params["w_rel"],
                                   n_arc=n_arc, n_rel=n_rel)
    # TODO(synk): this permute yields a lane-sparse (last dim = n_rels) layout; it is
    # kept only to match the PyTorch return signature (B, T, T, R).
    s_rel = jnp.transpose(s_rel, (0, 2, 3, 1))                             # (B, T, T, R)
    return s_arc, s_rel


# ----------------------------- deterministic param init ----------------------
def init_params(key, vocab, n_embed, n_hidden, n_layers, n_arc, n_rel, n_rels):
    keys = iter(jax.random.split(key, 64))

    def u(shape, scale=0.1):
        return jax.random.uniform(next(keys), shape, jnp.float32, -scale, scale)

    params = {"embed": u((vocab, n_embed))}
    lstm = []
    d_in = n_embed
    for _ in range(n_layers):
        lstm.append({
            "w_ih_f": u((d_in, 4 * n_hidden)),
            "w_hh_f": u((n_hidden, 4 * n_hidden)),
            "b_f": u((1, 4 * n_hidden)),
            "w_ih_b": u((d_in, 4 * n_hidden)),
            "w_hh_b": u((n_hidden, 4 * n_hidden)),
            "b_b": u((1, 4 * n_hidden)),
        })
        d_in = 2 * n_hidden
    params["lstm"] = lstm
    for name, dout in [("mlp_arc_h", n_arc), ("mlp_arc_d", n_arc),
                       ("mlp_rel_h", n_rel), ("mlp_rel_d", n_rel)]:
        params[name] = {"w": u((2 * n_hidden, dout)), "b": u((1, dout))}
    params["w_arc"] = u((1, n_arc + 1, n_arc))                 # (n_out=1, n_arc+1, n_arc)
    params["w_rel"] = u((n_rels, n_rel + 1, n_rel + 1))        # (n_rels, n_rel+1, n_rel+1)
    return params


if __name__ == "__main__":
    # small, module-consistent config
    B, T = 2, 8
    vocab, n_embed = 50, 32
    n_lstm_hidden, n_lstm_layers = 32, 2
    n_mlp_arc, n_mlp_rel, n_rels = 64, 32, 4
    pad_index = 0

    key = jax.random.PRNGKey(0)
    kp, kw, kt = jax.random.split(key, 3)
    params = init_params(kp, vocab, n_embed, n_lstm_hidden, n_lstm_layers,
                         n_mlp_arc, n_mlp_rel, n_rels)

    words = jax.random.randint(kw, (B, T), 1, vocab)
    words = words.at[0, 6:].set(pad_index)          # variable lengths: 6 and 8
    tags = jax.random.randint(kt, (B, T), 0, 10)    # unused by forward (as in PyTorch)

    fwd = jax.jit(functools.partial(word_parser_forward, pad_index=pad_index))
    s_arc, s_rel = fwd(params, words, tags)
    jax.block_until_ready((s_arc, s_rel))

    assert s_arc.shape == (B, T, T)
    assert s_rel.shape == (B, T, T, n_rels)
    # padded head positions of sentence 0 must be -inf
    assert bool(jnp.all(jnp.isneginf(s_arc[0, :, 6:])))
    assert bool(jnp.all(jnp.isfinite(s_arc[1])))
    print("KERNEL_OK")
</pallas_src>

<mosaic_0001>
module attributes {stable_mosaic.version = 11 : i64} {
  func.func @kernel(%arg0: i32, %arg1: memref<16x32xbf16, #tpu.memory_space<vmem>>, %arg2: memref<32x256xbf16, #tpu.memory_space<vmem>>, %arg3: memref<1x256xf32, #tpu.memory_space<vmem>>, %arg4: memref<16x128xf32, #tpu.memory_space<vmem>>, %arg5: memref<16x128xf32, #tpu.memory_space<vmem>>) attributes {dimension_semantics = [#tpu.dimension_semantics<parallel>], iteration_bounds = array<i64: 1>, scalar_prefetch = 0 : i64, scratch_operands = 0 : i64, tpu.core_type = #tpu.core_type<tc>, window_params = [{transform_indices = @transform_0, window_bounds = array<i64: 16, 32>}, {pipeline_mode = #tpu.pipeline_mode<synchronous>, transform_indices = @transform_1, window_bounds = array<i64: 32, 256>}, {pipeline_mode = #tpu.pipeline_mode<synchronous>, transform_indices = @transform_2, window_bounds = array<i64: 1, 256>}, {transform_indices = @transform_3, window_bounds = array<i64: 16, 128>}, {transform_indices = @transform_4, window_bounds = array<i64: 16, 128>}]} {
    %c0 = arith.constant 0 : index
    %c0_0 = arith.constant 0 : index
    %0 = vector.load %arg1[%c0, %c0_0] : memref<16x32xbf16, #tpu.memory_space<vmem>>, vector<16x32xbf16>
    %c0_1 = arith.constant 0 : index
    %c0_2 = arith.constant 0 : index
    %1 = vector.load %arg2[%c0_1, %c0_2] : memref<32x256xbf16, #tpu.memory_space<vmem>>, vector<32x256xbf16>
    %cst = arith.constant dense<0.000000e+00> : vector<16x256xf32>
    %2 = tpu.matmul %0, %1, %cst {dimension_numbers = #tpu.dot_dimension_numbers<[1], [0], [0], [1], [0, 0, 1, 1], [], []>} : vector<16x32xbf16>, vector<32x256xbf16>, vector<16x256xf32> -> vector<16x256xf32>
    %c0_3 = arith.constant 0 : index
    %c0_4 = arith.constant 0 : index
    %3 = vector.load %arg3[%c0_3, %c0_4] : memref<1x256xf32, #tpu.memory_space<vmem>>, vector<1x256xf32>
    %4 = vector.broadcast %3 : vector<1x256xf32> to vector<16x256xf32>
    %5 = arith.addf %2, %4 : vector<16x256xf32>
    %6 = vector.extract_strided_slice %5 {offsets = [0, 0], sizes = [16, 128], strides = [1, 1]} : vector<16x256xf32> to vector<16x128xf32>
    %c0_5 = arith.constant 0 : index
    %c0_6 = arith.constant 0 : index
    %7 = vector.load %arg4[%c0_5, %c0_6] : memref<16x128xf32, #tpu.memory_space<vmem>>, vector<16x128xf32>
    tpu.vector_store %arg4[%c0_5, %c0_6], %6 {strides = array<i32>} : memref<16x128xf32, #tpu.memory_space<vmem>>, vector<16x128xf32>,
    %8 = vector.extract_strided_slice %5 {offsets = [0, 128], sizes = [16, 128], strides = [1, 1]} : vector<16x256xf32> to vector<16x128xf32>
    %c0_7 = arith.constant 0 : index
    %c0_8 = arith.constant 0 : index
    %9 = vector.load %arg5[%c0_7, %c0_8] : memref<16x128xf32, #tpu.memory_space<vmem>>, vector<16x128xf32>
    tpu.vector_store %arg5[%c0_7, %c0_8], %8 {strides = array<i32>} : memref<16x128xf32, #tpu.memory_space<vmem>>, vector<16x128xf32>,
    return
  }
  func.func @transform_0(%arg0: i32) -> (i32, i32) {
    %c0_i32 = arith.constant 0 : i32
    %c0_i32_0 = arith.constant 0 : i32
    return %arg0, %c0_i32 : i32, i32
  }
  func.func @transform_1(%arg0: i32) -> (i32, i32) {
    %c0_i32 = arith.constant 0 : i32
    %c0_i32_0 = arith.constant 0 : i32
    %c0_i32_1 = arith.constant 0 : i32
    return %c0_i32, %c0_i32_0 : i32, i32
  }
  func.func @transform_2(%arg0: i32) -> (i32, i32) {
    %c0_i32 = arith.constant 0 : i32
    %c0_i32_0 = arith.constant 0 : i32
    %c0_i32_1 = arith.constant 0 : i32
    return %c0_i32, %c0_i32_0 : i32, i32
  }
  func.func @transform_3(%arg0: i32) -> (i32, i32) {
    %c0_i32 = arith.constant 0 : i32
    %c0_i32_0 = arith.constant 0 : i32
    return %arg0, %c0_i32 : i32, i32
  }
  func.func @transform_4(%arg0: i32) -> (i32, i32) {
    %c0_i32 = arith.constant 0 : i32
    %c0_i32_0 = arith.constant 0 : i32
    return %arg0, %c0_i32 : i32, i32
  }
}

module attributes {stable_mosaic.version = 11 : i64} {
  func.func @kernel(%arg0: i32, %arg1: memref<16x32xbf16, #tpu.memory_space<vmem>>, %arg2: memref<16x32xbf16, #tpu.memory_space<vmem>>, %arg3: memref<32x256xbf16, #tpu.memory_space<vmem>>, %arg4: memref<32x256xbf16, #tpu.memory_space<vmem>>, %arg5: memref<1x256xf32, #tpu.memory_space<vmem>>, %arg6: memref<16x128xf32, #tpu.memory_space<vmem>>, %arg7: memref<16x128xf32, #tpu.memory_space<vmem>>) attributes {dimension_semantics = [#tpu.dimension_semantics<parallel>], iteration_bounds = array<i64: 1>, scalar_prefetch = 0 : i64, scratch_operands = 0 : i64, tpu.core_type = #tpu.core_type<tc>, window_params = [{transform_indices = @transform_0, window_bounds = array<i64: 16, 32>}, {transform_indices = @transform_1, window_bounds = array<i64: 16, 32>}, {pipeline_mode = #tpu.pipeline_mode<synchronous>, transform_indices = @transform_2, window_bounds = array<i64: 32, 256>}, {pipeline_mode = #tpu.pipeline_mode<synchronous>, transform_indices = @transform_3, window_bounds = array<i64: 32, 256>}, {pipeline_mode = #tpu.pipeline_mode<synchronous>, transform_indices = @transform_4, window_bounds = array<i64: 1, 256>}, {transform_indices = @transform_5, window_bounds = array<i64: 16, 128>}, {transform_indices = @transform_6, window_bounds = array<i64: 16, 128>}]} {
    %c0 = arith.constant 0 : index
    %c0_0 = arith.constant 0 : index
    %0 = vector.load %arg1[%c0, %c0_0] : memref<16x32xbf16, #tpu.memory_space<vmem>>, vector<16x32xbf16>
    %c0_1 = arith.constant 0 : index
    %c0_2 = arith.constant 0 : index
    %1 = vector.load %arg3[%c0_1, %c0_2] : memref<32x256xbf16, #tpu.memory_space<vmem>>, vector<32x256xbf16>
    %cst = arith.constant dense<0.000000e+00> : vector<16x256xf32>
    %2 = tpu.matmul %0, %1, %cst {dimension_numbers = #tpu.dot_dimension_numbers<[1], [0], [0], [1], [0, 0, 1, 1], [], []>} : vector<16x32xbf16>, vector<32x256xbf16>, vector<16x256xf32> -> vector<16x256xf32>
    %c0_3 = arith.constant 0 : index
    %c0_4 = arith.constant 0 : index
    %3 = vector.load %arg2[%c0_3, %c0_4] : memref<16x32xbf16, #tpu.memory_space<vmem>>, vector<16x32xbf16>
    %c0_5 = arith.constant 0 : index
    %c0_6 = arith.constant 0 : index
    %4 = vector.load %arg4[%c0_5, %c0_6] : memref<32x256xbf16, #tpu.memory_space<vmem>>, vector<32x256xbf16>
    %cst_7 = arith.constant dense<0.000000e+00> : vector<16x256xf32>
    %5 = tpu.matmul %3, %4, %cst_7 {dimension_numbers = #tpu.dot_dimension_numbers<[1], [0], [0], [1], [0, 0, 1, 1], [], []>} : vector<16x32xbf16>, vector<32x256xbf16>, vector<16x256xf32> -> vector<16x256xf32>
    %6 = arith.addf %2, %5 : vector<16x256xf32>
    %c0_8 = arith.constant 0 : index
    %c0_9 = arith.constant 0 : index
    %7 = vector.load %arg5[%c0_8, %c0_9] : memref<1x256xf32, #tpu.memory_space<vmem>>, vector<1x256xf32>
    %8 = vector.broadcast %7 : vector<1x256xf32> to vector<16x256xf32>
    %9 = arith.addf %6, %8 : vector<16x256xf32>
    %10 = vector.extract_strided_slice %9 {offsets = [0, 0], sizes = [16, 128], strides = [1, 1]} : vector<16x256xf32> to vector<16x128xf32>
    %c0_10 = arith.constant 0 : index
    %c0_11 = arith.constant 0 : index
    %11 = vector.load %arg6[%c0_10, %c0_11] : memref<16x128xf32, #tpu.memory_space<vmem>>, vector<16x128xf32>
    tpu.vector_store %arg6[%c0_10, %c0_11], %10 {strides = array<i32>} : memref<16x128xf32, #tpu.memory_space<vmem>>, vector<16x128xf32>,
    %12 = vector.extract_strided_slice %9 {offsets = [0, 128], sizes = [16, 128], strides = [1, 1]} : vector<16x256xf32> to vector<16x128xf32>
    %c0_12 = arith.constant 0 : index
    %c0_13 = arith.constant 0 : index
    %13 = vector.load %arg7[%c0_12, %c0_13] : memref<16x128xf32, #tpu.memory_space<vmem>>, vector<16x128xf32>
    tpu.vector_store %arg7[%c0_12, %c0_13], %12 {strides = array<i32>} : memref<16x128xf32, #tpu.memory_space<vmem>>, vector<16x128xf32>,
    return
  }
  func.func @transform_0(%arg0: i32) -> (i32, i32) {
    %c0_i32 = arith.constant 0 : i32
    %c0_i32_0 = arith.constant 0 : i32
    return %arg0, %c0_i32 : i32, i32
  }
  func.func @transform_1(%arg0: i32) -> (i32, i32) {
    %c0_i32 = arith.constant 0 : i32
    %c0_i32_0 = arith.constant 0 : i32
    return %arg0, %c0_i32 : i32, i32
  }
  func.func @transform_2(%arg0: i32) -> (i32, i32) {
    %c0_i32 = arith.constant 0 : i32
    %c0_i32_0 = arith.constant 0 : i32
    %c0_i32_1 = arith.constant 0 : i32
    return %c0_i32, %c0_i32_0 : i32, i32
  }
  func.func @transform_3(%arg0: i32) -> (i32, i32) {
    %c0_i32 = arith.constant 0 : i32
    %c0_i32_0 = arith.constant 0 : i32
    %c0_i32_1 = arith.constant 0 : i32
    return %c0_i32, %c0_i32_0 : i32, i32
  }
  func.func @transform_4(%arg0: i32) -> (i32, i32) {
    %c0_i32 = arith.constant 0 : i32
    %c0_i32_0 = arith.constant 0 : i32
    %c0_i32_1 = arith.constant 0 : i32
    return %c0_i32, %c0_i32_0 : i32, i32
  }
  func.func @transform_5(%arg0: i32) -> (i32, i32) {
    %c0_i32 = arith.constant 0 : i32
    %c0_i32_0 = arith.constant 0 : i32
    return %arg0, %c0_i32 : i32, i32
  }
  func.func @transform_6(%arg0: i32) -> (i32, i32) {
    %c0_i32 = arith.constant 0 : i32
    %c0_i32_0 = arith.constant 0 : i32
    return %arg0, %c0_i32 : i32, i32
  }
}

module attributes {stable_mosaic.version = 11 : i64} {
  func.func @_bilstm_rec_kernel(%arg0: i32, %arg1: memref<8x2x128xf32, #tpu.memory_space<vmem>>, %arg2: memref<8x2x128xf32, #tpu.memory_space<vmem>>, %arg3: memref<8x2x1xf32, #tpu.memory_space<vmem>>, %arg4: memref<8x2x1xf32, #tpu.memory_space<vmem>>, %arg5: memref<32x128xf32, #tpu.memory_space<vmem>>, %arg6: memref<32x128xf32, #tpu.memory_space<vmem>>, %arg7: memref<8x2x32xbf16, #tpu.memory_space<vmem>>, %arg8: memref<8x2x32xbf16, #tpu.memory_space<vmem>>, %arg9: memref<2x32xf32, #tpu.memory_space<vmem>>, %arg10: memref<2x32xf32, #tpu.memory_space<vmem>>, %arg11: memref<2x32xf32, #tpu.memory_space<vmem>>, %arg12: memref<2x32xf32, #tpu.memory_space<vmem>>) attributes {dimension_semantics = [#tpu.dimension_semantics<arbitrary>], iteration_bounds = array<i64: 1>, scalar_prefetch = 0 : i64, scratch_operands = 4 : i64, tpu.core_type = #tpu.core_type<tc>, window_params = [{transform_indices = @transform_0, window_bounds = array<i64: 8, 2, 128>}, {transform_indices = @transform_1, window_bounds = array<i64: 8, 2, 128>}, {transform_indices = @transform_2, window_bounds = array<i64: 8, 2, 1>}, {transform_indices = @transform_3, window_bounds = array<i64: 8, 2, 1>}, {pipeline_mode = #tpu.pipeline_mode<synchronous>, transform_indices = @transform_4, window_bounds = array<i64: 32, 128>}, {pipeline_mode = #tpu.pipeline_mode<synchronous>, transform_indices = @transform_5, window_bounds = array<i64: 32, 128>}, {transform_indices = @transform_6, window_bounds = array<i64: 8, 2, 32>}, {transform_indices = @transform_7, window_bounds = array<i64: 8, 2, 32>}]} {
    %c0_i32 = arith.constant 0 : i32
    %0 = arith.cmpi eq, %arg0, %c0_i32 : i32
    %1 = arith.extui %0 : i1 to i32
    %c0_i32_0 = arith.constant 0 : i32
    %2 = arith.cmpi ne, %1, %c0_i32_0 : i32
    scf.if %2 {
      %cst_364 = arith.constant 0.000000e+00 : f32
      %885 = vector.broadcast %cst_364 : f32 to vector<2x32xf32>
      %c0_365 = arith.constant 0 : index
      %c0_366 = arith.constant 0 : index
      %886 = vector.load %arg9[%c0_365, %c0_366] : memref<2x32xf32, #tpu.memory_space<vmem>>, vector<2x32xf32>
      tpu.vector_store %arg9[%c0_365, %c0_366], %885 {strides = array<i32>} : memref<2x32xf32, #tpu.memory_space<vmem>>, vector<2x32xf32>,
      %cst_367 = arith.constant 0.000000e+00 : f32
      %887 = vector.broadcast %cst_367 : f32 to vector<2x32xf32>
      %c0_368 = arith.constant 0 : index
      %c0_369 = arith.constant 0 : index
      %888 = vector.load %arg10[%c0_368, %c0_369] : memref<2x32xf32, #tpu.memory_space<vmem>>, vector<2x32xf32>
      tpu.vector_store %arg10[%c0_368, %c0_369], %887 {strides = array<i32>} : memref<2x32xf32, #tpu.memory_space<vmem>>, vector<2x32xf32>,
      %cst_370 = arith.constant 0.000000e+00 : f32
      %889 = vector.broadcast %cst_370 : f32 to vector<2x32xf32>
      %c0_371 = arith.constant 0 : index
      %c0_372 = arith.constant 0 : index
      %890 = vector.load %arg11[%c0_371, %c0_372] : memref<2x32xf32, #tpu.memory_space<vmem>>, vector<2x32xf32>
      tpu.vector_store %arg11[%c0_371, %c0_372], %889 {strides = array<i32>} : memref<2x32xf32, #tpu.memory_space<vmem>>, vector<2x32xf32>,
      %cst_373 = arith.constant 0.000000e+00 : f32
      %891 = vector.broadcast %cst_373 : f32 to vector<2x32xf32>
      %c0_374 = arith.constant 0 : index
      %c0_375 = arith.constant 0 : index
      %892 = vector.load %arg12[%c0_374, %c0_375] : memref<2x32xf32, #tpu.memory_space<vmem>>, vector<2x32xf32>
      tpu.vector_store %arg12[%c0_374, %c0_375], %891 {strides = array<i32>} : memref<2x32xf32, #tpu.memory_space<vmem>>, vector<2x32xf32>,
    } else {
    }
    %c0 = arith.constant 0 : index
    %c0_1 = arith.constant 0 : index
    %3 = vector.load %arg5[%c0, %c0_1] : memref<32x128xf32, #tpu.memory_space<vmem>>, vector<32x128xf32>
    %c0_2 = arith.constant 0 : index
    %c0_3 = arith.constant 0 : index
    %4 = vector.load %arg6[%c0_2, %c0_3] : memref<32x128xf32, #tpu.memory_space<vmem>>, vector<32x128xf32>
    %c0_4 = arith.constant 0 : index
    %c0_5 = arith.constant 0 : index
    %c0_6 = arith.constant 0 : index
    %5 = vector.load %arg1[%c0_4, %c0_5, %c0_6] : memref<8x2x128xf32, #tpu.memory_space<vmem>>, vector<1x2x128xf32>
    %6 = vector.shape_cast %5 : vector<1x2x128xf32> to vector<2x128xf32>
    %c0_7 = arith.constant 0 : index
    %c0_8 = arith.constant 0 : index
    %c0_9 = arith.constant 0 : index
    %7 = vector.load %arg3[%c0_7, %c0_8, %c0_9] : memref<8x2x1xf32, #tpu.memory_space<vmem>>, vector<1x2x1xf32>
    %8 = vector.shape_cast %7 : vector<1x2x1xf32> to vector<2x1xf32>
    %c0_10 = arith.constant 0 : index
    %c0_11 = arith.constant 0 : index
    %9 = vector.load %arg9[%c0_10, %c0_11] : memref<2x32xf32, #tpu.memory_space<vmem>>, vector<2x32xf32>
    %c0_12 = arith.constant 0 : index
    %c0_13 = arith.constant 0 : index
    %10 = vector.load %arg10[%c0_12, %c0_13] : memref<2x32xf32, #tpu.memory_space<vmem>>, vector<2x32xf32>
    %cst = arith.constant dense<0.000000e+00> : vector<2x128xf32>
    %11 = tpu.matmul %9, %3, %cst {dimension_numbers = #tpu.dot_dimension_numbers<[1], [0], [0], [1], [0, 0, 1, 1], [], []>} : vector<2x32xf32>, vector<32x128xf32>, vector<2x128xf32> -> vector<2x128xf32>
    %12 = arith.addf %6, %11 : vector<2x128xf32>
    %13 = vector.extract_strided_slice %12 {offsets = [0, 0], sizes = [2, 32], strides = [1, 1]} : vector<2x128xf32> to vector<2x32xf32>
    %14 = arith.negf %13 : vector<2x32xf32>
    %15 = math.exp %14 : vector<2x32xf32>
    %cst_14 = arith.constant 1.000000e+00 : f32
    %16 = vector.broadcast %cst_14 : f32 to vector<2x32xf32>
    %17 = arith.addf %16, %15 : vector<2x32xf32>
    %18 = arith.divf %16, %17 : vector<2x32xf32>
    %19 = vector.extract_strided_slice %12 {offsets = [0, 32], sizes = [2, 32], strides = [1, 1]} : vector<2x128xf32> to vector<2x32xf32>
    %20 = arith.negf %19 : vector<2x32xf32>
    %21 = math.exp %20 : vector<2x32xf32>
    %cst_15 = arith.constant 1.000000e+00 : f32
    %22 = vector.broadcast %cst_15 : f32 to vector<2x32xf32>
    %23 = arith.addf %22, %21 : vector<2x32xf32>
    %24 = arith.divf %22, %23 : vector<2x32xf32>
    %25 = vector.extract_strided_slice %12 {offsets = [0, 64], sizes = [2, 32], strides = [1, 1]} : vector<2x128xf32> to vector<2x32xf32>
    %26 = math.tanh %25 : vector<2x32xf32>
    %27 = vector.extract_strided_slice %12 {offsets = [0, 96], sizes = [2, 32], strides = [1, 1]} : vector<2x128xf32> to vector<2x32xf32>
    %28 = arith.negf %27 : vector<2x32xf32>
    %29 = math.exp %28 : vector<2x32xf32>
    %cst_16 = arith.constant 1.000000e+00 : f32
    %30 = vector.broadcast %cst_16 : f32 to vector<2x32xf32>
    %31 = arith.addf %30, %29 : vector<2x32xf32>
    %32 = arith.divf %30, %31 : vector<2x32xf32>
    %33 = arith.mulf %24, %10 : vector<2x32xf32>
    %34 = arith.mulf %18, %26 : vector<2x32xf32>
    %35 = arith.addf %33, %34 : vector<2x32xf32>
    %36 = math.tanh %35 : vector<2x32xf32>
    %37 = arith.mulf %32, %36 : vector<2x32xf32>
    %38 = vector.broadcast %8 : vector<2x1xf32> to vector<2x32xf32>
    %39 = arith.mulf %38, %37 : vector<2x32xf32>
    %cst_17 = arith.constant 1.000000e+00 : f32
    %40 = vector.broadcast %cst_17 : f32 to vector<2x1xf32>
    %41 = arith.subf %40, %8 : vector<2x1xf32>
    %42 = vector.broadcast %41 : vector<2x1xf32> to vector<2x32xf32>
    %43 = arith.mulf %42, %9 : vector<2x32xf32>
    %44 = arith.addf %39, %43 : vector<2x32xf32>
    %45 = vector.broadcast %8 : vector<2x1xf32> to vector<2x32xf32>
    %46 = arith.mulf %45, %35 : vector<2x32xf32>
    %cst_18 = arith.constant 1.000000e+00 : f32
    %47 = vector.broadcast %cst_18 : f32 to vector<2x1xf32>
    %48 = arith.subf %47, %8 : vector<2x1xf32>
    %49 = vector.broadcast %48 : vector<2x1xf32> to vector<2x32xf32>
    %50 = arith.mulf %49, %10 : vector<2x32xf32>
    %51 = arith.addf %46, %50 : vector<2x32xf32>
    %52 = vector.broadcast %8 : vector<2x1xf32> to vector<2x32xf32>
    %53 = arith.mulf %52, %37 : vector<2x32xf32>
    %c0_19 = arith.constant 0 : index
    %c0_20 = arith.constant 0 : index
    %54 = vector.load %arg9[%c0_19, %c0_20] : memref<2x32xf32, #tpu.memory_space<vmem>>, vector<2x32xf32>
    tpu.vector_store %arg9[%c0_19, %c0_20], %44 {strides = array<i32>} : memref<2x32xf32, #tpu.memory_space<vmem>>, vector<2x32xf32>,
    %c0_21 = arith.constant 0 : index
    %c0_22 = arith.constant 0 : index
    %55 = vector.load %arg10[%c0_21, %c0_22] : memref<2x32xf32, #tpu.memory_space<vmem>>, vector<2x32xf32>
    tpu.vector_store %arg10[%c0_21, %c0_22], %51 {strides = array<i32>} : memref<2x32xf32, #tpu.memory_space<vmem>>, vector<2x32xf32>,
    %56 = arith.truncf %53 : vector<2x32xf32> to vector<2x32xbf16>
    %c0_23 = arith.constant 0 : index
    %c0_24 = arith.constant 0 : index
    %c0_25 = arith.constant 0 : index
    %57 = vector.load %arg7[%c0_23, %c0_24, %c0_25] : memref<8x2x32xbf16, #tpu.memory_space<vmem>>, vector<1x2x32xbf16>
    %58 = vector.shape_cast %57 : vector<1x2x32xbf16> to vector<2x32xbf16>
    %59 = vector.shape_cast %56 : vector<2x32xbf16> to vector<1x2x32xbf16>
    tpu.vector_store %arg7[%c0_23, %c0_24, %c0_25], %59 {strides = array<i32>} : memref<8x2x32xbf16, #tpu.memory_space<vmem>>, vector<1x2x32xbf16>,
    %c7 = arith.constant 7 : index
    %c0_26 = arith.constant 0 : index
    %c0_27 = arith.constant 0 : index
    %60 = vector.load %arg2[%c7, %c0_26, %c0_27] : memref<8x2x128xf32, #tpu.memory_space<vmem>>, vector<1x2x128xf32>
    %61 = vector.shape_cast %60 : vector<1x2x128xf32> to vector<2x128xf32>
    %c7_28 = arith.constant 7 : index
    %c0_29 = arith.constant 0 : index
    %c0_30 = arith.constant 0 : index
    %62 = vector.load %arg4[%c7_28, %c0_29, %c0_30] : memref<8x2x1xf32, #tpu.memory_space<vmem>>, vector<1x2x1xf32>
    %63 = vector.shape_cast %62 : vector<1x2x1xf32> to vector<2x1xf32>
    %c0_31 = arith.constant 0 : index
    %c0_32 = arith.constant 0 : index
    %64 = vector.load %arg11[%c0_31, %c0_32] : memref<2x32xf32, #tpu.memory_space<vmem>>, vector<2x32xf32>
    %c0_33 = arith.constant 0 : index
    %c0_34 = arith.constant 0 : index
    %65 = vector.load %arg12[%c0_33, %c0_34] : memref<2x32xf32, #tpu.memory_space<vmem>>, vector<2x32xf32>
    %cst_35 = arith.constant dense<0.000000e+00> : vector<2x128xf32>
    %66 = tpu.matmul %64, %4, %cst_35 {dimension_numbers = #tpu.dot_dimension_numbers<[1], [0], [0], [1], [0, 0, 1, 1], [], []>} : vector<2x32xf32>, vector<32x128xf32>, vector<2x128xf32> -> vector<2x128xf32>
    %67 = arith.addf %61, %66 : vector<2x128xf32>
    %68 = vector.extract_strided_slice %67 {offsets = [0, 0], sizes = [2, 32], strides = [1, 1]} : vector<2x128xf32> to vector<2x32xf32>
    %69 = arith.negf %68 : vector<2x32xf32>
    %70 = math.exp %69 : vector<2x32xf32>
    %cst_36 = arith.constant 1.000000e+00 : f32
    %71 = vector.broadcast %cst_36 : f32 to vector<2x32xf32>
    %72 = arith.addf %71, %70 : vector<2x32xf32>
    %73 = arith.divf %71, %72 : vector<2x32xf32>
    %74 = vector.extract_strided_slice %67 {offsets = [0, 32], sizes = [2, 32], strides = [1, 1]} : vector<2x128xf32> to vector<2x32xf32>
    %75 = arith.negf %74 : vector<2x32xf32>
    %76 = math.exp %75 : vector<2x32xf32>
    %cst_37 = arith.constant 1.000000e+00 : f32
    %77 = vector.broadcast %cst_37 : f32 to vector<2x32xf32>
    %78 = arith.addf %77, %76 : vector<2x32xf32>
    %79 = arith.divf %77, %78 : vector<2x32xf32>
    %80 = vector.extract_strided_slice %67 {offsets = [0, 64], sizes = [2, 32], strides = [1, 1]} : vector<2x128xf32> to vector<2x32xf32>
    %81 = math.tanh %80 : vector<2x32xf32>
    %82 = vector.extract_strided_slice %67 {offsets = [0, 96], sizes = [2, 32], strides = [1, 1]} : vector<2x128xf32> to vector<2x32xf32>
    %83 = arith.negf %82 : vector<2x32xf32>
    %84 = math.exp %83 : vector<2x32xf32>
    %cst_38 = arith.constant 1.000000e+00 : f32
    %85 = vector.broadcast %cst_38 : f32 to vector<2x32xf32>
    %86 = arith.addf %85, %84 : vector<2x32xf32>
    %87 = arith.divf %85, %86 : vector<2x32xf32>
    %88 = arith.mulf %79, %65 : vector<2x32xf32>
    %89 = arith.mulf %73, %81 : vector<2x32xf32>
    %90 = arith.addf %88, %89 : vector<2x32xf32>
    %91 = math.tanh %90 : vector<2x32xf32>
    %92 = arith.mulf %87, %91 : vector<2x32xf32>
    %93 = vector.broadcast %63 : vector<2x1xf32> to vector<2x32xf32>
    %94 = arith.mulf %93, %92 : vector<2x32xf32>
    %cst_39 = arith.constant 1.000000e+00 : f32
    %95 = vector.broadcast %cst_39 : f32 to vector<2x1xf32>
    %96 = arith.subf %95, %63 : vector<2x1xf32>
    %97 = vector.broadcast %96 : vector<2x1xf32> to vector<2x32xf32>
    %98 = arith.mulf %97, %64 : vector<2x32xf32>
    %99 = arith.addf %94, %98 : vector<2x32xf32>
    %100 = vector.broadcast %63 : vector<2x1xf32> to vector<2x32xf32>
    %101 = arith.mulf %100, %90 : vector<2x32xf32>
    %cst_40 = arith.constant 1.000000e+00 : f32
    %102 = vector.broadcast %cst_40 : f32 to vector<2x1xf32>
    %103 = arith.subf %102, %63 : vector<2x1xf32>
    %104 = vector.broadcast %103 : vector<2x1xf32> to vector<2x32xf32>
    %105 = arith.mulf %104, %65 : vector<2x32xf32>
    %106 = arith.addf %101, %105 : vector<2x32xf32>
    %107 = vector.broadcast %63 : vector<2x1xf32> to vector<2x32xf32>
    %108 = arith.mulf %107, %92 : vector<2x32xf32>
    %c0_41 = arith.constant 0 : index
    %c0_42 = arith.constant 0 : index
    %109 = vector.load %arg11[%c0_41, %c0_42] : memref<2x32xf32, #tpu.memory_space<vmem>>, vector<2x32xf32>
    tpu.vector_store %arg11[%c0_41, %c0_42], %99 {strides = array<i32>} : memref<2x32xf32, #tpu.memory_space<vmem>>, vector<2x32xf32>,
    %c0_43 = arith.constant 0 : index
    %c0_44 = arith.constant 0 : index
    %110 = vector.load %arg12[%c0_43, %c0_44] : memref<2x32xf32, #tpu.memory_space<vmem>>, vector<2x32xf32>
    tpu.vector_store %arg12[%c0_43, %c0_44], %106 {strides = array<i32>} : memref<2x32xf32, #tpu.memory_space<vmem>>, vector<2x32xf32>,
    %111 = arith.truncf %108 : vector<2x32xf32> to vector<2x32xbf16>
    %c7_45 = arith.constant 7 : index
    %c0_46 = arith.constant 0 : index
    %c0_47 = arith.constant 0 : index
    %112 = vector.load %arg8[%c7_45, %c0_46, %c0_47] : memref<8x2x32xbf16, #tpu.memory_space<vmem>>, vector<1x2x32xbf16>
    %113 = vector.shape_cast %112 : vector<1x2x32xbf16> to vector<2x32xbf16>
    %114 = vector.shape_cast %111 : vector<2x32xbf16> to vector<1x2x32xbf16>
    tpu.vector_store %arg8[%c7_45, %c0_46, %c0_47], %114 {strides = array<i32>} : memref<8x2x32xbf16, #tpu.memory_space<vmem>>, vector<1x2x32xbf16>,
    %c1 = arith.constant 1 : index
    %c0_48 = arith.constant 0 : index
    %c0_49 = arith.constant 0 : index
    %115 = vector.load %arg1[%c1, %c0_48, %c0_49] : memref<8x2x128xf32, #tpu.memory_space<vmem>>, vector<1x2x128xf32>
    %116 = vector.shape_cast %115 : vector<1x2x128xf32> to vector<2x128xf32>
    %c1_50 = arith.constant 1 : index
    %c0_51 = arith.constant 0 : index
    %c0_52 = arith.constant 0 : index
    %117 = vector.load %arg3[%c1_50, %c0_51, %c0_52] : memref<8x2x1xf32, #tpu.memory_space<vmem>>, vector<1x2x1xf32>
    %118 = vector.shape_cast %117 : vector<1x2x1xf32> to vector<2x1xf32>
    %c0_53 = arith.constant 0 : index
    %c0_54 = arith.constant 0 : index
    %119 = vector.load %arg9[%c0_53, %c0_54] : memref<2x32xf32, #tpu.memory_space<vmem>>, vector<2x32xf32>
    %c0_55 = arith.constant 0 : index
    %c0_56 = arith.constant 0 : index
    %120 = vector.load %arg10[%c0_55, %c0_56] : memref<2x32xf32, #tpu.memory_space<vmem>>, vector<2x32xf32>
    %cst_57 = arith.constant dense<0.000000e+00> : vector<2x128xf32>
    %121 = tpu.matmul %119, %3, %cst_57 {dimension_numbers = #tpu.dot_dimension_numbers<[1], [0], [0], [1], [0, 0, 1, 1], [], []>} : vector<2x32xf32>, vector<32x128xf32>, vector<2x128xf32> -> vector<2x128xf32>
    %122 = arith.addf %116, %121 : vector<2x128xf32>
    %123 = vector.extract_strided_slice %122 {offsets = [0, 0], sizes = [2, 32], strides = [1, 1]} : vector<2x128xf32> to vector<2x32xf32>
    %124 = arith.negf %123 : vector<2x32xf32>
    %125 = math.exp %124 : vector<2x32xf32>
    %cst_58 = arith.constant 1.000000e+00 : f32
    %126 = vector.broadcast %cst_58 : f32 to vector<2x32xf32>
    %127 = arith.addf %126, %125 : vector<2x32xf32>
    %128 = arith.divf %126, %127 : vector<2x32xf32>
    %129 = vector.extract_strided_slice %122 {offsets = [0, 32], sizes = [2, 32], strides = [1, 1]} : vector<2x128xf32> to vector<2x32xf32>
    %130 = arith.negf %129 : vector<2x32xf32>
    %131 = math.exp %130 : vector<2x32xf32>
    %cst_59 = arith.constant 1.000000e+00 : f32
    %132 = vector.broadcast %cst_59 : f32 to vector<2x32xf32>
    %133 = arith.addf %132, %131 : vector<2x32xf32>
    %134 = arith.divf %132, %133 : vector<2x32xf32>
    %135 = vector.extract_strided_slice %122 {offsets = [0, 64], sizes = [2, 32], strides = [1, 1]} : vector<2x128xf32> to vector<2x32xf32>
    %136 = math.tanh %135 : vector<2x32xf32>
    %137 = vector.extract_strided_slice %122 {offsets = [0, 96], sizes = [2, 32], strides = [1, 1]} : vector<2x128xf32> to vector<2x32xf32>
    %138 = arith.negf %137 : vector<2x32xf32>
    %139 = math.exp %138 : vector<2x32xf32>
    %cst_60 = arith.constant 1.000000e+00 : f32
    %140 = vector.broadcast %cst_60 : f32 to vector<2x32xf32>
    %141 = arith.addf %140, %139 : vector<2x32xf32>
    %142 = arith.divf %140, %141 : vector<2x32xf32>
    %143 = arith.mulf %134, %120 : vector<2x32xf32>
    %144 = arith.mulf %128, %136 : vector<2x32xf32>
    %145 = arith.addf %143, %144 : vector<2x32xf32>
    %146 = math.tanh %145 : vector<2x32xf32>
    %147 = arith.mulf %142, %146 : vector<2x32xf32>
    %148 = vector.broadcast %118 : vector<2x1xf32> to vector<2x32xf32>
    %149 = arith.mulf %148, %147 : vector<2x32xf32>
    %cst_61 = arith.constant 1.000000e+00 : f32
    %150 = vector.broadcast %cst_61 : f32 to vector<2x1xf32>
    %151 = arith.subf %150, %118 : vector<2x1xf32>
    %152 = vector.broadcast %151 : vector<2x1xf32> to vector<2x32xf32>
    %153 = arith.mulf %152, %119 : vector<2x32xf32>
    %154 = arith.addf %149, %153 : vector<2x32xf32>
    %155 = vector.broadcast %118 : vector<2x1xf32> to vector<2x32xf32>
    %156 = arith.mulf %155, %145 : vector<2x32xf32>
    %cst_62 = arith.constant 1.000000e+00 : f32
    %157 = vector.broadcast %cst_62 : f32 to vector<2x1xf32>
    %158 = arith.subf %157, %118 : vector<2x1xf32>
    %159 = vector.broadcast %158 : vector<2x1xf32> to vector<2x32xf32>
    %160 = arith.mulf %159, %120 : vector<2x32xf32>
    %161 = arith.addf %156, %160 : vector<2x32xf32>
    %162 = vector.broadcast %118 : vector<2x1xf32> to vector<2x32xf32>
    %163 = arith.mulf %162, %147 : vector<2x32xf32>
    %c0_63 = arith.constant 0 : index
    %c0_64 = arith.constant 0 : index
    %164 = vector.load %arg9[%c0_63, %c0_64] : memref<2x32xf32, #tpu.memory_space<vmem>>, vector<2x32xf32>
    tpu.vector_store %arg9[%c0_63, %c0_64], %154 {strides = array<i32>} : memref<2x32xf32, #tpu.memory_space<vmem>>, vector<2x32xf32>,
    %c0_65 = arith.constant 0 : index
    %c0_66 = arith.constant 0 : index
    %165 = vector.load %arg10[%c0_65, %c0_66] : memref<2x32xf32, #tpu.memory_space<vmem>>, vector<2x32xf32>
    tpu.vector_store %arg10[%c0_65, %c0_66], %161 {strides = array<i32>} : memref<2x32xf32, #tpu.memory_space<vmem>>, vector<2x32xf32>,
    %166 = arith.truncf %163 : vector<2x32xf32> to vector<2x32xbf16>
    %c1_67 = arith.constant 1 : index
    %c0_68 = arith.constant 0 : index
    %c0_69 = arith.constant 0 : index
    %167 = vector.load %arg7[%c1_67, %c0_68, %c0_69] : memref<8x2x32xbf16, #tpu.memory_space<vmem>>, vector<1x2x32xbf16>
    %168 = vector.shape_cast %167 : vector<1x2x32xbf16> to vector<2x32xbf16>
    %169 = vector.shape_cast %166 : vector<2x32xbf16> to vector<1x2x32xbf16>
    tpu.vector_store %arg7[%c1_67, %c0_68, %c0_69], %169 {strides = array<i32>} : memref<8x2x32xbf16, #tpu.memory_space<vmem>>, vector<1x2x32xbf16>,
    %c6 = arith.constant 6 : index
    %c0_70 = arith.constant 0 : index
    %c0_71 = arith.constant 0 : index
    %170 = vector.load %arg2[%c6, %c0_70, %c0_71] : memref<8x2x128xf32, #tpu.memory_space<vmem>>, vector<1x2x128xf32>
    %171 = vector.shape_cast %170 : vector<1x2x128xf32> to vector<2x128xf32>
    %c6_72 = arith.constant 6 : index
    %c0_73 = arith.constant 0 : index
    %c0_74 = arith.constant 0 : index
    %172 = vector.load %arg4[%c6_72, %c0_73, %c0_74] : memref<8x2x1xf32, #tpu.memory_space<vmem>>, vector<1x2x1xf32>
    %173 = vector.shape_cast %172 : vector<1x2x1xf32> to vector<2x1xf32>
    %c0_75 = arith.constant 0 : index
    %c0_76 = arith.constant 0 : index
    %174 = vector.load %arg11[%c0_75, %c0_76] : memref<2x32xf32, #tpu.memory_space<vmem>>, vector<2x32xf32>
    %c0_77 = arith.constant 0 : index
    %c0_78 = arith.constant 0 : index
    %175 = vector.load %arg12[%c0_77, %c0_78] : memref<2x32xf32, #tpu.memory_space<vmem>>, vector<2x32xf32>
    %cst_79 = arith.constant dense<0.000000e+00> : vector<2x128xf32>
    %176 = tpu.matmul %174, %4, %cst_79 {dimension_numbers = #tpu.dot_dimension_numbers<[1], [0], [0], [1], [0, 0, 1, 1], [], []>} : vector<2x32xf32>, vector<32x128xf32>, vector<2x128xf32> -> vector<2x128xf32>
    %177 = arith.addf %171, %176 : vector<2x128xf32>
    %178 = vector.extract_strided_slice %177 {offsets = [0, 0], sizes = [2, 32], strides = [1, 1]} : vector<2x128xf32> to vector<2x32xf32>
    %179 = arith.negf %178 : vector<2x32xf32>
    %180 = math.exp %179 : vector<2x32xf32>
    %cst_80 = arith.constant 1.000000e+00 : f32
    %181 = vector.broadcast %cst_80 : f32 to vector<2x32xf32>
    %182 = arith.addf %181, %180 : vector<2x32xf32>
    %183 = arith.divf %181, %182 : vector<2x32xf32>
    %184 = vector.extract_strided_slice %177 {offsets = [0, 32], sizes = [2, 32], strides = [1, 1]} : vector<2x128xf32> to vector<2x32xf32>
    %185 = arith.negf %184 : vector<2x32xf32>
    %186 = math.exp %185 : vector<2x32xf32>
    %cst_81 = arith.constant 1.000000e+00 : f32
    %187 = vector.broadcast %cst_81 : f32 to vector<2x32xf32>
    %188 = arith.addf %187, %186 : vector<2x32xf32>
    %189 = arith.divf %187, %188 : vector<2x32xf32>
    %190 = vector.extract_strided_slice %177 {offsets = [0, 64], sizes = [2, 32], strides = [1, 1]} : vector<2x128xf32> to vector<2x32xf32>
    %191 = math.tanh %190 : vector<2x32xf32>
    %192 = vector.extract_strided_slice %177 {offsets = [0, 96], sizes = [2, 32], strides = [1, 1]} : vector<2x128xf32> to vector<2x32xf32>
    %193 = arith.negf %192 : vector<2x32xf32>
    %194 = math.exp %193 : vector<2x32xf32>
    %cst_82 = arith.constant 1.000000e+00 : f32
    %195 = vector.broadcast %cst_82 : f32 to vector<2x32xf32>
    %196 = arith.addf %195, %194 : vector<2x32xf32>
    %197 = arith.divf %195, %196 : vector<2x32xf32>
    %198 = arith.mulf %189, %175 : vector<2x32xf32>
    %199 = arith.mulf %183, %191 : vector<2x32xf32>
    %200 = arith.addf %198, %199 : vector<2x32xf32>
    %201 = math.tanh %200 : vector<2x32xf32>
    %202 = arith.mulf %197, %201 : vector<2x32xf32>
    %203 = vector.broadcast %173 : vector<2x1xf32> to vector<2x32xf32>
    %204 = arith.mulf %203, %202 : vector<2x32xf32>
    %cst_83 = arith.constant 1.000000e+00 : f32
    %205 = vector.broadcast %cst_83 : f32 to vector<2x1xf32>
    %206 = arith.subf %205, %173 : vector<2x1xf32>
    %207 = vector.broadcast %206 : vector<2x1xf32> to vector<2x32xf32>
    %208 = arith.mulf %207, %174 : vector<2x32xf32>
    %209 = arith.addf %204, %208 : vector<2x32xf32>
    %210 = vector.broadcast %173 : vector<2x1xf32> to vector<2x32xf32>
    %211 = arith.mulf %210, %200 : vector<2x32xf32>
    %cst_84 = arith.constant 1.000000e+00 : f32
    %212 = vector.broadcast %cst_84 : f32 to vector<2x1xf32>
    %213 = arith.subf %212, %173 : vector<2x1xf32>
    %214 = vector.broadcast %213 : vector<2x1xf32> to vector<2x32xf32>
    %215 = arith.mulf %214, %175 : vector<2x32xf32>
    %216 = arith.addf %211, %215 : vector<2x32xf32>
    %217 = vector.broadcast %173 : vector<2x1xf32> to vector<2x32xf32>
    %218 = arith.mulf %217, %202 : vector<2x32xf32>
    %c0_85 = arith.constant 0 : index
    %c0_86 = arith.constant 0 : index
    %219 = vector.load %arg11[%c0_85, %c0_86] : memref<2x32xf32, #tpu.memory_space<vmem>>, vector<2x32xf32>
    tpu.vector_store %arg11[%c0_85, %c0_86], %209 {strides = array<i32>} : memref<2x32xf32, #tpu.memory_space<vmem>>, vector<2x32xf32>,
    %c0_87 = arith.constant 0 : index
    %c0_88 = arith.constant 0 : index
    %220 = vector.load %arg12[%c0_87, %c0_88] : memref<2x32xf32, #tpu.memory_space<vmem>>, vector<2x32xf32>
    tpu.vector_store %arg12[%c0_87, %c0_88], %216 {strides = array<i32>} : memref<2x32xf32, #tpu.memory_space<vmem>>, vector<2x32xf32>,
    %221 = arith.truncf %218 : vector<2x32xf32> to vector<2x32xbf16>
    %c6_89 = arith.constant 6 : index
    %c0_90 = arith.constant 0 : index
    %c0_91 = arith.constant 0 : index
    %222 = vector.load %arg8[%c6_89, %c0_90, %c0_91] : memref<8x2x32xbf16, #tpu.memory_space<vmem>>, vector<1x2x32xbf16>
    %223 = vector.shape_cast %222 : vector<1x2x32xbf16> to vector<2x32xbf16>
    %224 = vector.shape_cast %221 : vector<2x32xbf16> to vector<1x2x32xbf16>
    tpu.vector_store %arg8[%c6_89, %c0_90, %c0_91], %224 {strides = array<i32>} : memref<8x2x32xbf16, #tpu.memory_space<vmem>>, vector<1x2x32xbf16>,
    %c2 = arith.constant 2 : index
    %c0_92 = arith.constant 0 : index
    %c0_93 = arith.constant 0 : index
    %225 = vector.load %arg1[%c2, %c0_92, %c0_93] : memref<8x2x128xf32, #tpu.memory_space<vmem>>, vector<1x2x128xf32>
    %226 = vector.shape_cast %225 : vector<1x2x128xf32> to vector<2x128xf32>
    %c2_94 = arith.constant 2 : index
    %c0_95 = arith.constant 0 : index
    %c0_96 = arith.constant 0 : index
    %227 = vector.load %arg3[%c2_94, %c0_95, %c0_96] : memref<8x2x1xf32, #tpu.memory_space<vmem>>, vector<1x2x1xf32>
    %228 = vector.shape_cast %227 : vector<1x2x1xf32> to vector<2x1xf32>
    %c0_97 = arith.constant 0 : index
    %c0_98 = arith.constant 0 : index
    %229 = vector.load %arg9[%c0_97, %c0_98] : memref<2x32xf32, #tpu.memory_space<vmem>>, vector<2x32xf32>
    %c0_99 = arith.constant 0 : index
    %c0_100 = arith.constant 0 : index
    %230 = vector.load %arg10[%c0_99, %c0_100] : memref<2x32xf32, #tpu.memory_space<vmem>>, vector<2x32xf32>
    %cst_101 = arith.constant dense<0.000000e+00> : vector<2x128xf32>
    %231 = tpu.matmul %229, %3, %cst_101 {dimension_numbers = #tpu.dot_dimension_numbers<[1], [0], [0], [1], [0, 0, 1, 1], [], []>} : vector<2x32xf32>, vector<32x128xf32>, vector<2x128xf32> -> vector<2x128xf32>
    %232 = arith.addf %226, %231 : vector<2x128xf32>
    %233 = vector.extract_strided_slice %232 {offsets = [0, 0], sizes = [2, 32], strides = [1, 1]} : vector<2x128xf32> to vector<2x32xf32>
    %234 = arith.negf %233 : vector<2x32xf32>
    %235 = math.exp %234 : vector<2x32xf32>
    %cst_102 = arith.constant 1.000000e+00 : f32
    %236 = vector.broadcast %cst_102 : f32 to vector<2x32xf32>
    %237 = arith.addf %236, %235 : vector<2x32xf32>
    %238 = arith.divf %236, %237 : vector<2x32xf32>
    %239 = vector.extract_strided_slice %232 {offsets = [0, 32], sizes = [2, 32], strides = [1, 1]} : vector<2x128xf32> to vector<2x32xf32>
    %240 = arith.negf %239 : vector<2x32xf32>
    %241 = math.exp %240 : vector<2x32xf32>
    %cst_103 = arith.constant 1.000000e+00 : f32
    %242 = vector.broadcast %cst_103 : f32 to vector<2x32xf32>
    %243 = arith.addf %242, %241 : vector<2x32xf32>
    %244 = arith.divf %242, %243 : vector<2x32xf32>
    %245 = vector.extract_strided_slice %232 {offsets = [0, 64], sizes = [2, 32], strides = [1, 1]} : vector<2x128xf32> to vector<2x32xf32>
    %246 = math.tanh %245 : vector<2x32xf32>
    %247 = vector.extract_strided_slice %232 {offsets = [0, 96], sizes = [2, 32], strides = [1, 1]} : vector<2x128xf32> to vector<2x32xf32>
    %248 = arith.negf %247 : vector<2x32xf32>
    %249 = math.exp %248 : vector<2x32xf32>
    %cst_104 = arith.constant 1.000000e+00 : f32
    %250 = vector.broadcast %cst_104 : f32 to vector<2x32xf32>
    %251 = arith.addf %250, %249 : vector<2x32xf32>
    %252 = arith.divf %250, %251 : vector<2x32xf32>
    %253 = arith.mulf %244, %230 : vector<2x32xf32>
    %254 = arith.mulf %238, %246 : vector<2x32xf32>
    %255 = arith.addf %253, %254 : vector<2x32xf32>
    %256 = math.tanh %255 : vector<2x32xf32>
    %257 = arith.mulf %252, %256 : vector<2x32xf32>
    %258 = vector.broadcast %228 : vector<2x1xf32> to vector<2x32xf32>
    %259 = arith.mulf %258, %257 : vector<2x32xf32>
    %cst_105 = arith.constant 1.000000e+00 : f32
    %260 = vector.broadcast %cst_105 : f32 to vector<2x1xf32>
    %261 = arith.subf %260, %228 : vector<2x1xf32>
    %262 = vector.broadcast %261 : vector<2x1xf32> to vector<2x32xf32>
    %263 = arith.mulf %262, %229 : vector<2x32xf32>
    %264 = arith.addf %259, %263 : vector<2x32xf32>
    %265 = vector.broadcast %228 : vector<2x1xf32> to vector<2x32xf32>
    %266 = arith.mulf %265, %255 : vector<2x32xf32>
    %cst_106 = arith.constant 1.000000e+00 : f32
    %267 = vector.broadcast %cst_106 : f32 to vector<2x1xf32>
    %268 = arith.subf %267, %228 : vector<2x1xf32>
    %269 = vector.broadcast %268 : vector<2x1xf32> to vector<2x32xf32>
    %270 = arith.mulf %269, %230 : vector<2x32xf32>
    %271 = arith.addf %266, %270 : vector<2x32xf32>
    %272 = vector.broadcast %228 : vector<2x1xf32> to vector<2x32xf32>
    %273 = arith.mulf %272, %257 : vector<2x32xf32>
    %c0_107 = arith.constant 0 : index
    %c0_108 = arith.constant 0 : index
    %274 = vector.load %arg9[%c0_107, %c0_108] : memref<2x32xf32, #tpu.memory_space<vmem>>, vector<2x32xf32>
    tpu.vector_store %arg9[%c0_107, %c0_108], %264 {strides = array<i32>} : memref<2x32xf32, #tpu.memory_space<vmem>>, vector<2x32xf32>,
    %c0_109 = arith.constant 0 : index
    %c0_110 = arith.constant 0 : index
    %275 = vector.load %arg10[%c0_109, %c0_110] : memref<2x32xf32, #tpu.memory_space<vmem>>, vector<2x32xf32>
    tpu.vector_store %arg10[%c0_109, %c0_110], %271 {strides = array<i32>} : memref<2x32xf32, #tpu.memory_space<vmem>>, vector<2x32xf32>,
    %276 = arith.truncf %273 : vector<2x32xf32> to vector<2x32xbf16>
    %c2_111 = arith.constant 2 : index
    %c0_112 = arith.constant 0 : index
    %c0_113 = arith.constant 0 : index
    %277 = vector.load %arg7[%c2_111, %c0_112, %c0_113] : memref<8x2x32xbf16, #tpu.memory_space<vmem>>, vector<1x2x32xbf16>
    %278 = vector.shape_cast %277 : vector<1x2x32xbf16> to vector<2x32xbf16>
    %279 = vector.shape_cast %276 : vector<2x32xbf16> to vector<1x2x32xbf16>
    tpu.vector_store %arg7[%c2_111, %c0_112, %c0_113], %279 {strides = array<i32>} : memref<8x2x32xbf16, #tpu.memory_space<vmem>>, vector<1x2x32xbf16>,
    %c5 = arith.constant 5 : index
    %c0_114 = arith.constant 0 : index
    %c0_115 = arith.constant 0 : index
    %280 = vector.load %arg2[%c5, %c0_114, %c0_115] : memref<8x2x128xf32, #tpu.memory_space<vmem>>, vector<1x2x128xf32>
    %281 = vector.shape_cast %280 : vector<1x2x128xf32> to vector<2x128xf32>
    %c5_116 = arith.constant 5 : index
    %c0_117 = arith.constant 0 : index
    %c0_118 = arith.constant 0 : index
    %282 = vector.load %arg4[%c5_116, %c0_117, %c0_118] : memref<8x2x1xf32, #tpu.memory_space<vmem>>, vector<1x2x1xf32>
    %283 = vector.shape_cast %282 : vector<1x2x1xf32> to vector<2x1xf32>
    %c0_119 = arith.constant 0 : index
    %c0_120 = arith.constant 0 : index
    %284 = vector.load %arg11[%c0_119, %c0_120] : memref<2x32xf32, #tpu.memory_space<vmem>>, vector<2x32xf32>
    %c0_121 = arith.constant 0 : index
    %c0_122 = arith.constant 0 : index
    %285 = vector.load %arg12[%c0_121, %c0_122] : memref<2x32xf32, #tpu.memory_space<vmem>>, vector<2x32xf32>
    %cst_123 = arith.constant dense<0.000000e+00> : vector<2x128xf32>
    %286 = tpu.matmul %284, %4, %cst_123 {dimension_numbers = #tpu.dot_dimension_numbers<[1], [0], [0], [1], [0, 0, 1, 1], [], []>} : vector<2x32xf32>, vector<32x128xf32>, vector<2x128xf32> -> vector<2x128xf32>
    %287 = arith.addf %281, %286 : vector<2x128xf32>
    %288 = vector.extract_strided_slice %287 {offsets = [0, 0], sizes = [2, 32], strides = [1, 1]} : vector<2x128xf32> to vector<2x32xf32>
    %289 = arith.negf %288 : vector<2x32xf32>
    %290 = math.exp %289 : vector<2x32xf32>
    %cst_124 = arith.constant 1.000000e+00 : f32
    %291 = vector.broadcast %cst_124 : f32 to vector<2x32xf32>
    %292 = arith.addf %291, %290 : vector<2x32xf32>
    %293 = arith.divf %291, %292 : vector<2x32xf32>
    %294 = vector.extract_strided_slice %287 {offsets = [0, 32], sizes = [2, 32], strides = [1, 1]} : vector<2x128xf32> to vector<2x32xf32>
    %295 = arith.negf %294 : vector<2x32xf32>
    %296 = math.exp %295 : vector<2x32xf32>
    %cst_125 = arith.constant 1.000000e+00 : f32
    %297 = vector.broadcast %cst_125 : f32 to vector<2x32xf32>
    %298 = arith.addf %297, %296 : vector<2x32xf32>
    %299 = arith.divf %297, %298 : vector<2x32xf32>
    %300 = vector.extract_strided_slice %287 {offsets = [0, 64], sizes = [2, 32], strides = [1, 1]} : vector<2x128xf32> to vector<2x32xf32>
    %301 = math.tanh %300 : vector<2x32xf32>
    %302 = vector.extract_strided_slice %287 {offsets = [0, 96], sizes = [2, 32], strides = [1, 1]} : vector<2x128xf32> to vector<2x32xf32>
    %303 = arith.negf %302 : vector<2x32xf32>
    %304 = math.exp %303 : vector<2x32xf32>
    %cst_126 = arith.constant 1.000000e+00 : f32
    %305 = vector.broadcast %cst_126 : f32 to vector<2x32xf32>
    %306 = arith.addf %305, %304 : vector<2x32xf32>
    %307 = arith.divf %305, %306 : vector<2x32xf32>
    %308 = arith.mulf %299, %285 : vector<2x32xf32>
    %309 = arith.mulf %293, %301 : vector<2x32xf32>
    %310 = arith.addf %308, %309 : vector<2x32xf32>
    %311 = math.tanh %310 : vector<2x32xf32>
    %312 = arith.mulf %307, %311 : vector<2x32xf32>
    %313 = vector.broadcast %283 : vector<2x1xf32> to vector<2x32xf32>
    %314 = arith.mulf %313, %312 : vector<2x32xf32>
    %cst_127 = arith.constant 1.000000e+00 : f32
    %315 = vector.broadcast %cst_127 : f32 to vector<2x1xf32>
    %316 = arith.subf %315, %283 : vector<2x1xf32>
    %317 = vector.broadcast %316 : vector<2x1xf32> to vector<2x32xf32>
    %318 = arith.mulf %317, %284 : vector<2x32xf32>
    %319 = arith.addf %314, %318 : vector<2x32xf32>
    %320 = vector.broadcast %283 : vector<2x1xf32> to vector<2x32xf32>
    %321 = arith.mulf %320, %310 : vector<2x32xf32>
    %cst_128 = arith.constant 1.000000e+00 : f32
    %322 = vector.broadcast %cst_128 : f32 to vector<2x1xf32>
    %323 = arith.subf %322, %283 : vector<2x1xf32>
    %324 = vector.broadcast %323 : vector<2x1xf32> to vector<2x32xf32>
    %325 = arith.mulf %324, %285 : vector<2x32xf32>
    %326 = arith.addf %321, %325 : vector<2x32xf32>
    %327 = vector.broadcast %283 : vector<2x1xf32> to vector<2x32xf32>
    %328 = arith.mulf %327, %312 : vector<2x32xf32>
    %c0_129 = arith.constant 0 : index
    %c0_130 = arith.constant 0 : index
    %329 = vector.load %arg11[%c0_129, %c0_130] : memref<2x32xf32, #tpu.memory_space<vmem>>, vector<2x32xf32>
    tpu.vector_store %arg11[%c0_129, %c0_130], %319 {strides = array<i32>} : memref<2x32xf32, #tpu.memory_space<vmem>>, vector<2x32xf32>,
    %c0_131 = arith.constant 0 : index
    %c0_132 = arith.constant 0 : index
    %330 = vector.load %arg12[%c0_131, %c0_132] : memref<2x32xf32, #tpu.memory_space<vmem>>, vector<2x32xf32>
    tpu.vector_store %arg12[%c0_131, %c0_132], %326 {strides = array<i32>} : memref<2x32xf32, #tpu.memory_space<vmem>>, vector<2x32xf32>,
    %331 = arith.truncf %328 : vector<2x32xf32> to vector<2x32xbf16>
    %c5_133 = arith.constant 5 : index
    %c0_134 = arith.constant 0 : index
    %c0_135 = arith.constant 0 : index
    %332 = vector.load %arg8[%c5_133, %c0_134, %c0_135] : memref<8x2x32xbf16, #tpu.memory_space<vmem>>, vector<1x2x32xbf16>
    %333 = vector.shape_cast %332 : vector<1x2x32xbf16> to vector<2x32xbf16>
    %334 = vector.shape_cast %331 : vector<2x32xbf16> to vector<1x2x32xbf16>
    tpu.vector_store %arg8[%c5_133, %c0_134, %c0_135], %334 {strides = array<i32>} : memref<8x2x32xbf16, #tpu.memory_space<vmem>>, vector<1x2x32xbf16>,
    %c3 = arith.constant 3 : index
    %c0_136 = arith.constant 0 : index
    %c0_137 = arith.constant 0 : index
    %335 = vector.load %arg1[%c3, %c0_136, %c0_137] : memref<8x2x128xf32, #tpu.memory_space<vmem>>, vector<1x2x128xf32>
    %336 = vector.shape_cast %335 : vector<1x2x128xf32> to vector<2x128xf32>
    %c3_138 = arith.constant 3 : index
    %c0_139 = arith.constant 0 : index
    %c0_140 = arith.constant 0 : index
    %337 = vector.load %arg3[%c3_138, %c0_139, %c0_140] : memref<8x2x1xf32, #tpu.memory_space<vmem>>, vector<1x2x1xf32>
    %338 = vector.shape_cast %337 : vector<1x2x1xf32> to vector<2x1xf32>
    %c0_141 = arith.constant 0 : index
    %c0_142 = arith.constant 0 : index
    %339 = vector.load %arg9[%c0_141, %c0_142] : memref<2x32xf32, #tpu.memory_space<vmem>>, vector<2x32xf32>
    %c0_143 = arith.constant 0 : index
    %c0_144 = arith.constant 0 : index
    %340 = vector.load %arg10[%c0_143, %c0_144] : memref<2x32xf32, #tpu.memory_space<vmem>>, vector<2x32xf32>
    %cst_145 = arith.constant dense<0.000000e+00> : vector<2x128xf32>
    %341 = tpu.matmul %339, %3, %cst_145 {dimension_numbers = #tpu.dot_dimension_numbers<[1], [0], [0], [1], [0, 0, 1, 1], [], []>} : vector<2x32xf32>, vector<32x128xf32>, vector<2x128xf32> -> vector<2x128xf32>
    %342 = arith.addf %336, %341 : vector<2x128xf32>
    %343 = vector.extract_strided_slice %342 {offsets = [0, 0], sizes = [2, 32], strides = [1, 1]} : vector<2x128xf32> to vector<2x32xf32>
    %344 = arith.negf %343 : vector<2x32xf32>
    %345 = math.exp %344 : vector<2x32xf32>
    %cst_146 = arith.constant 1.000000e+00 : f32
    %346 = vector.broadcast %cst_146 : f32 to vector<2x32xf32>
    %347 = arith.addf %346, %345 : vector<2x32xf32>
    %348 = arith.divf %346, %347 : vector<2x32xf32>
    %349 = vector.extract_strided_slice %342 {offsets = [0, 32], sizes = [2, 32], strides = [1, 1]} : vector<2x128xf32> to vector<2x32xf32>
    %350 = arith.negf %349 : vector<2x32xf32>
    %351 = math.exp %350 : vector<2x32xf32>
    %cst_147 = arith.constant 1.000000e+00 : f32
    %352 = vector.broadcast %cst_147 : f32 to vector<2x32xf32>
    %353 = arith.addf %352, %351 : vector<2x32xf32>
    %354 = arith.divf %352, %353 : vector<2x32xf32>
    %355 = vector.extract_strided_slice %342 {offsets = [0, 64], sizes = [2, 32], strides = [1, 1]} : vector<2x128xf32> to vector<2x32xf32>
    %356 = math.tanh %355 : vector<2x32xf32>
    %357 = vector.extract_strided_slice %342 {offsets = [0, 96], sizes = [2, 32], strides = [1, 1]} : vector<2x128xf32> to vector<2x32xf32>
    %358 = arith.negf %357 : vector<2x32xf32>
    %359 = math.exp %358 : vector<2x32xf32>
    %cst_148 = arith.constant 1.000000e+00 : f32
    %360 = vector.broadcast %cst_148 : f32 to vector<2x32xf32>
    %361 = arith.addf %360, %359 : vector<2x32xf32>
    %362 = arith.divf %360, %361 : vector<2x32xf32>
    %363 = arith.mulf %354, %340 : vector<2x32xf32>
    %364 = arith.mulf %348, %356 : vector<2x32xf32>
    %365 = arith.addf %363, %364 : vector<2x32xf32>
    %366 = math.tanh %365 : vector<2x32xf32>
    %367 = arith.mulf %362, %366 : vector<2x32xf32>
    %368 = vector.broadcast %338 : vector<2x1xf32> to vector<2x32xf32>
    %369 = arith.mulf %368, %367 : vector<2x32xf32>
    %cst_149 = arith.constant 1.000000e+00 : f32
    %370 = vector.broadcast %cst_149 : f32 to vector<2x1xf32>
    %371 = arith.subf %370, %338 : vector<2x1xf32>
    %372 = vector.broadcast %371 : vector<2x1xf32> to vector<2x32xf32>
    %373 = arith.mulf %372, %339 : vector<2x32xf32>
    %374 = arith.addf %369, %373 : vector<2x32xf32>
    %375 = vector.broadcast %338 : vector<2x1xf32> to vector<2x32xf32>
    %376 = arith.mulf %375, %365 : vector<2x32xf32>
    %cst_150 = arith.constant 1.000000e+00 : f32
    %377 = vector.broadcast %cst_150 : f32 to vector<2x1xf32>
    %378 = arith.subf %377, %338 : vector<2x1xf32>
    %379 = vector.broadcast %378 : vector<2x1xf32> to vector<2x32xf32>
    %380 = arith.mulf %379, %340 : vector<2x32xf32>
    %381 = arith.addf %376, %380 : vector<2x32xf32>
    %382 = vector.broadcast %338 : vector<2x1xf32> to vector<2x32xf32>
    %383 = arith.mulf %382, %367 : vector<2x32xf32>
    %c0_151 = arith.constant 0 : index
    %c0_152 = arith.constant 0 : index
    %384 = vector.load %arg9[%c0_151, %c0_152] : memref<2x32xf32, #tpu.memory_space<vmem>>, vector<2x32xf32>
    tpu.vector_store %arg9[%c0_151, %c0_152], %374 {strides = array<i32>} : memref<2x32xf32, #tpu.memory_space<vmem>>, vector<2x32xf32>,
    %c0_153 = arith.constant 0 : index
    %c0_154 = arith.constant 0 : index
    %385 = vector.load %arg10[%c0_153, %c0_154] : memref<2x32xf32, #tpu.memory_space<vmem>>, vector<2x32xf32>
    tpu.vector_store %arg10[%c0_153, %c0_154], %381 {strides = array<i32>} : memref<2x32xf32, #tpu.memory_space<vmem>>, vector<2x32xf32>,
    %386 = arith.truncf %383 : vector<2x32xf32> to vector<2x32xbf16>
    %c3_155 = arith.constant 3 : index
    %c0_156 = arith.constant 0 : index
    %c0_157 = arith.constant 0 : index
    %387 = vector.load %arg7[%c3_155, %c0_156, %c0_157] : memref<8x2x32xbf16, #tpu.memory_space<vmem>>, vector<1x2x32xbf16>
    %388 = vector.shape_cast %387 : vector<1x2x32xbf16> to vector<2x32xbf16>
    %389 = vector.shape_cast %386 : vector<2x32xbf16> to vector<1x2x32xbf16>
    tpu.vector_store %arg7[%c3_155, %c0_156, %c0_157], %389 {strides = array<i32>} : memref<8x2x32xbf16, #tpu.memory_space<vmem>>, vector<1x2x32xbf16>,
    %c4 = arith.constant 4 : index
    %c0_158 = arith.constant 0 : index
    %c0_159 = arith.constant 0 : index
    %390 = vector.load %arg2[%c4, %c0_158, %c0_159] : memref<8x2x128xf32, #tpu.memory_space<vmem>>, vector<1x2x128xf32>
    %391 = vector.shape_cast %390 : vector<1x2x128xf32> to vector<2x128xf32>
    %c4_160 = arith.constant 4 : index
    %c0_161 = arith.constant 0 : index
    %c0_162 = arith.constant 0 : index
    %392 = vector.load %arg4[%c4_160, %c0_161, %c0_162] : memref<8x2x1xf32, #tpu.memory_space<vmem>>, vector<1x2x1xf32>
    %393 = vector.shape_cast %392 : vector<1x2x1xf32> to vector<2x1xf32>
    %c0_163 = arith.constant 0 : index
    %c0_164 = arith.constant 0 : index
    %394 = vector.load %arg11[%c0_163, %c0_164] : memref<2x32xf32, #tpu.memory_space<vmem>>, vector<2x32xf32>
    %c0_165 = arith.constant 0 : index
    %c0_166 = arith.constant 0 : index
    %395 = vector.load %arg12[%c0_165, %c0_166] : memref<2x32xf32, #tpu.memory_space<vmem>>, vector<2x32xf32>
    %cst_167 = arith.constant dense<0.000000e+00> : vector<2x128xf32>
    %396 = tpu.matmul %394, %4, %cst_167 {dimension_numbers = #tpu.dot_dimension_numbers<[1], [0], [0], [1], [0, 0, 1, 1], [], []>} : vector<2x32xf32>, vector<32x128xf32>, vector<2x128xf32> -> vector<2x128xf32>
    %397 = arith.addf %391, %396 : vector<2x128xf32>
    %398 = vector.extract_strided_slice %397 {offsets = [0, 0], sizes = [2, 32], strides = [1, 1]} : vector<2x128xf32> to vector<2x32xf32>
    %399 = arith.negf %398 : vector<2x32xf32>
    %400 = math.exp %399 : vector<2x32xf32>
    %cst_168 = arith.constant 1.000000e+00 : f32
    %401 = vector.broadcast %cst_168 : f32 to vector<2x32xf32>
    %402 = arith.addf %401, %400 : vector<2x32xf32>
    %403 = arith.divf %401, %402 : vector<2x32xf32>
    %404 = vector.extract_strided_slice %397 {offsets = [0, 32], sizes = [2, 32], strides = [1, 1]} : vector<2x128xf32> to vector<2x32xf32>
    %405 = arith.negf %404 : vector<2x32xf32>
    %406 = math.exp %405 : vector<2x32xf32>
    %cst_169 = arith.constant 1.000000e+00 : f32
    %407 = vector.broadcast %cst_169 : f32 to vector<2x32xf32>
    %408 = arith.addf %407, %406 : vector<2x32xf32>
    %409 = arith.divf %407, %408 : vector<2x32xf32>
    %410 = vector.extract_strided_slice %397 {offsets = [0, 64], sizes = [2, 32], strides = [1, 1]} : vector<2x128xf32> to vector<2x32xf32>
    %411 = math.tanh %410 : vector<2x32xf32>
    %412 = vector.extract_strided_slice %397 {offsets = [0, 96], sizes = [2, 32], strides = [1, 1]} : vector<2x128xf32> to vector<2x32xf32>
    %413 = arith.negf %412 : vector<2x32xf32>
    %414 = math.exp %413 : vector<2x32xf32>
    %cst_170 = arith.constant 1.000000e+00 : f32
    %415 = vector.broadcast %cst_170 : f32 to vector<2x32xf32>
    %416 = arith.addf %415, %414 : vector<2x32xf32>
    %417 = arith.divf %415, %416 : vector<2x32xf32>
    %418 = arith.mulf %409, %395 : vector<2x32xf32>
    %419 = arith.mulf %403, %411 : vector<2x32xf32>
    %420 = arith.addf %418, %419 : vector<2x32xf32>
    %421 = math.tanh %420 : vector<2x32xf32>
    %422 = arith.mulf %417, %421 : vector<2x32xf32>
    %423 = vector.broadcast %393 : vector<2x1xf32> to vector<2x32xf32>
    %424 = arith.mulf %423, %422 : vector<2x32xf32>
    %cst_171 = arith.constant 1.000000e+00 : f32
    %425 = vector.broadcast %cst_171 : f32 to vector<2x1xf32>
    %426 = arith.subf %425, %393 : vector<2x1xf32>
    %427 = vector.broadcast %426 : vector<2x1xf32> to vector<2x32xf32>
    %428 = arith.mulf %427, %394 : vector<2x32xf32>
    %429 = arith.addf %424, %428 : vector<2x32xf32>
    %430 = vector.broadcast %393 : vector<2x1xf32> to vector<2x32xf32>
    %431 = arith.mulf %430, %420 : vector<2x32xf32>
    %cst_172 = arith.constant 1.000000e+00 : f32
    %432 = vector.broadcast %cst_172 : f32 to vector<2x1xf32>
    %433 = arith.subf %432, %393 : vector<2x1xf32>
    %434 = vector.broadcast %433 : vector<2x1xf32> to vector<2x32xf32>
    %435 = arith.mulf %434, %395 : vector<2x32xf32>
    %436 = arith.addf %431, %435 : vector<2x32xf32>
    %437 = vector.broadcast %393 : vector<2x1xf32> to vector<2x32xf32>
    %438 = arith.mulf %437, %422 : vector<2x32xf32>
    %c0_173 = arith.constant 0 : index
    %c0_174 = arith.constant 0 : index
    %439 = vector.load %arg11[%c0_173, %c0_174] : memref<2x32xf32, #tpu.memory_space<vmem>>, vector<2x32xf32>
    tpu.vector_store %arg11[%c0_173, %c0_174], %429 {strides = array<i32>} : memref<2x32xf32, #tpu.memory_space<vmem>>, vector<2x32xf32>,
    %c0_175 = arith.constant 0 : index
    %c0_176 = arith.constant 0 : index
    %440 = vector.load %arg12[%c0_175, %c0_176] : memref<2x32xf32, #tpu.memory_space<vmem>>, vector<2x32xf32>
    tpu.vector_store %arg12[%c0_175, %c0_176], %436 {strides = array<i32>} : memref<2x32xf32, #tpu.memory_space<vmem>>, vector<2x32xf32>,
    %441 = arith.truncf %438 : vector<2x32xf32> to vector<2x32xbf16>
    %c4_177 = arith.constant 4 : index
    %c0_178 = arith.constant 0 : index
    %c0_179 = arith.constant 0 : index
    %442 = vector.load %arg8[%c4_177, %c0_178, %c0_179] : memref<8x2x32xbf16, #tpu.memory_space<vmem>>, vector<1x2x32xbf16>
    %443 = vector.shape_cast %442 : vector<1x2x32xbf16> to vector<2x32xbf16>
    %444 = vector.shape_cast %441 : vector<2x32xbf16> to vector<1x2x32xbf16>
    tpu.vector_store %arg8[%c4_177, %c0_178, %c0_179], %444 {strides = array<i32>} : memref<8x2x32xbf16, #tpu.memory_space<vmem>>, vector<1x2x32xbf16>,
    %c4_180 = arith.constant 4 : index
    %c0_181 = arith.constant 0 : index
    %c0_182 = arith.constant 0 : index
    %445 = vector.load %arg1[%c4_180, %c0_181, %c0_182] : memref<8x2x128xf32, #tpu.memory_space<vmem>>, vector<1x2x128xf32>
    %446 = vector.shape_cast %445 : vector<1x2x128xf32> to vector<2x128xf32>
    %c4_183 = arith.constant 4 : index
    %c0_184 = arith.constant 0 : index
    %c0_185 = arith.constant 0 : index
    %447 = vector.load %arg3[%c4_183, %c0_184, %c0_185] : memref<8x2x1xf32, #tpu.memory_space<vmem>>, vector<1x2x1xf32>
    %448 = vector.shape_cast %447 : vector<1x2x1xf32> to vector<2x1xf32>
    %c0_186 = arith.constant 0 : index
    %c0_187 = arith.constant 0 : index
    %449 = vector.load %arg9[%c0_186, %c0_187] : memref<2x32xf32, #tpu.memory_space<vmem>>, vector<2x32xf32>
    %c0_188 = arith.constant 0 : index
    %c0_189 = arith.constant 0 : index
    %450 = vector.load %arg10[%c0_188, %c0_189] : memref<2x32xf32, #tpu.memory_space<vmem>>, vector<2x32xf32>
    %cst_190 = arith.constant dense<0.000000e+00> : vector<2x128xf32>
    %451 = tpu.matmul %449, %3, %cst_190 {dimension_numbers = #tpu.dot_dimension_numbers<[1], [0], [0], [1], [0, 0, 1, 1], [], []>} : vector<2x32xf32>, vector<32x128xf32>, vector<2x128xf32> -> vector<2x128xf32>
    %452 = arith.addf %446, %451 : vector<2x128xf32>
    %453 = vector.extract_strided_slice %452 {offsets = [0, 0], sizes = [2, 32], strides = [1, 1]} : vector<2x128xf32> to vector<2x32xf32>
    %454 = arith.negf %453 : vector<2x32xf32>
    %455 = math.exp %454 : vector<2x32xf32>
    %cst_191 = arith.constant 1.000000e+00 : f32
    %456 = vector.broadcast %cst_191 : f32 to vector<2x32xf32>
    %457 = arith.addf %456, %455 : vector<2x32xf32>
    %458 = arith.divf %456, %457 : vector<2x32xf32>
    %459 = vector.extract_strided_slice %452 {offsets = [0, 32], sizes = [2, 32], strides = [1, 1]} : vector<2x128xf32> to vector<2x32xf32>
    %460 = arith.negf %459 : vector<2x32xf32>
    %461 = math.exp %460 : vector<2x32xf32>
    %cst_192 = arith.constant 1.000000e+00 : f32
    %462 = vector.broadcast %cst_192 : f32 to vector<2x32xf32>
    %463 = arith.addf %462, %461 : vector<2x32xf32>
    %464 = arith.divf %462, %463 : vector<2x32xf32>
    %465 = vector.extract_strided_slice %452 {offsets = [0, 64], sizes = [2, 32], strides = [1, 1]} : vector<2x128xf32> to vector<2x32xf32>
    %466 = math.tanh %465 : vector<2x32xf32>
    %467 = vector.extract_strided_slice %452 {offsets = [0, 96], sizes = [2, 32], strides = [1, 1]} : vector<2x128xf32> to vector<2x32xf32>
    %468 = arith.negf %467 : vector<2x32xf32>
    %469 = math.exp %468 : vector<2x32xf32>
    %cst_193 = arith.constant 1.000000e+00 : f32
    %470 = vector.broadcast %cst_193 : f32 to vector<2x32xf32>
    %471 = arith.addf %470, %469 : vector<2x32xf32>
    %472 = arith.divf %470, %471 : vector<2x32xf32>
    %473 = arith.mulf %464, %450 : vector<2x32xf32>
    %474 = arith.mulf %458, %466 : vector<2x32xf32>
    %475 = arith.addf %473, %474 : vector<2x32xf32>
    %476 = math.tanh %475 : vector<2x32xf32>
    %477 = arith.mulf %472, %476 : vector<2x32xf32>
    %478 = vector.broadcast %448 : vector<2x1xf32> to vector<2x32xf32>
    %479 = arith.mulf %478, %477 : vector<2x32xf32>
    %cst_194 = arith.constant 1.000000e+00 : f32
    %480 = vector.broadcast %cst_194 : f32 to vector<2x1xf32>
    %481 = arith.subf %480, %448 : vector<2x1xf32>
    %482 = vector.broadcast %481 : vector<2x1xf32> to vector<2x32xf32>
    %483 = arith.mulf %482, %449 : vector<2x32xf32>
    %484 = arith.addf %479, %483 : vector<2x32xf32>
    %485 = vector.broadcast %448 : vector<2x1xf32> to vector<2x32xf32>
    %486 = arith.mulf %485, %475 : vector<2x32xf32>
    %cst_195 = arith.constant 1.000000e+00 : f32
    %487 = vector.broadcast %cst_195 : f32 to vector<2x1xf32>
    %488 = arith.subf %487, %448 : vector<2x1xf32>
    %489 = vector.broadcast %488 : vector<2x1xf32> to vector<2x32xf32>
    %490 = arith.mulf %489, %450 : vector<2x32xf32>
    %491 = arith.addf %486, %490 : vector<2x32xf32>
    %492 = vector.broadcast %448 : vector<2x1xf32> to vector<2x32xf32>
    %493 = arith.mulf %492, %477 : vector<2x32xf32>
    %c0_196 = arith.constant 0 : index
    %c0_197 = arith.constant 0 : index
    %494 = vector.load %arg9[%c0_196, %c0_197] : memref<2x32xf32, #tpu.memory_space<vmem>>, vector<2x32xf32>
    tpu.vector_store %arg9[%c0_196, %c0_197], %484 {strides = array<i32>} : memref<2x32xf32, #tpu.memory_space<vmem>>, vector<2x32xf32>,
    %c0_198 = arith.constant 0 : index
    %c0_199 = arith.constant 0 : index
    %495 = vector.load %arg10[%c0_198, %c0_199] : memref<2x32xf32, #tpu.memory_space<vmem>>, vector<2x32xf32>
    tpu.vector_store %arg10[%c0_198, %c0_199], %491 {strides = array<i32>} : memref<2x32xf32, #tpu.memory_space<vmem>>, vector<2x32xf32>,
    %496 = arith.truncf %493 : vector<2x32xf32> to vector<2x32xbf16>
    %c4_200 = arith.constant 4 : index
    %c0_201 = arith.constant 0 : index
    %c0_202 = arith.constant 0 : index
    %497 = vector.load %arg7[%c4_200, %c0_201, %c0_202] : memref<8x2x32xbf16, #tpu.memory_space<vmem>>, vector<1x2x32xbf16>
    %498 = vector.shape_cast %497 : vector<1x2x32xbf16> to vector<2x32xbf16>
    %499 = vector.shape_cast %496 : vector<2x32xbf16> to vector<1x2x32xbf16>
    tpu.vector_store %arg7[%c4_200, %c0_201, %c0_202], %499 {strides = array<i32>} : memref<8x2x32xbf16, #tpu.memory_space<vmem>>, vector<1x2x32xbf16>,
    %c3_203 = arith.constant 3 : index
    %c0_204 = arith.constant 0 : index
    %c0_205 = arith.constant 0 : index
    %500 = vector.load %arg2[%c3_203, %c0_204, %c0_205] : memref<8x2x128xf32, #tpu.memory_space<vmem>>, vector<1x2x128xf32>
    %501 = vector.shape_cast %500 : vector<1x2x128xf32> to vector<2x128xf32>
    %c3_206 = arith.constant 3 : index
    %c0_207 = arith.constant 0 : index
    %c0_208 = arith.constant 0 : index
    %502 = vector.load %arg4[%c3_206, %c0_207, %c0_208] : memref<8x2x1xf32, #tpu.memory_space<vmem>>, vector<1x2x1xf32>
    %503 = vector.shape_cast %502 : vector<1x2x1xf32> to vector<2x1xf32>
    %c0_209 = arith.constant 0 : index
    %c0_210 = arith.constant 0 : index
    %504 = vector.load %arg11[%c0_209, %c0_210] : memref<2x32xf32, #tpu.memory_space<vmem>>, vector<2x32xf32>
    %c0_211 = arith.constant 0 : index
    %c0_212 = arith.constant 0 : index
    %505 = vector.load %arg12[%c0_211, %c0_212] : memref<2x32xf32, #tpu.memory_space<vmem>>, vector<2x32xf32>
    %cst_213 = arith.constant dense<0.000000e+00> : vector<2x128xf32>
    %506 = tpu.matmul %504, %4, %cst_213 {dimension_numbers = #tpu.dot_dimension_numbers<[1], [0], [0], [1], [0, 0, 1, 1], [], []>} : vector<2x32xf32>, vector<32x128xf32>, vector<2x128xf32> -> vector<2x128xf32>
    %507 = arith.addf %501, %506 : vector<2x128xf32>
    %508 = vector.extract_strided_slice %507 {offsets = [0, 0], sizes = [2, 32], strides = [1, 1]} : vector<2x128xf32> to vector<2x32xf32>
    %509 = arith.negf %508 : vector<2x32xf32>
    %510 = math.exp %509 : vector<2x32xf32>
    %cst_214 = arith.constant 1.000000e+00 : f32
    %511 = vector.broadcast %cst_214 : f32 to vector<2x32xf32>
    %512 = arith.addf %511, %510 : vector<2x32xf32>
    %513 = arith.divf %511, %512 : vector<2x32xf32>
    %514 = vector.extract_strided_slice %507 {offsets = [0, 32], sizes = [2, 32], strides = [1, 1]} : vector<2x128xf32> to vector<2x32xf32>
    %515 = arith.negf %514 : vector<2x32xf32>
    %516 = math.exp %515 : vector<2x32xf32>
    %cst_215 = arith.constant 1.000000e+00 : f32
    %517 = vector.broadcast %cst_215 : f32 to vector<2x32xf32>
    %518 = arith.addf %517, %516 : vector<2x32xf32>
    %519 = arith.divf %517, %518 : vector<2x32xf32>
    %520 = vector.extract_strided_slice %507 {offsets = [0, 64], sizes = [2, 32], strides = [1, 1]} : vector<2x128xf32> to vector<2x32xf32>
    %521 = math.tanh %520 : vector<2x32xf32>
    %522 = vector.extract_strided_slice %507 {offsets = [0, 96], sizes = [2, 32], strides = [1, 1]} : vector<2x128xf32> to vector<2x32xf32>
    %523 = arith.negf %522 : vector<2x32xf32>
    %524 = math.exp %523 : vector<2x32xf32>
    %cst_216 = arith.constant 1.000000e+00 : f32
    %525 = vector.broadcast %cst_216 : f32 to vector<2x32xf32>
    %526 = arith.addf %525, %524 : vector<2x32xf32>
    %527 = arith.divf %525, %526 : vector<2x32xf32>
    %528 = arith.mulf %519, %505 : vector<2x32xf32>
    %529 = arith.mulf %513, %521 : vector<2x32xf32>
    %530 = arith.addf %528, %529 : vector<2x32xf32>
    %531 = math.tanh %530 : vector<2x32xf32>
    %532 = arith.mulf %527, %531 : vector<2x32xf32>
    %533 = vector.broadcast %503 : vector<2x1xf32> to vector<2x32xf32>
    %534 = arith.mulf %533, %532 : vector<2x32xf32>
    %cst_217 = arith.constant 1.000000e+00 : f32
    %535 = vector.broadcast %cst_217 : f32 to vector<2x1xf32>
    %536 = arith.subf %535, %503 : vector<2x1xf32>
    %537 = vector.broadcast %536 : vector<2x1xf32> to vector<2x32xf32>
    %538 = arith.mulf %537, %504 : vector<2x32xf32>
    %539 = arith.addf %534, %538 : vector<2x32xf32>
    %540 = vector.broadcast %503 : vector<2x1xf32> to vector<2x32xf32>
    %541 = arith.mulf %540, %530 : vector<2x32xf32>
    %cst_218 = arith.constant 1.000000e+00 : f32
    %542 = vector.broadcast %cst_218 : f32 to vector<2x1xf32>
    %543 = arith.subf %542, %503 : vector<2x1xf32>
    %544 = vector.broadcast %543 : vector<2x1xf32> to vector<2x32xf32>
    %545 = arith.mulf %544, %505 : vector<2x32xf32>
    %546 = arith.addf %541, %545 : vector<2x32xf32>
    %547 = vector.broadcast %503 : vector<2x1xf32> to vector<2x32xf32>
    %548 = arith.mulf %547, %532 : vector<2x32xf32>
    %c0_219 = arith.constant 0 : index
    %c0_220 = arith.constant 0 : index
    %549 = vector.load %arg11[%c0_219, %c0_220] : memref<2x32xf32, #tpu.memory_space<vmem>>, vector<2x32xf32>
    tpu.vector_store %arg11[%c0_219, %c0_220], %539 {strides = array<i32>} : memref<2x32xf32, #tpu.memory_space<vmem>>, vector<2x32xf32>,
    %c0_221 = arith.constant 0 : index
    %c0_222 = arith.constant 0 : index
    %550 = vector.load %arg12[%c0_221, %c0_222] : memref<2x32xf32, #tpu.memory_space<vmem>>, vector<2x32xf32>
    tpu.vector_store %arg12[%c0_221, %c0_222], %546 {strides = array<i32>} : memref<2x32xf32, #tpu.memory_space<vmem>>, vector<2x32xf32>,
    %551 = arith.truncf %548 : vector<2x32xf32> to vector<2x32xbf16>
    %c3_223 = arith.constant 3 : index
    %c0_224 = arith.constant 0 : index
    %c0_225 = arith.constant 0 : index
    %552 = vector.load %arg8[%c3_223, %c0_224, %c0_225] : memref<8x2x32xbf16, #tpu.memory_space<vmem>>, vector<1x2x32xbf16>
    %553 = vector.shape_cast %552 : vector<1x2x32xbf16> to vector<2x32xbf16>
    %554 = vector.shape_cast %551 : vector<2x32xbf16> to vector<1x2x32xbf16>
    tpu.vector_store %arg8[%c3_223, %c0_224, %c0_225], %554 {strides = array<i32>} : memref<8x2x32xbf16, #tpu.memory_space<vmem>>, vector<1x2x32xbf16>,
    %c5_226 = arith.constant 5 : index
    %c0_227 = arith.constant 0 : index
    %c0_228 = arith.constant 0 : index
    %555 = vector.load %arg1[%c5_226, %c0_227, %c0_228] : memref<8x2x128xf32, #tpu.memory_space<vmem>>, vector<1x2x128xf32>
    %556 = vector.shape_cast %555 : vector<1x2x128xf32> to vector<2x128xf32>
    %c5_229 = arith.constant 5 : index
    %c0_230 = arith.constant 0 : index
    %c0_231 = arith.constant 0 : index
    %557 = vector.load %arg3[%c5_229, %c0_230, %c0_231] : memref<8x2x1xf32, #tpu.memory_space<vmem>>, vector<1x2x1xf32>
    %558 = vector.shape_cast %557 : vector<1x2x1xf32> to vector<2x1xf32>
    %c0_232 = arith.constant 0 : index
    %c0_233 = arith.constant 0 : index
    %559 = vector.load %arg9[%c0_232, %c0_233] : memref<2x32xf32, #tpu.memory_space<vmem>>, vector<2x32xf32>
    %c0_234 = arith.constant 0 : index
    %c0_235 = arith.constant 0 : index
    %560 = vector.load %arg10[%c0_234, %c0_235] : memref<2x32xf32, #tpu.memory_space<vmem>>, vector<2x32xf32>
    %cst_236 = arith.constant dense<0.000000e+00> : vector<2x128xf32>
    %561 = tpu.matmul %559, %3, %cst_236 {dimension_numbers = #tpu.dot_dimension_numbers<[1], [0], [0], [1], [0, 0, 1, 1], [], []>} : vector<2x32xf32>, vector<32x128xf32>, vector<2x128xf32> -> vector<2x128xf32>
    %562 = arith.addf %556, %561 : vector<2x128xf32>
    %563 = vector.extract_strided_slice %562 {offsets = [0, 0], sizes = [2, 32], strides = [1, 1]} : vector<2x128xf32> to vector<2x32xf32>
    %564 = arith.negf %563 : vector<2x32xf32>
    %565 = math.exp %564 : vector<2x32xf32>
    %cst_237 = arith.constant 1.000000e+00 : f32
    %566 = vector.broadcast %cst_237 : f32 to vector<2x32xf32>
    %567 = arith.addf %566, %565 : vector<2x32xf32>
    %568 = arith.divf %566, %567 : vector<2x32xf32>
    %569 = vector.extract_strided_slice %562 {offsets = [0, 32], sizes = [2, 32], strides = [1, 1]} : vector<2x128xf32> to vector<2x32xf32>
    %570 = arith.negf %569 : vector<2x32xf32>
    %571 = math.exp %570 : vector<2x32xf32>
    %cst_238 = arith.constant 1.000000e+00 : f32
    %572 = vector.broadcast %cst_238 : f32 to vector<2x32xf32>
    %573 = arith.addf %572, %571 : vector<2x32xf32>
    %574 = arith.divf %572, %573 : vector<2x32xf32>
    %575 = vector.extract_strided_slice %562 {offsets = [0, 64], sizes = [2, 32], strides = [1, 1]} : vector<2x128xf32> to vector<2x32xf32>
    %576 = math.tanh %575 : vector<2x32xf32>
    %577 = vector.extract_strided_slice %562 {offsets = [0, 96], sizes = [2, 32], strides = [1, 1]} : vector<2x128xf32> to vector<2x32xf32>
    %578 = arith.negf %577 : vector<2x32xf32>
    %579 = math.exp %578 : vector<2x32xf32>
    %cst_239 = arith.constant 1.000000e+00 : f32
    %580 = vector.broadcast %cst_239 : f32 to vector<2x32xf32>
    %581 = arith.addf %580, %579 : vector<2x32xf32>
    %582 = arith.divf %580, %581 : vector<2x32xf32>
    %583 = arith.mulf %574, %560 : vector<2x32xf32>
    %584 = arith.mulf %568, %576 : vector<2x32xf32>
    %585 = arith.addf %583, %584 : vector<2x32xf32>
    %586 = math.tanh %585 : vector<2x32xf32>
    %587 = arith.mulf %582, %586 : vector<2x32xf32>
    %588 = vector.broadcast %558 : vector<2x1xf32> to vector<2x32xf32>
    %589 = arith.mulf %588, %587 : vector<2x32xf32>
    %cst_240 = arith.constant 1.000000e+00 : f32
    %590 = vector.broadcast %cst_240 : f32 to vector<2x1xf32>
    %591 = arith.subf %590, %558 : vector<2x1xf32>
    %592 = vector.broadcast %591 : vector<2x1xf32> to vector<2x32xf32>
    %593 = arith.mulf %592, %559 : vector<2x32xf32>
    %594 = arith.addf %589, %593 : vector<2x32xf32>
    %595 = vector.broadcast %558 : vector<2x1xf32> to vector<2x32xf32>
    %596 = arith.mulf %595, %585 : vector<2x32xf32>
    %cst_241 = arith.constant 1.000000e+00 : f32
    %597 = vector.broadcast %cst_241 : f32 to vector<2x1xf32>
    %598 = arith.subf %597, %558 : vector<2x1xf32>
    %599 = vector.broadcast %598 : vector<2x1xf32> to vector<2x32xf32>
    %600 = arith.mulf %599, %560 : vector<2x32xf32>
    %601 = arith.addf %596, %600 : vector<2x32xf32>
    %602 = vector.broadcast %558 : vector<2x1xf32> to vector<2x32xf32>
    %603 = arith.mulf %602, %587 : vector<2x32xf32>
    %c0_242 = arith.constant 0 : index
    %c0_243 = arith.constant 0 : index
    %604 = vector.load %arg9[%c0_242, %c0_243] : memref<2x32xf32, #tpu.memory_space<vmem>>, vector<2x32xf32>
    tpu.vector_store %arg9[%c0_242, %c0_243], %594 {strides = array<i32>} : memref<2x32xf32, #tpu.memory_space<vmem>>, vector<2x32xf32>,
    %c0_244 = arith.constant 0 : index
    %c0_245 = arith.constant 0 : index
    %605 = vector.load %arg10[%c0_244, %c0_245] : memref<2x32xf32, #tpu.memory_space<vmem>>, vector<2x32xf32>
    tpu.vector_store %arg10[%c0_244, %c0_245], %601 {strides = array<i32>} : memref<2x32xf32, #tpu.memory_space<vmem>>, vector<2x32xf32>,
    %606 = arith.truncf %603 : vector<2x32xf32> to vector<2x32xbf16>
    %c5_246 = arith.constant 5 : index
    %c0_247 = arith.constant 0 : index
    %c0_248 = arith.constant 0 : index
    %607 = vector.load %arg7[%c5_246, %c0_247, %c0_248] : memref<8x2x32xbf16, #tpu.memory_space<vmem>>, vector<1x2x32xbf16>
    %608 = vector.shape_cast %607 : vector<1x2x32xbf16> to vector<2x32xbf16>
    %609 = vector.shape_cast %606 : vector<2x32xbf16> to vector<1x2x32xbf16>
    tpu.vector_store %arg7[%c5_246, %c0_247, %c0_248], %609 {strides = array<i32>} : memref<8x2x32xbf16, #tpu.memory_space<vmem>>, vector<1x2x32xbf16>,
    %c2_249 = arith.constant 2 : index
    %c0_250 = arith.constant 0 : index
    %c0_251 = arith.constant 0 : index
    %610 = vector.load %arg2[%c2_249, %c0_250, %c0_251] : memref<8x2x128xf32, #tpu.memory_space<vmem>>, vector<1x2x128xf32>
    %611 = vector.shape_cast %610 : vector<1x2x128xf32> to vector<2x128xf32>
    %c2_252 = arith.constant 2 : index
    %c0_253 = arith.constant 0 : index
    %c0_254 = arith.constant 0 : index
    %612 = vector.load %arg4[%c2_252, %c0_253, %c0_254] : memref<8x2x1xf32, #tpu.memory_space<vmem>>, vector<1x2x1xf32>
    %613 = vector.shape_cast %612 : vector<1x2x1xf32> to vector<2x1xf32>
    %c0_255 = arith.constant 0 : index
    %c0_256 = arith.constant 0 : index
    %614 = vector.load %arg11[%c0_255, %c0_256] : memref<2x32xf32, #tpu.memory_space<vmem>>, vector<2x32xf32>
    %c0_257 = arith.constant 0 : index
    %c0_258 = arith.constant 0 : index
    %615 = vector.load %arg12[%c0_257, %c0_258] : memref<2x32xf32, #tpu.memory_space<vmem>>, vector<2x32xf32>
    %cst_259 = arith.constant dense<0.000000e+00> : vector<2x128xf32>
    %616 = tpu.matmul %614, %4, %cst_259 {dimension_numbers = #tpu.dot_dimension_numbers<[1], [0], [0], [1], [0, 0, 1, 1], [], []>} : vector<2x32xf32>, vector<32x128xf32>, vector<2x128xf32> -> vector<2x128xf32>
    %617 = arith.addf %611, %616 : vector<2x128xf32>
    %618 = vector.extract_strided_slice %617 {offsets = [0, 0], sizes = [2, 32], strides = [1, 1]} : vector<2x128xf32> to vector<2x32xf32>
    %619 = arith.negf %618 : vector<2x32xf32>
    %620 = math.exp %619 : vector<2x32xf32>
    %cst_260 = arith.constant 1.000000e+00 : f32
    %621 = vector.broadcast %cst_260 : f32 to vector<2x32xf32>
    %622 = arith.addf %621, %620 : vector<2x32xf32>
    %623 = arith.divf %621, %622 : vector<2x32xf32>
    %624 = vector.extract_strided_slice %617 {offsets = [0, 32], sizes = [2, 32], strides = [1, 1]} : vector<2x128xf32> to vector<2x32xf32>
    %625 = arith.negf %624 : vector<2x32xf32>
    %626 = math.exp %625 : vector<2x32xf32>
    %cst_261 = arith.constant 1.000000e+00 : f32
    %627 = vector.broadcast %cst_261 : f32 to vector<2x32xf32>
    %628 = arith.addf %627, %626 : vector<2x32xf32>
    %629 = arith.divf %627, %628 : vector<2x32xf32>
    %630 = vector.extract_strided_slice %617 {offsets = [0, 64], sizes = [2, 32], strides = [1, 1]} : vector<2x128xf32> to vector<2x32xf32>
    %631 = math.tanh %630 : vector<2x32xf32>
    %632 = vector.extract_strided_slice %617 {offsets = [0, 96], sizes = [2, 32], strides = [1, 1]} : vector<2x128xf32> to vector<2x32xf32>
    %633 = arith.negf %632 : vector<2x32xf32>
    %634 = math.exp %633 : vector<2x32xf32>
    %cst_262 = arith.constant 1.000000e+00 : f32
    %635 = vector.broadcast %cst_262 : f32 to vector<2x32xf32>
    %636 = arith.addf %635, %634 : vector<2x32xf32>
    %637 = arith.divf %635, %636 : vector<2x32xf32>
    %638 = arith.mulf %629, %615 : vector<2x32xf32>
    %639 = arith.mulf %623, %631 : vector<2x32xf32>
    %640 = arith.addf %638, %639 : vector<2x32xf32>
    %641 = math.tanh %640 : vector<2x32xf32>
    %642 = arith.mulf %637, %641 : vector<2x32xf32>
    %643 = vector.broadcast %613 : vector<2x1xf32> to vector<2x32xf32>
    %644 = arith.mulf %643, %642 : vector<2x32xf32>
    %cst_263 = arith.constant 1.000000e+00 : f32
    %645 = vector.broadcast %cst_263 : f32 to vector<2x1xf32>
    %646 = arith.subf %645, %613 : vector<2x1xf32>
    %647 = vector.broadcast %646 : vector<2x1xf32> to vector<2x32xf32>
    %648 = arith.mulf %647, %614 : vector<2x32xf32>
    %649 = arith.addf %644, %648 : vector<2x32xf32>
    %650 = vector.broadcast %613 : vector<2x1xf32> to vector<2x32xf32>
    %651 = arith.mulf %650, %640 : vector<2x32xf32>
    %cst_264 = arith.constant 1.000000e+00 : f32
    %652 = vector.broadcast %cst_264 : f32 to vector<2x1xf32>
    %653 = arith.subf %652, %613 : vector<2x1xf32>
    %654 = vector.broadcast %653 : vector<2x1xf32> to vector<2x32xf32>
    %655 = arith.mulf %654, %615 : vector<2x32xf32>
    %656 = arith.addf %651, %655 : vector<2x32xf32>
    %657 = vector.broadcast %613 : vector<2x1xf32> to vector<2x32xf32>
    %658 = arith.mulf %657, %642 : vector<2x32xf32>
    %c0_265 = arith.constant 0 : index
    %c0_266 = arith.constant 0 : index
    %659 = vector.load %arg11[%c0_265, %c0_266] : memref<2x32xf32, #tpu.memory_space<vmem>>, vector<2x32xf32>
    tpu.vector_store %arg11[%c0_265, %c0_266], %649 {strides = array<i32>} : memref<2x32xf32, #tpu.memory_space<vmem>>, vector<2x32xf32>,
    %c0_267 = arith.constant 0 : index
    %c0_268 = arith.constant 0 : index
    %660 = vector.load %arg12[%c0_267, %c0_268] : memref<2x32xf32, #tpu.memory_space<vmem>>, vector<2x32xf32>
    tpu.vector_store %arg12[%c0_267, %c0_268], %656 {strides = array<i32>} : memref<2x32xf32, #tpu.memory_space<vmem>>, vector<2x32xf32>,
    %661 = arith.truncf %658 : vector<2x32xf32> to vector<2x32xbf16>
    %c2_269 = arith.constant 2 : index
    %c0_270 = arith.constant 0 : index
    %c0_271 = arith.constant 0 : index
    %662 = vector.load %arg8[%c2_269, %c0_270, %c0_271] : memref<8x2x32xbf16, #tpu.memory_space<vmem>>, vector<1x2x32xbf16>
    %663 = vector.shape_cast %662 : vector<1x2x32xbf16> to vector<2x32xbf16>
    %664 = vector.shape_cast %661 : vector<2x32xbf16> to vector<1x2x32xbf16>
    tpu.vector_store %arg8[%c2_269, %c0_270, %c0_271], %664 {strides = array<i32>} : memref<8x2x32xbf16, #tpu.memory_space<vmem>>, vector<1x2x32xbf16>,
    %c6_272 = arith.constant 6 : index
    %c0_273 = arith.constant 0 : index
    %c0_274 = arith.constant 0 : index
    %665 = vector.load %arg1[%c6_272, %c0_273, %c0_274] : memref<8x2x128xf32, #tpu.memory_space<vmem>>, vector<1x2x128xf32>
    %666 = vector.shape_cast %665 : vector<1x2x128xf32> to vector<2x128xf32>
    %c6_275 = arith.constant 6 : index
    %c0_276 = arith.constant 0 : index
    %c0_277 = arith.constant 0 : index
    %667 = vector.load %arg3[%c6_275, %c0_276, %c0_277] : memref<8x2x1xf32, #tpu.memory_space<vmem>>, vector<1x2x1xf32>
    %668 = vector.shape_cast %667 : vector<1x2x1xf32> to vector<2x1xf32>
    %c0_278 = arith.constant 0 : index
    %c0_279 = arith.constant 0 : index
    %669 = vector.load %arg9[%c0_278, %c0_279] : memref<2x32xf32, #tpu.memory_space<vmem>>, vector<2x32xf32>
    %c0_280 = arith.constant 0 : index
    %c0_281 = arith.constant 0 : index
    %670 = vector.load %arg10[%c0_280, %c0_281] : memref<2x32xf32, #tpu.memory_space<vmem>>, vector<2x32xf32>
    %cst_282 = arith.constant dense<0.000000e+00> : vector<2x128xf32>
    %671 = tpu.matmul %669, %3, %cst_282 {dimension_numbers = #tpu.dot_dimension_numbers<[1], [0], [0], [1], [0, 0, 1, 1], [], []>} : vector<2x32xf32>, vector<32x128xf32>, vector<2x128xf32> -> vector<2x128xf32>
    %672 = arith.addf %666, %671 : vector<2x128xf32>
    %673 = vector.extract_strided_slice %672 {offsets = [0, 0], sizes = [2, 32], strides = [1, 1]} : vector<2x128xf32> to vector<2x32xf32>
    %674 = arith.negf %673 : vector<2x32xf32>
    %675 = math.exp %674 : vector<2x32xf32>
    %cst_283 = arith.constant 1.000000e+00 : f32
    %676 = vector.broadcast %cst_283 : f32 to vector<2x32xf32>
    %677 = arith.addf %676, %675 : vector<2x32xf32>
    %678 = arith.divf %676, %677 : vector<2x32xf32>
    %679 = vector.extract_strided_slice %672 {offsets = [0, 32], sizes = [2, 32], strides = [1, 1]} : vector<2x128xf32> to vector<2x32xf32>
    %680 = arith.negf %679 : vector<2x32xf32>
    %681 = math.exp %680 : vector<2x32xf32>
    %cst_284 = arith.constant 1.000000e+00 : f32
    %682 = vector.broadcast %cst_284 : f32 to vector<2x32xf32>
    %683 = arith.addf %682, %681 : vector<2x32xf32>
    %684 = arith.divf %682, %683 : vector<2x32xf32>
    %685 = vector.extract_strided_slice %672 {offsets = [0, 64], sizes = [2, 32], strides = [1, 1]} : vector<2x128xf32> to vector<2x32xf32>
    %686 = math.tanh %685 : vector<2x32xf32>
    %687 = vector.extract_strided_slice %672 {offsets = [0, 96], sizes = [2, 32], strides = [1, 1]} : vector<2x128xf32> to vector<2x32xf32>
    %688 = arith.negf %687 : vector<2x32xf32>
    %689 = math.exp %688 : vector<2x32xf32>
    %cst_285 = arith.constant 1.000000e+00 : f32
    %690 = vector.broadcast %cst_285 : f32 to vector<2x32xf32>
    %691 = arith.addf %690, %689 : vector<2x32xf32>
    %692 = arith.divf %690, %691 : vector<2x32xf32>
    %693 = arith.mulf %684, %670 : vector<2x32xf32>
    %694 = arith.mulf %678, %686 : vector<2x32xf32>
    %695 = arith.addf %693, %694 : vector<2x32xf32>
    %696 = math.tanh %695 : vector<2x32xf32>
    %697 = arith.mulf %692, %696 : vector<2x32xf32>
    %698 = vector.broadcast %668 : vector<2x1xf32> to vector<2x32xf32>
    %699 = arith.mulf %698, %697 : vector<2x32xf32>
    %cst_286 = arith.constant 1.000000e+00 : f32
    %700 = vector.broadcast %cst_286 : f32 to vector<2x1xf32>
    %701 = arith.subf %700, %668 : vector<2x1xf32>
    %702 = vector.broadcast %701 : vector<2x1xf32> to vector<2x32xf32>
    %703 = arith.mulf %702, %669 : vector<2x32xf32>
    %704 = arith.addf %699, %703 : vector<2x32xf32>
    %705 = vector.broadcast %668 : vector<2x1xf32> to vector<2x32xf32>
    %706 = arith.mulf %705, %695 : vector<2x32xf32>
    %cst_287 = arith.constant 1.000000e+00 : f32
    %707 = vector.broadcast %cst_287 : f32 to vector<2x1xf32>
    %708 = arith.subf %707, %668 : vector<2x1xf32>
    %709 = vector.broadcast %708 : vector<2x1xf32> to vector<2x32xf32>
    %710 = arith.mulf %709, %670 : vector<2x32xf32>
    %711 = arith.addf %706, %710 : vector<2x32xf32>
    %712 = vector.broadcast %668 : vector<2x1xf32> to vector<2x32xf32>
    %713 = arith.mulf %712, %697 : vector<2x32xf32>
    %c0_288 = arith.constant 0 : index
    %c0_289 = arith.constant 0 : index
    %714 = vector.load %arg9[%c0_288, %c0_289] : memref<2x32xf32, #tpu.memory_space<vmem>>, vector<2x32xf32>
    tpu.vector_store %arg9[%c0_288, %c0_289], %704 {strides = array<i32>} : memref<2x32xf32, #tpu.memory_space<vmem>>, vector<2x32xf32>,
    %c0_290 = arith.constant 0 : index
    %c0_291 = arith.constant 0 : index
    %715 = vector.load %arg10[%c0_290, %c0_291] : memref<2x32xf32, #tpu.memory_space<vmem>>, vector<2x32xf32>
    tpu.vector_store %arg10[%c0_290, %c0_291], %711 {strides = array<i32>} : memref<2x32xf32, #tpu.memory_space<vmem>>, vector<2x32xf32>,
    %716 = arith.truncf %713 : vector<2x32xf32> to vector<2x32xbf16>
    %c6_292 = arith.constant 6 : index
    %c0_293 = arith.constant 0 : index
    %c0_294 = arith.constant 0 : index
    %717 = vector.load %arg7[%c6_292, %c0_293, %c0_294] : memref<8x2x32xbf16, #tpu.memory_space<vmem>>, vector<1x2x32xbf16>
    %718 = vector.shape_cast %717 : vector<1x2x32xbf16> to vector<2x32xbf16>
    %719 = vector.shape_cast %716 : vector<2x32xbf16> to vector<1x2x32xbf16>
    tpu.vector_store %arg7[%c6_292, %c0_293, %c0_294], %719 {strides = array<i32>} : memref<8x2x32xbf16, #tpu.memory_space<vmem>>, vector<1x2x32xbf16>,
    %c1_295 = arith.constant 1 : index
    %c0_296 = arith.constant 0 : index
    %c0_297 = arith.constant 0 : index
    %720 = vector.load %arg2[%c1_295, %c0_296, %c0_297] : memref<8x2x128xf32, #tpu.memory_space<vmem>>, vector<1x2x128xf32>
    %721 = vector.shape_cast %720 : vector<1x2x128xf32> to vector<2x128xf32>
    %c1_298 = arith.constant 1 : index
    %c0_299 = arith.constant 0 : index
    %c0_300 = arith.constant 0 : index
    %722 = vector.load %arg4[%c1_298, %c0_299, %c0_300] : memref<8x2x1xf32, #tpu.memory_space<vmem>>, vector<1x2x1xf32>
    %723 = vector.shape_cast %722 : vector<1x2x1xf32> to vector<2x1xf32>
    %c0_301 = arith.constant 0 : index
    %c0_302 = arith.constant 0 : index
    %724 = vector.load %arg11[%c0_301, %c0_302] : memref<2x32xf32, #tpu.memory_space<vmem>>, vector<2x32xf32>
    %c0_303 = arith.constant 0 : index
    %c0_304 = arith.constant 0 : index
    %725 = vector.load %arg12[%c0_303, %c0_304] : memref<2x32xf32, #tpu.memory_space<vmem>>, vector<2x32xf32>
    %cst_305 = arith.constant dense<0.000000e+00> : vector<2x128xf32>
    %726 = tpu.matmul %724, %4, %cst_305 {dimension_numbers = #tpu.dot_dimension_numbers<[1], [0], [0], [1], [0, 0, 1, 1], [], []>} : vector<2x32xf32>, vector<32x128xf32>, vector<2x128xf32> -> vector<2x128xf32>
    %727 = arith.addf %721, %726 : vector<2x128xf32>
    %728 = vector.extract_strided_slice %727 {offsets = [0, 0], sizes = [2, 32], strides = [1, 1]} : vector<2x128xf32> to vector<2x32xf32>
    %729 = arith.negf %728 : vector<2x32xf32>
    %730 = math.exp %729 : vector<2x32xf32>
    %cst_306 = arith.constant 1.000000e+00 : f32
    %731 = vector.broadcast %cst_306 : f32 to vector<2x32xf32>
    %732 = arith.addf %731, %730 : vector<2x32xf32>
    %733 = arith.divf %731, %732 : vector<2x32xf32>
    %734 = vector.extract_strided_slice %727 {offsets = [0, 32], sizes = [2, 32], strides = [1, 1]} : vector<2x128xf32> to vector<2x32xf32>
    %735 = arith.negf %734 : vector<2x32xf32>
    %736 = math.exp %735 : vector<2x32xf32>
    %cst_307 = arith.constant 1.000000e+00 : f32
    %737 = vector.broadcast %cst_307 : f32 to vector<2x32xf32>
    %738 = arith.addf %737, %736 : vector<2x32xf32>
    %739 = arith.divf %737, %738 : vector<2x32xf32>
    %740 = vector.extract_strided_slice %727 {offsets = [0, 64], sizes = [2, 32], strides = [1, 1]} : vector<2x128xf32> to vector<2x32xf32>
    %741 = math.tanh %740 : vector<2x32xf32>
    %742 = vector.extract_strided_slice %727 {offsets = [0, 96], sizes = [2, 32], strides = [1, 1]} : vector<2x128xf32> to vector<2x32xf32>
    %743 = arith.negf %742 : vector<2x32xf32>
    %744 = math.exp %743 : vector<2x32xf32>
    %cst_308 = arith.constant 1.000000e+00 : f32
    %745 = vector.broadcast %cst_308 : f32 to vector<2x32xf32>
    %746 = arith.addf %745, %744 : vector<2x32xf32>
    %747 = arith.divf %745, %746 : vector<2x32xf32>
    %748 = arith.mulf %739, %725 : vector<2x32xf32>
    %749 = arith.mulf %733, %741 : vector<2x32xf32>
    %750 = arith.addf %748, %749 : vector<2x32xf32>
    %751 = math.tanh %750 : vector<2x32xf32>
    %752 = arith.mulf %747, %751 : vector<2x32xf32>
    %753 = vector.broadcast %723 : vector<2x1xf32> to vector<2x32xf32>
    %754 = arith.mulf %753, %752 : vector<2x32xf32>
    %cst_309 = arith.constant 1.000000e+00 : f32
    %755 = vector.broadcast %cst_309 : f32 to vector<2x1xf32>
    %756 = arith.subf %755, %723 : vector<2x1xf32>
    %757 = vector.broadcast %756 : vector<2x1xf32> to vector<2x32xf32>
    %758 = arith.mulf %757, %724 : vector<2x32xf32>
    %759 = arith.addf %754, %758 : vector<2x32xf32>
    %760 = vector.broadcast %723 : vector<2x1xf32> to vector<2x32xf32>
    %761 = arith.mulf %760, %750 : vector<2x32xf32>
    %cst_310 = arith.constant 1.000000e+00 : f32
    %762 = vector.broadcast %cst_310 : f32 to vector<2x1xf32>
    %763 = arith.subf %762, %723 : vector<2x1xf32>
    %764 = vector.broadcast %763 : vector<2x1xf32> to vector<2x32xf32>
    %765 = arith.mulf %764, %725 : vector<2x32xf32>
    %766 = arith.addf %761, %765 : vector<2x32xf32>
    %767 = vector.broadcast %723 : vector<2x1xf32> to vector<2x32xf32>
    %768 = arith.mulf %767, %752 : vector<2x32xf32>
    %c0_311 = arith.constant 0 : index
    %c0_312 = arith.constant 0 : index
    %769 = vector.load %arg11[%c0_311, %c0_312] : memref<2x32xf32, #tpu.memory_space<vmem>>, vector<2x32xf32>
    tpu.vector_store %arg11[%c0_311, %c0_312], %759 {strides = array<i32>} : memref<2x32xf32, #tpu.memory_space<vmem>>, vector<2x32xf32>,
    %c0_313 = arith.constant 0 : index
    %c0_314 = arith.constant 0 : index
    %770 = vector.load %arg12[%c0_313, %c0_314] : memref<2x32xf32, #tpu.memory_space<vmem>>, vector<2x32xf32>
    tpu.vector_store %arg12[%c0_313, %c0_314], %766 {strides = array<i32>} : memref<2x32xf32, #tpu.memory_space<vmem>>, vector<2x32xf32>,
    %771 = arith.truncf %768 : vector<2x32xf32> to vector<2x32xbf16>
    %c1_315 = arith.constant 1 : index
    %c0_316 = arith.constant 0 : index
    %c0_317 = arith.constant 0 : index
    %772 = vector.load %arg8[%c1_315, %c0_316, %c0_317] : memref<8x2x32xbf16, #tpu.memory_space<vmem>>, vector<1x2x32xbf16>
    %773 = vector.shape_cast %772 : vector<1x2x32xbf16> to vector<2x32xbf16>
    %774 = vector.shape_cast %771 : vector<2x32xbf16> to vector<1x2x32xbf16>
    tpu.vector_store %arg8[%c1_315, %c0_316, %c0_317], %774 {strides = array<i32>} : memref<8x2x32xbf16, #tpu.memory_space<vmem>>, vector<1x2x32xbf16>,
    %c7_318 = arith.constant 7 : index
    %c0_319 = arith.constant 0 : index
    %c0_320 = arith.constant 0 : index
    %775 = vector.load %arg1[%c7_318, %c0_319, %c0_320] : memref<8x2x128xf32, #tpu.memory_space<vmem>>, vector<1x2x128xf32>
    %776 = vector.shape_cast %775 : vector<1x2x128xf32> to vector<2x128xf32>
    %c7_321 = arith.constant 7 : index
    %c0_322 = arith.constant 0 : index
    %c0_323 = arith.constant 0 : index
    %777 = vector.load %arg3[%c7_321, %c0_322, %c0_323] : memref<8x2x1xf32, #tpu.memory_space<vmem>>, vector<1x2x1xf32>
    %778 = vector.shape_cast %777 : vector<1x2x1xf32> to vector<2x1xf32>
    %c0_324 = arith.constant 0 : index
    %c0_325 = arith.constant 0 : index
    %779 = vector.load %arg9[%c0_324, %c0_325] : memref<2x32xf32, #tpu.memory_space<vmem>>, vector<2x32xf32>
    %c0_326 = arith.constant 0 : index
    %c0_327 = arith.constant 0 : index
    %780 = vector.load %arg10[%c0_326, %c0_327] : memref<2x32xf32, #tpu.memory_space<vmem>>, vector<2x32xf32>
    %cst_328 = arith.constant dense<0.000000e+00> : vector<2x128xf32>
    %781 = tpu.matmul %779, %3, %cst_328 {dimension_numbers = #tpu.dot_dimension_numbers<[1], [0], [0], [1], [0, 0, 1, 1], [], []>} : vector<2x32xf32>, vector<32x128xf32>, vector<2x128xf32> -> vector<2x128xf32>
    %782 = arith.addf %776, %781 : vector<2x128xf32>
    %783 = vector.extract_strided_slice %782 {offsets = [0, 0], sizes = [2, 32], strides = [1, 1]} : vector<2x128xf32> to vector<2x32xf32>
    %784 = arith.negf %783 : vector<2x32xf32>
    %785 = math.exp %784 : vector<2x32xf32>
    %cst_329 = arith.constant 1.000000e+00 : f32
    %786 = vector.broadcast %cst_329 : f32 to vector<2x32xf32>
    %787 = arith.addf %786, %785 : vector<2x32xf32>
    %788 = arith.divf %786, %787 : vector<2x32xf32>
    %789 = vector.extract_strided_slice %782 {offsets = [0, 32], sizes = [2, 32], strides = [1, 1]} : vector<2x128xf32> to vector<2x32xf32>
    %790 = arith.negf %789 : vector<2x32xf32>
    %791 = math.exp %790 : vector<2x32xf32>
    %cst_330 = arith.constant 1.000000e+00 : f32
    %792 = vector.broadcast %cst_330 : f32 to vector<2x32xf32>
    %793 = arith.addf %792, %791 : vector<2x32xf32>
    %794 = arith.divf %792, %793 : vector<2x32xf32>
    %795 = vector.extract_strided_slice %782 {offsets = [0, 64], sizes = [2, 32], strides = [1, 1]} : vector<2x128xf32> to vector<2x32xf32>
    %796 = math.tanh %795 : vector<2x32xf32>
    %797 = vector.extract_strided_slice %782 {offsets = [0, 96], sizes = [2, 32], strides = [1, 1]} : vector<2x128xf32> to vector<2x32xf32>
    %798 = arith.negf %797 : vector<2x32xf32>
    %799 = math.exp %798 : vector<2x32xf32>
    %cst_331 = arith.constant 1.000000e+00 : f32
    %800 = vector.broadcast %cst_331 : f32 to vector<2x32xf32>
    %801 = arith.addf %800, %799 : vector<2x32xf32>
    %802 = arith.divf %800, %801 : vector<2x32xf32>
    %803 = arith.mulf %794, %780 : vector<2x32xf32>
    %804 = arith.mulf %788, %796 : vector<2x32xf32>
    %805 = arith.addf %803, %804 : vector<2x32xf32>
    %806 = math.tanh %805 : vector<2x32xf32>
    %807 = arith.mulf %802, %806 : vector<2x32xf32>
    %808 = vector.broadcast %778 : vector<2x1xf32> to vector<2x32xf32>
    %809 = arith.mulf %808, %807 : vector<2x32xf32>
    %cst_332 = arith.constant 1.000000e+00 : f32
    %810 = vector.broadcast %cst_332 : f32 to vector<2x1xf32>
    %811 = arith.subf %810, %778 : vector<2x1xf32>
    %812 = vector.broadcast %811 : vector<2x1xf32> to vector<2x32xf32>
    %813 = arith.mulf %812, %779 : vector<2x32xf32>
    %814 = arith.addf %809, %813 : vector<2x32xf32>
    %815 = vector.broadcast %778 : vector<2x1xf32> to vector<2x32xf32>
    %816 = arith.mulf %815, %805 : vector<2x32xf32>
    %cst_333 = arith.constant 1.000000e+00 : f32
    %817 = vector.broadcast %cst_333 : f32 to vector<2x1xf32>
    %818 = arith.subf %817, %778 : vector<2x1xf32>
    %819 = vector.broadcast %818 : vector<2x1xf32> to vector<2x32xf32>
    %820 = arith.mulf %819, %780 : vector<2x32xf32>
    %821 = arith.addf %816, %820 : vector<2x32xf32>
    %822 = vector.broadcast %778 : vector<2x1xf32> to vector<2x32xf32>
    %823 = arith.mulf %822, %807 : vector<2x32xf32>
    %c0_334 = arith.constant 0 : index
    %c0_335 = arith.constant 0 : index
    %824 = vector.load %arg9[%c0_334, %c0_335] : memref<2x32xf32, #tpu.memory_space<vmem>>, vector<2x32xf32>
    tpu.vector_store %arg9[%c0_334, %c0_335], %814 {strides = array<i32>} : memref<2x32xf32, #tpu.memory_space<vmem>>, vector<2x32xf32>,
    %c0_336 = arith.constant 0 : index
    %c0_337 = arith.constant 0 : index
    %825 = vector.load %arg10[%c0_336, %c0_337] : memref<2x32xf32, #tpu.memory_space<vmem>>, vector<2x32xf32>
    tpu.vector_store %arg10[%c0_336, %c0_337], %821 {strides = array<i32>} : memref<2x32xf32, #tpu.memory_space<vmem>>, vector<2x32xf32>,
    %826 = arith.truncf %823 : vector<2x32xf32> to vector<2x32xbf16>
    %c7_338 = arith.constant 7 : index
    %c0_339 = arith.constant 0 : index
    %c0_340 = arith.constant 0 : index
    %827 = vector.load %arg7[%c7_338, %c0_339, %c0_340] : memref<8x2x32xbf16, #tpu.memory_space<vmem>>, vector<1x2x32xbf16>
    %828 = vector.shape_cast %827 : vector<1x2x32xbf16> to vector<2x32xbf16>
    %829 = vector.shape_cast %826 : vector<2x32xbf16> to vector<1x2x32xbf16>
    tpu.vector_store %arg7[%c7_338, %c0_339, %c0_340], %829 {strides = array<i32>} : memref<8x2x32xbf16, #tpu.memory_space<vmem>>, vector<1x2x32xbf16>,
    %c0_341 = arith.constant 0 : index
    %c0_342 = arith.constant 0 : index
    %c0_343 = arith.constant 0 : index
    %830 = vector.load %arg2[%c0_341, %c0_342, %c0_343] : memref<8x2x128xf32, #tpu.memory_space<vmem>>, vector<1x2x128xf32>
    %831 = vector.shape_cast %830 : vector<1x2x128xf32> to vector<2x128xf32>
    %c0_344 = arith.constant 0 : index
    %c0_345 = arith.constant 0 : index
    %c0_346 = arith.constant 0 : index
    %832 = vector.load %arg4[%c0_344, %c0_345, %c0_346] : memref<8x2x1xf32, #tpu.memory_space<vmem>>, vector<1x2x1xf32>
    %833 = vector.shape_cast %832 : vector<1x2x1xf32> to vector<2x1xf32>
    %c0_347 = arith.constant 0 : index
    %c0_348 = arith.constant 0 : index
    %834 = vector.load %arg11[%c0_347, %c0_348] : memref<2x32xf32, #tpu.memory_space<vmem>>, vector<2x32xf32>
    %c0_349 = arith.constant 0 : index
    %c0_350 = arith.constant 0 : index
    %835 = vector.load %arg12[%c0_349, %c0_350] : memref<2x32xf32, #tpu.memory_space<vmem>>, vector<2x32xf32>
    %cst_351 = arith.constant dense<0.000000e+00> : vector<2x128xf32>
    %836 = tpu.matmul %834, %4, %cst_351 {dimension_numbers = #tpu.dot_dimension_numbers<[1], [0], [0], [1], [0, 0, 1, 1], [], []>} : vector<2x32xf32>, vector<32x128xf32>, vector<2x128xf32> -> vector<2x128xf32>
    %837 = arith.addf %831, %836 : vector<2x128xf32>
    %838 = vector.extract_strided_slice %837 {offsets = [0, 0], sizes = [2, 32], strides = [1, 1]} : vector<2x128xf32> to vector<2x32xf32>
    %839 = arith.negf %838 : vector<2x32xf32>
    %840 = math.exp %839 : vector<2x32xf32>
    %cst_352 = arith.constant 1.000000e+00 : f32
    %841 = vector.broadcast %cst_352 : f32 to vector<2x32xf32>
    %842 = arith.addf %841, %840 : vector<2x32xf32>
    %843 = arith.divf %841, %842 : vector<2x32xf32>
    %844 = vector.extract_strided_slice %837 {offsets = [0, 32], sizes = [2, 32], strides = [1, 1]} : vector<2x128xf32> to vector<2x32xf32>
    %845 = arith.negf %844 : vector<2x32xf32>
    %846 = math.exp %845 : vector<2x32xf32>
    %cst_353 = arith.constant 1.000000e+00 : f32
    %847 = vector.broadcast %cst_353 : f32 to vector<2x32xf32>
    %848 = arith.addf %847, %846 : vector<2x32xf32>
    %849 = arith.divf %847, %848 : vector<2x32xf32>
    %850 = vector.extract_strided_slice %837 {offsets = [0, 64], sizes = [2, 32], strides = [1, 1]} : vector<2x128xf32> to vector<2x32xf32>
    %851 = math.tanh %850 : vector<2x32xf32>
    %852 = vector.extract_strided_slice %837 {offsets = [0, 96], sizes = [2, 32], strides = [1, 1]} : vector<2x128xf32> to vector<2x32xf32>
    %853 = arith.negf %852 : vector<2x32xf32>
    %854 = math.exp %853 : vector<2x32xf32>
    %cst_354 = arith.constant 1.000000e+00 : f32
    %855 = vector.broadcast %cst_354 : f32 to vector<2x32xf32>
    %856 = arith.addf %855, %854 : vector<2x32xf32>
    %857 = arith.divf %855, %856 : vector<2x32xf32>
    %858 = arith.mulf %849, %835 : vector<2x32xf32>
    %859 = arith.mulf %843, %851 : vector<2x32xf32>
    %860 = arith.addf %858, %859 : vector<2x32xf32>
    %861 = math.tanh %860 : vector<2x32xf32>
    %862 = arith.mulf %857, %861 : vector<2x32xf32>
    %863 = vector.broadcast %833 : vector<2x1xf32> to vector<2x32xf32>
    %864 = arith.mulf %863, %862 : vector<2x32xf32>
    %cst_355 = arith.constant 1.000000e+00 : f32
    %865 = vector.broadcast %cst_355 : f32 to vector<2x1xf32>
    %866 = arith.subf %865, %833 : vector<2x1xf32>
    %867 = vector.broadcast %866 : vector<2x1xf32> to vector<2x32xf32>
    %868 = arith.mulf %867, %834 : vector<2x32xf32>
    %869 = arith.addf %864, %868 : vector<2x32xf32>
    %870 = vector.broadcast %833 : vector<2x1xf32> to vector<2x32xf32>
    %871 = arith.mulf %870, %860 : vector<2x32xf32>
    %cst_356 = arith.constant 1.000000e+00 : f32
    %872 = vector.broadcast %cst_356 : f32 to vector<2x1xf32>
    %873 = arith.subf %872, %833 : vector<2x1xf32>
    %874 = vector.broadcast %873 : vector<2x1xf32> to vector<2x32xf32>
    %875 = arith.mulf %874, %835 : vector<2x32xf32>
    %876 = arith.addf %871, %875 : vector<2x32xf32>
    %877 = vector.broadcast %833 : vector<2x1xf32> to vector<2x32xf32>
    %878 = arith.mulf %877, %862 : vector<2x32xf32>
    %c0_357 = arith.constant 0 : index
    %c0_358 = arith.constant 0 : index
    %879 = vector.load %arg11[%c0_357, %c0_358] : memref<2x32xf32, #tpu.memory_space<vmem>>, vector<2x32xf32>
    tpu.vector_store %arg11[%c0_357, %c0_358], %869 {strides = array<i32>} : memref<2x32xf32, #tpu.memory_space<vmem>>, vector<2x32xf32>,
    %c0_359 = arith.constant 0 : index
    %c0_360 = arith.constant 0 : index
    %880 = vector.load %arg12[%c0_359, %c0_360] : memref<2x32xf32, #tpu.memory_space<vmem>>, vector<2x32xf32>
    tpu.vector_store %arg12[%c0_359, %c0_360], %876 {strides = array<i32>} : memref<2x32xf32, #tpu.memory_space<vmem>>, vector<2x32xf32>,
    %881 = arith.truncf %878 : vector<2x32xf32> to vector<2x32xbf16>
    %c0_361 = arith.constant 0 : index
    %c0_362 = arith.constant 0 : index
    %c0_363 = arith.constant 0 : index
    %882 = vector.load %arg8[%c0_361, %c0_362, %c0_363] : memref<8x2x32xbf16, #tpu.memory_space<vmem>>, vector<1x2x32xbf16>
    %883 = vector.shape_cast %882 : vector<1x2x32xbf16> to vector<2x32xbf16>
    %884 = vector.shape_cast %881 : vector<2x32xbf16> to vector<1x2x32xbf16>
    tpu.vector_store %arg8[%c0_361, %c0_362, %c0_363], %884 {strides = array<i32>} : memref<8x2x32xbf16, #tpu.memory_space<vmem>>, vector<1x2x32xbf16>,
    return
  }
  func.func @transform_0(%arg0: i32) -> (i32, i32, i32) {
    %c0_i32 = arith.constant 0 : i32
    %c0_i32_0 = arith.constant 0 : i32
    %c0_i32_1 = arith.constant 0 : i32
    return %arg0, %c0_i32, %c0_i32_0 : i32, i32, i32
  }
  func.func @transform_1(%arg0: i32) -> (i32, i32, i32) {
    %c0_i32 = arith.constant 0 : i32
    %0 = arith.subi %c0_i32, %arg0 : i32
    %c0_i32_0 = arith.constant 0 : i32
    %c0_i32_1 = arith.constant 0 : i32
    %c0_i32_2 = arith.constant 0 : i32
    return %0, %c0_i32_0, %c0_i32_1 : i32, i32, i32
  }
  func.func @transform_2(%arg0: i32) -> (i32, i32, i32) {
    %c0_i32 = arith.constant 0 : i32
    %c0_i32_0 = arith.constant 0 : i32
    %c0_i32_1 = arith.constant 0 : i32
    return %arg0, %c0_i32, %c0_i32_0 : i32, i32, i32
  }
  func.func @transform_3(%arg0: i32) -> (i32, i32, i32) {
    %c0_i32 = arith.constant 0 : i32
    %0 = arith.subi %c0_i32, %arg0 : i32
    %c0_i32_0 = arith.constant 0 : i32
    %c0_i32_1 = arith.constant 0 : i32
    %c0_i32_2 = arith.constant 0 : i32
    return %0, %c0_i32_0, %c0_i32_1 : i32, i32, i32
  }
  func.func @transform_4(%arg0: i32) -> (i32, i32) {
    %c0_i32 = arith.constant 0 : i32
    %c0_i32_0 = arith.constant 0 : i32
    %c0_i32_1 = arith.constant 0 : i32
    return %c0_i32, %c0_i32_0 : i32, i32
  }
  func.func @transform_5(%arg0: i32) -> (i32, i32) {
    %c0_i32 = arith.constant 0 : i32
    %c0_i32_0 = arith.constant 0 : i32
    %c0_i32_1 = arith.constant 0 : i32
    return %c0_i32, %c0_i32_0 : i32, i32
  }
  func.func @transform_6(%arg0: i32) -> (i32, i32, i32) {
    %c0_i32 = arith.constant 0 : i32
    %c0_i32_0 = arith.constant 0 : i32
    %c0_i32_1 = arith.constant 0 : i32
    return %arg0, %c0_i32, %c0_i32_0 : i32, i32, i32
  }
  func.func @transform_7(%arg0: i32) -> (i32, i32, i32) {
    %c0_i32 = arith.constant 0 : i32
    %0 = arith.subi %c0_i32, %arg0 : i32
    %c0_i32_0 = arith.constant 0 : i32
    %c0_i32_1 = arith.constant 0 : i32
    %c0_i32_2 = arith.constant 0 : i32
    return %0, %c0_i32_0, %c0_i32_1 : i32, i32, i32
  }
}

module attributes {stable_mosaic.version = 11 : i64} {
  func.func @kernel(%arg0: i32, %arg1: memref<16x32xbf16, #tpu.memory_space<vmem>>, %arg2: memref<16x32xbf16, #tpu.memory_space<vmem>>, %arg3: memref<32x192xbf16, #tpu.memory_space<vmem>>, %arg4: memref<32x192xbf16, #tpu.memory_space<vmem>>, %arg5: memref<1x192xf32, #tpu.memory_space<vmem>>, %arg6: memref<16x192xf32, #tpu.memory_space<vmem>>) attributes {dimension_semantics = [#tpu.dimension_semantics<parallel>], iteration_bounds = array<i64: 1>, scalar_prefetch = 0 : i64, scratch_operands = 0 : i64, tpu.core_type = #tpu.core_type<tc>, window_params = [{transform_indices = @transform_0, window_bounds = array<i64: 16, 32>}, {transform_indices = @transform_1, window_bounds = array<i64: 16, 32>}, {pipeline_mode = #tpu.pipeline_mode<synchronous>, transform_indices = @transform_2, window_bounds = array<i64: 32, 192>}, {pipeline_mode = #tpu.pipeline_mode<synchronous>, transform_indices = @transform_3, window_bounds = array<i64: 32, 192>}, {pipeline_mode = #tpu.pipeline_mode<synchronous>, transform_indices = @transform_4, window_bounds = array<i64: 1, 192>}, {transform_indices = @transform_5, window_bounds = array<i64: 16, 192>}]} {
    %c0 = arith.constant 0 : index
    %c0_0 = arith.constant 0 : index
    %0 = vector.load %arg1[%c0, %c0_0] : memref<16x32xbf16, #tpu.memory_space<vmem>>, vector<16x32xbf16>
    %c0_1 = arith.constant 0 : index
    %c0_2 = arith.constant 0 : index
    %1 = vector.load %arg3[%c0_1, %c0_2] : memref<32x192xbf16, #tpu.memory_space<vmem>>, vector<32x192xbf16>
    %cst = arith.constant dense<0.000000e+00> : vector<16x192xf32>
    %2 = tpu.matmul %0, %1, %cst {dimension_numbers = #tpu.dot_dimension_numbers<[1], [0], [0], [1], [0, 0, 1, 1], [], []>} : vector<16x32xbf16>, vector<32x192xbf16>, vector<16x192xf32> -> vector<16x192xf32>
    %c0_3 = arith.constant 0 : index
    %c0_4 = arith.constant 0 : index
    %3 = vector.load %arg2[%c0_3, %c0_4] : memref<16x32xbf16, #tpu.memory_space<vmem>>, vector<16x32xbf16>
    %c0_5 = arith.constant 0 : index
    %c0_6 = arith.constant 0 : index
    %4 = vector.load %arg4[%c0_5, %c0_6] : memref<32x192xbf16, #tpu.memory_space<vmem>>, vector<32x192xbf16>
    %cst_7 = arith.constant dense<0.000000e+00> : vector<16x192xf32>
    %5 = tpu.matmul %3, %4, %cst_7 {dimension_numbers = #tpu.dot_dimension_numbers<[1], [0], [0], [1], [0, 0, 1, 1], [], []>} : vector<16x32xbf16>, vector<32x192xbf16>, vector<16x192xf32> -> vector<16x192xf32>
    %6 = arith.addf %2, %5 : vector<16x192xf32>
    %c0_8 = arith.constant 0 : index
    %c0_9 = arith.constant 0 : index
    %7 = vector.load %arg5[%c0_8, %c0_9] : memref<1x192xf32, #tpu.memory_space<vmem>>, vector<1x192xf32>
    %8 = vector.broadcast %7 : vector<1x192xf32> to vector<16x192xf32>
    %9 = arith.addf %6, %8 : vector<16x192xf32>
    %cst_10 = arith.constant 0.000000e+00 : f32
    %10 = vector.broadcast %cst_10 : f32 to vector<16x192xf32>
    %11 = arith.cmpf ogt, %9, %10 : vector<16x192xf32>
    %cst_11 = arith.constant 1.000000e-01 : f32
    %12 = vector.broadcast %cst_11 : f32 to vector<16x192xf32>
    %13 = arith.mulf %12, %9 : vector<16x192xf32>
    %14 = arith.select %11, %9, %13 : vector<16x192xi1>, vector<16x192xf32>
    %c0_12 = arith.constant 0 : index
    %c0_13 = arith.constant 0 : index
    %15 = vector.load %arg6[%c0_12, %c0_13] : memref<16x192xf32, #tpu.memory_space<vmem>>, vector<16x192xf32>
    tpu.vector_store %arg6[%c0_12, %c0_13], %14 {strides = array<i32>} : memref<16x192xf32, #tpu.memory_space<vmem>>, vector<16x192xf32>,
    return
  }
  func.func @transform_0(%arg0: i32) -> (i32, i32) {
    %c0_i32 = arith.constant 0 : i32
    %c0_i32_0 = arith.constant 0 : i32
    return %arg0, %c0_i32 : i32, i32
  }
  func.func @transform_1(%arg0: i32) -> (i32, i32) {
    %c0_i32 = arith.constant 0 : i32
    %c0_i32_0 = arith.constant 0 : i32
    return %arg0, %c0_i32 : i32, i32
  }
  func.func @transform_2(%arg0: i32) -> (i32, i32) {
    %c0_i32 = arith.constant 0 : i32
    %c0_i32_0 = arith.constant 0 : i32
    %c0_i32_1 = arith.constant 0 : i32
    return %c0_i32, %c0_i32_0 : i32, i32
  }
  func.func @transform_3(%arg0: i32) -> (i32, i32) {
    %c0_i32 = arith.constant 0 : i32
    %c0_i32_0 = arith.constant 0 : i32
    %c0_i32_1 = arith.constant 0 : i32
    return %c0_i32, %c0_i32_0 : i32, i32
  }
  func.func @transform_4(%arg0: i32) -> (i32, i32) {
    %c0_i32 = arith.constant 0 : i32
    %c0_i32_0 = arith.constant 0 : i32
    %c0_i32_1 = arith.constant 0 : i32
    return %c0_i32, %c0_i32_0 : i32, i32
  }
  func.func @transform_5(%arg0: i32) -> (i32, i32) {
    %c0_i32 = arith.constant 0 : i32
    %c0_i32_0 = arith.constant 0 : i32
    return %arg0, %c0_i32 : i32, i32
  }
}

module attributes {stable_mosaic.version = 11 : i64} {
  func.func @kernel(%arg0: i32, %arg1: memref<1x8x192xf32, #tpu.memory_space<vmem>>, %arg2: memref<1x1x8xf32, #tpu.memory_space<vmem>>, %arg3: memref<64x64xf32, #tpu.memory_space<vmem>>, %arg4: memref<1x64xf32, #tpu.memory_space<vmem>>, %arg5: memref<32x128xf32, #tpu.memory_space<vmem>>, %arg6: memref<1x128xf32, #tpu.memory_space<vmem>>, %arg7: memref<32x4xf32, #tpu.memory_space<vmem>>, %arg8: memref<1x4xf32, #tpu.memory_space<vmem>>, %arg9: memref<1x8x8xf32, #tpu.memory_space<vmem>>, %arg10: memref<1x4x8x8xf32, #tpu.memory_space<vmem>>) attributes {dimension_semantics = [#tpu.dimension_semantics<parallel>], iteration_bounds = array<i64: 2>, scalar_prefetch = 0 : i64, scratch_operands = 0 : i64, tpu.core_type = #tpu.core_type<tc>, window_params = [{transform_indices = @transform_0, window_bounds = array<i64: 1, 8, 192>}, {transform_indices = @transform_1, window_bounds = array<i64: 1, 1, 8>}, {pipeline_mode = #tpu.pipeline_mode<synchronous>, transform_indices = @transform_2, window_bounds = array<i64: 64, 64>}, {pipeline_mode = #tpu.pipeline_mode<synchronous>, transform_indices = @transform_3, window_bounds = array<i64: 1, 64>}, {pipeline_mode = #tpu.pipeline_mode<synchronous>, transform_indices = @transform_4, window_bounds = array<i64: 32, 128>}, {pipeline_mode = #tpu.pipeline_mode<synchronous>, transform_indices = @transform_5, window_bounds = array<i64: 1, 128>}, {pipeline_mode = #tpu.pipeline_mode<synchronous>, transform_indices = @transform_6, window_bounds = array<i64: 32, 4>}, {pipeline_mode = #tpu.pipeline_mode<synchronous>, transform_indices = @transform_7, window_bounds = array<i64: 1, 4>}, {transform_indices = @transform_8, window_bounds = array<i64: 1, 8, 8>}, {transform_indices = @transform_9, window_bounds = array<i64: 1, 4, 8, 8>}]} {
    %c0 = arith.constant 0 : index
    %c0_0 = arith.constant 0 : index
    %c0_1 = arith.constant 0 : index
    %0 = vector.load %arg1[%c0, %c0_0, %c0_1] : memref<1x8x192xf32, #tpu.memory_space<vmem>>, vector<1x8x192xf32>
    %1 = vector.shape_cast %0 : vector<1x8x192xf32> to vector<8x192xf32>
    %2 = vector.extract_strided_slice %1 {offsets = [0, 0], sizes = [8, 64], strides = [1, 1]} : vector<8x192xf32> to vector<8x64xf32>
    %3 = vector.extract_strided_slice %1 {offsets = [0, 64], sizes = [8, 64], strides = [1, 1]} : vector<8x192xf32> to vector<8x64xf32>
    %4 = vector.extract_strided_slice %1 {offsets = [0, 128], sizes = [8, 32], strides = [1, 1]} : vector<8x192xf32> to vector<8x32xf32>
    %5 = vector.extract_strided_slice %1 {offsets = [0, 160], sizes = [8, 32], strides = [1, 1]} : vector<8x192xf32> to vector<8x32xf32>
    %c0_2 = arith.constant 0 : index
    %c0_3 = arith.constant 0 : index
    %c0_4 = arith.constant 0 : index
    %6 = vector.load %arg2[%c0_2, %c0_3, %c0_4] : memref<1x1x8xf32, #tpu.memory_space<vmem>>, vector<1x1x8xf32>
    %7 = vector.shape_cast %6 : vector<1x1x8xf32> to vector<1x8xf32>
    %c0_5 = arith.constant 0 : index
    %c0_6 = arith.constant 0 : index
    %8 = vector.load %arg3[%c0_5, %c0_6] : memref<64x64xf32, #tpu.memory_space<vmem>>, vector<64x64xf32>
    %cst = arith.constant dense<0.000000e+00> : vector<8x64xf32>
    %9 = tpu.matmul %3, %8, %cst {dimension_numbers = #tpu.dot_dimension_numbers<[1], [0], [0], [1], [0, 0, 1, 1], [], []>} : vector<8x64xf32>, vector<64x64xf32>, vector<8x64xf32> -> vector<8x64xf32>
    %c0_7 = arith.constant 0 : index
    %c0_8 = arith.constant 0 : index
    %10 = vector.load %arg4[%c0_7, %c0_8] : memref<1x64xf32, #tpu.memory_space<vmem>>, vector<1x64xf32>
    %11 = vector.broadcast %10 : vector<1x64xf32> to vector<8x64xf32>
    %12 = arith.addf %9, %11 : vector<8x64xf32>
    %cst_9 = arith.constant dense<0.000000e+00> : vector<8x8xf32>
    %13 = tpu.matmul %12, %2, %cst_9 {dimension_numbers = #tpu.dot_dimension_numbers<[1], [1], [0], [0], [0, 0, 1, 0], [], []>} : vector<8x64xf32>, vector<8x64xf32>, vector<8x8xf32> -> vector<8x8xf32>
    %cst_10 = arith.constant 5.000000e-01 : f32
    %14 = vector.broadcast %cst_10 : f32 to vector<1x8xf32>
    %15 = arith.cmpf ogt, %7, %14 : vector<1x8xf32>
    %cst_11 = arith.constant 0xFF800000 : f32
    %16 = vector.shape_cast %15 : vector<1x8xi1> to vector<1x8xi1>
    %17 = vector.broadcast %16 : vector<1x8xi1> to vector<8x8xi1>
    %18 = vector.broadcast %cst_11 : f32 to vector<8x8xf32>
    %19 = arith.select %17, %13, %18 : vector<8x8xi1>, vector<8x8xf32>
    %c0_12 = arith.constant 0 : index
    %c0_13 = arith.constant 0 : index
    %c0_14 = arith.constant 0 : index
    %20 = vector.load %arg9[%c0_12, %c0_13, %c0_14] : memref<1x8x8xf32, #tpu.memory_space<vmem>>, vector<1x8x8xf32>
    %21 = vector.shape_cast %20 : vector<1x8x8xf32> to vector<8x8xf32>
    %22 = vector.shape_cast %19 : vector<8x8xf32> to vector<1x8x8xf32>
    tpu.vector_store %arg9[%c0_12, %c0_13, %c0_14], %22 {strides = array<i32>} : memref<1x8x8xf32, #tpu.memory_space<vmem>>, vector<1x8x8xf32>,
    %c0_15 = arith.constant 0 : index
    %c0_16 = arith.constant 0 : index
    %23 = vector.load %arg5[%c0_15, %c0_16] : memref<32x128xf32, #tpu.memory_space<vmem>>, vector<32x128xf32>
    %cst_17 = arith.constant dense<0.000000e+00> : vector<8x128xf32>
    %24 = tpu.matmul %5, %23, %cst_17 {dimension_numbers = #tpu.dot_dimension_numbers<[1], [0], [0], [1], [0, 0, 1, 1], [], []>} : vector<8x32xf32>, vector<32x128xf32>, vector<8x128xf32> -> vector<8x128xf32>
    %c0_18 = arith.constant 0 : index
    %c0_19 = arith.constant 0 : index
    %25 = vector.load %arg6[%c0_18, %c0_19] : memref<1x128xf32, #tpu.memory_space<vmem>>, vector<1x128xf32>
    %26 = vector.broadcast %25 : vector<1x128xf32> to vector<8x128xf32>
    %27 = arith.addf %24, %26 : vector<8x128xf32>
    %c0_20 = arith.constant 0 : index
    %c0_21 = arith.constant 0 : index
    %28 = vector.load %arg7[%c0_20, %c0_21] : memref<32x4xf32, #tpu.memory_space<vmem>>, vector<32x4xf32>
    %cst_22 = arith.constant dense<0.000000e+00> : vector<8x4xf32>
    %29 = tpu.matmul %5, %28, %cst_22 {dimension_numbers = #tpu.dot_dimension_numbers<[1], [0], [0], [1], [0, 0, 1, 1], [], []>} : vector<8x32xf32>, vector<32x4xf32>, vector<8x4xf32> -> vector<8x4xf32>
    %c0_23 = arith.constant 0 : index
    %c0_24 = arith.constant 0 : index
    %30 = vector.load %arg8[%c0_23, %c0_24] : memref<1x4xf32, #tpu.memory_space<vmem>>, vector<1x4xf32>
    %31 = vector.broadcast %30 : vector<1x4xf32> to vector<8x4xf32>
    %32 = arith.addf %29, %31 : vector<8x4xf32>
    %33 = vector.extract_strided_slice %27 {offsets = [0, 0], sizes = [8, 32], strides = [1, 1]} : vector<8x128xf32> to vector<8x32xf32>
    %cst_25 = arith.constant dense<0.000000e+00> : vector<8x8xf32>
    %34 = tpu.matmul %33, %4, %cst_25 {dimension_numbers = #tpu.dot_dimension_numbers<[1], [1], [0], [0], [0, 0, 1, 0], [], []>} : vector<8x32xf32>, vector<8x32xf32>, vector<8x8xf32> -> vector<8x8xf32>
    %35 = vector.extract_strided_slice %32 {offsets = [0, 0], sizes = [8, 1], strides = [1, 1]} : vector<8x4xf32> to vector<8x1xf32>
    %36 = vector.broadcast %35 : vector<8x1xf32> to vector<8x8xf32>
    %37 = arith.addf %34, %36 : vector<8x8xf32>
    %c0_26 = arith.constant 0 : index
    %c0_27 = arith.constant 0 : index
    %c0_28 = arith.constant 0 : index
    %c0_29 = arith.constant 0 : index
    %38 = vector.load %arg10[%c0_26, %c0_27, %c0_28, %c0_29] : memref<1x4x8x8xf32, #tpu.memory_space<vmem>>, vector<1x1x8x8xf32>
    %39 = vector.shape_cast %38 : vector<1x1x8x8xf32> to vector<8x8xf32>
    %40 = vector.shape_cast %37 : vector<8x8xf32> to vector<1x1x8x8xf32>
    tpu.vector_store %arg10[%c0_26, %c0_27, %c0_28, %c0_29], %40 {strides = array<i32>} : memref<1x4x8x8xf32, #tpu.memory_space<vmem>>, vector<1x1x8x8xf32>,
    %41 = vector.extract_strided_slice %27 {offsets = [0, 32], sizes = [8, 32], strides = [1, 1]} : vector<8x128xf32> to vector<8x32xf32>
    %cst_30 = arith.constant dense<0.000000e+00> : vector<8x8xf32>
    %42 = tpu.matmul %41, %4, %cst_30 {dimension_numbers = #tpu.dot_dimension_numbers<[1], [1], [0], [0], [0, 0, 1, 0], [], []>} : vector<8x32xf32>, vector<8x32xf32>, vector<8x8xf32> -> vector<8x8xf32>
    %43 = vector.extract_strided_slice %32 {offsets = [0, 1], sizes = [8, 1], strides = [1, 1]} : vector<8x4xf32> to vector<8x1xf32>
    %44 = vector.broadcast %43 : vector<8x1xf32> to vector<8x8xf32>
    %45 = arith.addf %42, %44 : vector<8x8xf32>
    %c0_31 = arith.constant 0 : index
    %c1 = arith.constant 1 : index
    %c0_32 = arith.constant 0 : index
    %c0_33 = arith.constant 0 : index
    %46 = vector.load %arg10[%c0_31, %c1, %c0_32, %c0_33] : memref<1x4x8x8xf32, #tpu.memory_space<vmem>>, vector<1x1x8x8xf32>
    %47 = vector.shape_cast %46 : vector<1x1x8x8xf32> to vector<8x8xf32>
    %48 = vector.shape_cast %45 : vector<8x8xf32> to vector<1x1x8x8xf32>
    tpu.vector_store %arg10[%c0_31, %c1, %c0_32, %c0_33], %48 {strides = array<i32>} : memref<1x4x8x8xf32, #tpu.memory_space<vmem>>, vector<1x1x8x8xf32>,
    %49 = vector.extract_strided_slice %27 {offsets = [0, 64], sizes = [8, 32], strides = [1, 1]} : vector<8x128xf32> to vector<8x32xf32>
    %cst_34 = arith.constant dense<0.000000e+00> : vector<8x8xf32>
    %50 = tpu.matmul %49, %4, %cst_34 {dimension_numbers = #tpu.dot_dimension_numbers<[1], [1], [0], [0], [0, 0, 1, 0], [], []>} : vector<8x32xf32>, vector<8x32xf32>, vector<8x8xf32> -> vector<8x8xf32>
    %51 = vector.extract_strided_slice %32 {offsets = [0, 2], sizes = [8, 1], strides = [1, 1]} : vector<8x4xf32> to vector<8x1xf32>
    %52 = vector.broadcast %51 : vector<8x1xf32> to vector<8x8xf32>
    %53 = arith.addf %50, %52 : vector<8x8xf32>
    %c0_35 = arith.constant 0 : index
    %c2 = arith.constant 2 : index
    %c0_36 = arith.constant 0 : index
    %c0_37 = arith.constant 0 : index
    %54 = vector.load %arg10[%c0_35, %c2, %c0_36, %c0_37] : memref<1x4x8x8xf32, #tpu.memory_space<vmem>>, vector<1x1x8x8xf32>
    %55 = vector.shape_cast %54 : vector<1x1x8x8xf32> to vector<8x8xf32>
    %56 = vector.shape_cast %53 : vector<8x8xf32> to vector<1x1x8x8xf32>
    tpu.vector_store %arg10[%c0_35, %c2, %c0_36, %c0_37], %56 {strides = array<i32>} : memref<1x4x8x8xf32, #tpu.memory_space<vmem>>, vector<1x1x8x8xf32>,
    %57 = vector.extract_strided_slice %27 {offsets = [0, 96], sizes = [8, 32], strides = [1, 1]} : vector<8x128xf32> to vector<8x32xf32>
    %cst_38 = arith.constant dense<0.000000e+00> : vector<8x8xf32>
    %58 = tpu.matmul %57, %4, %cst_38 {dimension_numbers = #tpu.dot_dimension_numbers<[1], [1], [0], [0], [0, 0, 1, 0], [], []>} : vector<8x32xf32>, vector<8x32xf32>, vector<8x8xf32> -> vector<8x8xf32>
    %59 = vector.extract_strided_slice %32 {offsets = [0, 3], sizes = [8, 1], strides = [1, 1]} : vector<8x4xf32> to vector<8x1xf32>
    %60 = vector.broadcast %59 : vector<8x1xf32> to vector<8x8xf32>
    %61 = arith.addf %58, %60 : vector<8x8xf32>
    %c0_39 = arith.constant 0 : index
    %c3 = arith.constant 3 : index
    %c0_40 = arith.constant 0 : index
    %c0_41 = arith.constant 0 : index
    %62 = vector.load %arg10[%c0_39, %c3, %c0_40, %c0_41] : memref<1x4x8x8xf32, #tpu.memory_space<vmem>>, vector<1x1x8x8xf32>
    %63 = vector.shape_cast %62 : vector<1x1x8x8xf32> to vector<8x8xf32>
    %64 = vector.shape_cast %61 : vector<8x8xf32> to vector<1x1x8x8xf32>
    tpu.vector_store %arg10[%c0_39, %c3, %c0_40, %c0_41], %64 {strides = array<i32>} : memref<1x4x8x8xf32, #tpu.memory_space<vmem>>, vector<1x1x8x8xf32>,
    return
  }
  func.func @transform_0(%arg0: i32) -> (i32, i32, i32) {
    %c0_i32 = arith.constant 0 : i32
    %c0_i32_0 = arith.constant 0 : i32
    %c0_i32_1 = arith.constant 0 : i32
    return %arg0, %c0_i32, %c0_i32_0 : i32, i32, i32
  }
  func.func @transform_1(%arg0: i32) -> (i32, i32, i32) {
    %c0_i32 = arith.constant 0 : i32
    %c0_i32_0 = arith.constant 0 : i32
    %c0_i32_1 = arith.constant 0 : i32
    return %arg0, %c0_i32, %c0_i32_0 : i32, i32, i32
  }
  func.func @transform_2(%arg0: i32) -> (i32, i32) {
    %c0_i32 = arith.constant 0 : i32
    %c0_i32_0 = arith.constant 0 : i32
    %c0_i32_1 = arith.constant 0 : i32
    return %c0_i32, %c0_i32_0 : i32, i32
  }
  func.func @transform_3(%arg0: i32) -> (i32, i32) {
    %c0_i32 = arith.constant 0 : i32
    %c0_i32_0 = arith.constant 0 : i32
    %c0_i32_1 = arith.constant 0 : i32
    return %c0_i32, %c0_i32_0 : i32, i32
  }
  func.func @transform_4(%arg0: i32) -> (i32, i32) {
    %c0_i32 = arith.constant 0 : i32
    %c0_i32_0 = arith.constant 0 : i32
    %c0_i32_1 = arith.constant 0 : i32
    return %c0_i32, %c0_i32_0 : i32, i32
  }
  func.func @transform_5(%arg0: i32) -> (i32, i32) {
    %c0_i32 = arith.constant 0 : i32
    %c0_i32_0 = arith.constant 0 : i32
    %c0_i32_1 = arith.constant 0 : i32
    return %c0_i32, %c0_i32_0 : i32, i32
  }
  func.func @transform_6(%arg0: i32) -> (i32, i32) {
    %c0_i32 = arith.constant 0 : i32
    %c0_i32_0 = arith.constant 0 : i32
    %c0_i32_1 = arith.constant 0 : i32
    return %c0_i32, %c0_i32_0 : i32, i32
  }
  func.func @transform_7(%arg0: i32) -> (i32, i32) {
    %c0_i32 = arith.constant 0 : i32
    %c0_i32_0 = arith.constant 0 : i32
    %c0_i32_1 = arith.constant 0 : i32
    return %c0_i32, %c0_i32_0 : i32, i32
  }
  func.func @transform_8(%arg0: i32) -> (i32, i32, i32) {
    %c0_i32 = arith.constant 0 : i32
    %c0_i32_0 = arith.constant 0 : i32
    %c0_i32_1 = arith.constant 0 : i32
    return %arg0, %c0_i32, %c0_i32_0 : i32, i32, i32
  }
  func.func @transform_9(%arg0: i32) -> (i32, i32, i32, i32) {
    %c0_i32 = arith.constant 0 : i32
    %c0_i32_0 = arith.constant 0 : i32
    %c0_i32_1 = arith.constant 0 : i32
    %c0_i32_2 = arith.constant 0 : i32
    return %arg0, %c0_i32, %c0_i32_0, %c0_i32_1 : i32, i32, i32, i32
  }
}

</mosaic_0001>

<bundles_post_ra>
// kernel: word_parser_forward.6
= control target key start
LH: loop header
LB: loop body
LE: loop exit
PB: predicated region body
PF: predicated region fallthrough
CT: control target
= control target key end

     0   :  { %vm54_vm0 = vcmask 261120   ;;  %s192_s1 = inlined_call_operand.vmem [shape: bf16[32,256], index: 1, kind: input, shape index: {}]   ;;  %s193_s0 = inlined_call_operand.vmem [shape: bf16[16,32], index: 0, kind: input, shape index: {}]   ;;  %s194_s2 = inlined_call_operand.vmem [shape: f32[1,256], index: 2, kind: input, shape index: {}]   ;;  %s195_s3 = inlined_call_operand.vmem [shape: f32[16,128], index: 3, kind: output, shape index: {0}]   ;;  %s196_s4 = inlined_call_operand.vmem [shape: f32[16,128], index: 4, kind: output, shape index: {1}]  }
   0x1   :  { %v112_v0 = vld [vmem:[%s192_s1 + $0x10] sm:$0xf]  ;;  %v124_v1 = vld [vmem:[%s192_s1 + $0x14] sm:$0xf0]  ;;  %v123_v2 = vld [vmem:[%s192_s1 + $0x14] sm:$0xf] }
   0x2   :  { %v113_v3 = vor.u32 %v124_v1, %v112_v0  ;;  %v114_v4 = vld [vmem:[%s192_s1 + $0x18] sm:$0xf0]  ;;  %v104_v5 = vld [vmem:[%s192_s1] sm:$0xf]  ;;  %v122_v6 = vld [vmem:[%s192_s1 + $0x4] sm:$0xf0] }
   0x3   :  { %v117_v7 = vor.u32 %v123_v2, %v114_v4  ;;  %v121_v8 = vld [vmem:[%s192_s1 + $0x4] sm:$0xf]  ;;  %v106_v9 = vld [vmem:[%s192_s1 + $0x8] sm:$0xf0]  ;;  %v105_v10 = vor.u32 %v122_v6, %v104_v5  ;;  %v23_v13 = vld [vmem:[%s194_s2] sm:$0x3] }
   0x4   :  { %64 = vmatpush.bf16.msra.mxu0 %v113_v3  ;;  %v109_v11 = vor.u32 %v121_v8, %v106_v9  ;;  %v120_v12 = vld [vmem:[%s193_s0] sm:$0xff]  ;;  %v25_v14 = vperm.slane %v23_v13, 0  ;;  %v26_v15 = vperm.slane %v23_v13, 1 }
   0x5   :  { %78 = vmatpush.bf16.msra.mxu1 %v117_v7 }
   0x8   :  { %65 = vmatpush.bf16.msra.mxu0 %v105_v10 }
   0x9   :  { %79 = vmatpush.bf16.msra.mxu1 %v109_v11 }
   0xb   :  { %118 = vmatmul.msk.bf16.vlgmr.msra.gmra.mxu0 %vm54_vm0, %v120_v12 }
   0xc   :  { %119 = vmatmul.msk.bf16.vlgmr.msra.gmra.mxu1 %vm54_vm0, %v120_v12 }
  0x88   :  { %v67_v16 = vpop.f32.mrf.mxu0 }
  0x89   :  { %v68_v17 = vadd.f32 %v67_v16, %v25_v14  ;;  %v81_v18 = vpop.f32.mrf.mxu1 }
  0x8a   :  { %v82_v19 = vadd.f32 %v81_v18, %v26_v15 }
  0x8b   :  { %86 = vst [vmem:[%s195_s3] sm:$0xff] %v68_v17 }
  0x8c   :  { %88 = vst [vmem:[%s196_s4] sm:$0xff] %v82_v19 }
  0x90   :  { %v69_v20 = vpop.f32.mrf.mxu0 }
  0x91   :  { %v70_v21 = vadd.f32 %v69_v20, %v25_v14  ;;  %v83_v22 = vpop.f32.mrf.mxu1 }
  0x92   :  { %v84_v23 = vadd.f32 %v83_v22, %v26_v15 }
  0x93   :  { %87 = vst [vmem:[%s195_s3 + $0x8] sm:$0xff] %v70_v21 }
  0x94   :  { %89 = vst [vmem:[%s196_s4 + $0x8] sm:$0xff] %v84_v23 }

// kernel: word_parser_forward.8
= control target key start
LH: loop header
LB: loop body
LE: loop exit
PB: predicated region body
PF: predicated region fallthrough
CT: control target
= control target key end

     0   :  { %vm60_vm0 = vcmask 261120   ;;  %s328_s3 = inlined_call_operand.vmem [shape: bf16[32,256], index: 3, kind: input, shape index: {}]   ;;  %s329_s2 = inlined_call_operand.vmem [shape: bf16[32,256], index: 2, kind: input, shape index: {}]   ;;  %s330_s1 = inlined_call_operand.vmem [shape: bf16[16,32], index: 1, kind: input, shape index: {}]   ;;  %s331_s0 = inlined_call_operand.vmem [shape: bf16[16,32], index: 0, kind: input, shape index: {}]   ;;  %s332_s4 = inlined_call_operand.vmem [shape: f32[1,256], index: 4, kind: input, shape index: {}]   ;;  %s333_s5 = inlined_call_operand.vmem [shape: f32[16,128], index: 5, kind: output, shape index: {0}]   ;;  %s334_s6 = inlined_call_operand.vmem [shape: f32[16,128], index: 6, kind: output, shape index: {1}]  }
   0x1   :  { %v184_v0 = vld [vmem:[%s328_s3 + $0x10] sm:$0xf]  ;;  %v223_v1 = vld [vmem:[%s328_s3 + $0x14] sm:$0xf0]  ;;  %v222_v2 = vld [vmem:[%s328_s3 + $0x14] sm:$0xf] }
   0x2   :  { %v185_v3 = vor.u32 %v223_v1, %v184_v0  ;;  %v186_v4 = vld [vmem:[%s328_s3 + $0x18] sm:$0xf0]  ;;  %v206_v5 = vld [vmem:[%s329_s2 + $0x10] sm:$0xf]  ;;  %v218_v6 = vld [vmem:[%s329_s2 + $0x14] sm:$0xf0] }
   0x3   :  { %v189_v7 = vor.u32 %v222_v2, %v186_v4  ;;  %v207_v8 = vor.u32 %v218_v6, %v206_v5  ;;  %v217_v9 = vld [vmem:[%s329_s2 + $0x14] sm:$0xf]  ;;  %v208_v10 = vld [vmem:[%s329_s2 + $0x18] sm:$0xf0]  ;;  %v176_v11 = vld [vmem:[%s328_s3] sm:$0xf] }
   0x4   :  { %70 = vmatpush.bf16.msra.mxu0 %v185_v3  ;;  %v211_v12 = vor.u32 %v217_v9, %v208_v10  ;;  %v221_v13 = vld [vmem:[%s328_s3 + $0x4] sm:$0xf0]  ;;  %v220_v14 = vld [vmem:[%s328_s3 + $0x4] sm:$0xf]  ;;  %v178_v15 = vld [vmem:[%s328_s3 + $0x8] sm:$0xf0] }
   0x5   :  { %84 = vmatpush.bf16.msra.mxu1 %v189_v7  ;;  %126 = vmatpush.bf16.msra.mxu2 %v207_v8  ;;  %v177_v16 = vor.u32 %v221_v13, %v176_v11  ;;  %v181_v17 = vor.u32 %v220_v14, %v178_v15  ;;  %v198_v18 = vld [vmem:[%s329_s2] sm:$0xf]  ;;  %v216_v19 = vld [vmem:[%s329_s2 + $0x4] sm:$0xf0]  ;;  %v215_v20 = vld [vmem:[%s329_s2 + $0x4] sm:$0xf] }
   0x6   :  { %140 = vmatpush.bf16.msra.mxu3 %v211_v12  ;;  %v199_v21 = vor.u32 %v216_v19, %v198_v18  ;;  %v200_v22 = vld [vmem:[%s329_s2 + $0x8] sm:$0xf0]  ;;  %v219_v24 = vld [vmem:[%s330_s1] sm:$0xff] }
   0x7   :  { %v203_v23 = vor.u32 %v215_v20, %v200_v22  ;;  %v214_v25 = vld [vmem:[%s331_s0] sm:$0xff] }
   0x8   :  { %71 = vmatpush.bf16.msra.mxu0 %v177_v16  ;;  %v148_v26 = vld [vmem:[%s332_s4] sm:$0x3] }
   0x9   :  { %85 = vmatpush.bf16.msra.mxu1 %v181_v17  ;;  %127 = vmatpush.bf16.msra.mxu2 %v199_v21  ;;  %v150_v29 = vperm.slane %v148_v26, 0  ;;  %v151_v31 = vperm.slane %v148_v26, 1 }
   0xa   :  { %141 = vmatpush.bf16.msra.mxu3 %v203_v23 }
   0xb   :  { %190 = vmatmul.msk.bf16.vlgmr.msra.gmra.mxu0 %vm60_vm0, %v219_v24 }
   0xc   :  { %191 = vmatmul.msk.bf16.vlgmr.msra.gmra.mxu1 %vm60_vm0, %v219_v24  ;;  %212 = vmatmul.msk.bf16.vlgmr.msra.gmra.mxu2 %vm60_vm0, %v214_v25 }
   0xd   :  { %213 = vmatmul.msk.bf16.vlgmr.msra.gmra.mxu3 %vm60_vm0, %v214_v25 }
  0x88   :  { %v73_v27 = vpop.f32.mrf.mxu0 }
  0x89   :  { %v87_v28 = vpop.f32.mrf.mxu1 }
  0x8f   :  { %v129_v30 = vpop.f32.mrf.mxu2 }
  0x90   :  { %v130_v32 = vadd.f32 %v129_v30, %v73_v27  ;;  %v143_v33 = vpop.f32.mrf.mxu3  ;;  %v75_v37 = vpop.f32.mrf.mxu0 }
  0x91   :  { %v144_v34 = vadd.f32 %v143_v33, %v87_v28  ;;  %v89_v39 = vpop.f32.mrf.mxu1 }
  0x92   :  { %v154_v35 = vadd.f32 %v150_v29, %v130_v32 }
  0x93   :  { %v155_v36 = vadd.f32 %v151_v31, %v144_v34 }
  0x94   :  { %158 = vst [vmem:[%s333_s5] sm:$0xff] %v154_v35 }
  0x95   :  { %160 = vst [vmem:[%s334_s6] sm:$0xff] %v155_v36 }
  0x97   :  { %v131_v38 = vpop.f32.mrf.mxu2 }
  0x98   :  { %v132_v40 = vadd.f32 %v131_v38, %v75_v37  ;;  %v145_v41 = vpop.f32.mrf.mxu3 }
  0x99   :  { %v146_v42 = vadd.f32 %v145_v41, %v89_v39 }
  0x9a   :  { %v156_v43 = vadd.f32 %v150_v29, %v132_v40 }
  0x9b   :  { %v157_v44 = vadd.f32 %v151_v31, %v146_v42 }
  0x9c   :  { %159 = vst [vmem:[%s333_s5 + $0x8] sm:$0xff] %v156_v43 }
  0x9d   :  { %161 = vst [vmem:[%s334_s6 + $0x8] sm:$0xff] %v157_v44 }

// kernel: word_parser_forward.10
= control target key start
LH: loop header
LB: loop body
LE: loop exit
PB: predicated region body
PF: predicated region fallthrough
CT: control target
= control target key end

     0   :  { %vm58_vm0 = vcmask 261120   ;;  %vm169_vm3 = vcmask 523264   ;;  %s332_s3 = inlined_call_operand.vmem [shape: bf16[32,192], index: 3, kind: input, shape index: {}]   ;;  %s333_s2 = inlined_call_operand.vmem [shape: bf16[32,192], index: 2, kind: input, shape index: {}]   ;;  %s334_s1 = inlined_call_operand.vmem [shape: bf16[16,32], index: 1, kind: input, shape index: {}]   ;;  %s335_s0 = inlined_call_operand.vmem [shape: bf16[16,32], index: 0, kind: input, shape index: {}]   ;;  %s336_s4 = inlined_call_operand.vmem [shape: f32[1,192], index: 4, kind: input, shape index: {}]   ;;  %s337_s5 = inlined_call_operand.vmem [shape: f32[16,192], index: 5, kind: output, shape index: {}]  }
   0x1   :  { %v191_v0 = vld [vmem:[%s332_s3 + $0x10] sm:$0xf]  ;;  %v230_v1 = vld [vmem:[%s332_s3 + $0x14] sm:$0xf0]  ;;  %v229_v2 = vld [vmem:[%s332_s3 + $0x14] sm:$0xf] }
   0x2   :  { %v192_v3 = vor.u32 %v230_v1, %v191_v0  ;;  %v193_v4 = vld [vmem:[%s332_s3 + $0x18] sm:$0xf0]  ;;  %v213_v5 = vld [vmem:[%s333_s2 + $0x10] sm:$0xf]  ;;  %v225_v6 = vld [vmem:[%s333_s2 + $0x14] sm:$0xf0] }
   0x3   :  { %v196_v7 = vor.u32 %v229_v2, %v193_v4  ;;  %v214_v8 = vor.u32 %v225_v6, %v213_v5  ;;  %v224_v9 = vld [vmem:[%s333_s2 + $0x14] sm:$0xf]  ;;  %v215_v10 = vld [vmem:[%s333_s2 + $0x18] sm:$0xf0]  ;;  %v183_v11 = vld [vmem:[%s332_s3] sm:$0xf] }
   0x4   :  { %68 = vmatpush.bf16.msra.mxu0 %v192_v3  ;;  %v218_v12 = vor.u32 %v224_v9, %v215_v10  ;;  %v228_v13 = vld [vmem:[%s332_s3 + $0x4] sm:$0xf0]  ;;  %v227_v14 = vld [vmem:[%s332_s3 + $0x4] sm:$0xf]  ;;  %v185_v15 = vld [vmem:[%s332_s3 + $0x8] sm:$0xf0] }
   0x5   :  { %82 = vmatpush.bf16.msra.mxu1 %v196_v7  ;;  %124 = vmatpush.bf16.msra.mxu2 %v214_v8  ;;  %v184_v16 = vor.u32 %v228_v13, %v183_v11  ;;  %v188_v17 = vor.u32 %v227_v14, %v185_v15  ;;  %v205_v18 = vld [vmem:[%s333_s2] sm:$0xf]  ;;  %v223_v19 = vld [vmem:[%s333_s2 + $0x4] sm:$0xf0]  ;;  %v222_v20 = vld [vmem:[%s333_s2 + $0x4] sm:$0xf] }
   0x6   :  { %138 = vmatpush.bf16.msra.mxu3 %v218_v12  ;;  %v206_v21 = vor.u32 %v223_v19, %v205_v18  ;;  %v207_v22 = vld [vmem:[%s333_s2 + $0x8] sm:$0xf0]  ;;  %v226_v24 = vld [vmem:[%s334_s1] sm:$0xff] }
   0x7   :  { %v210_v23 = vor.u32 %v222_v20, %v207_v22  ;;  %v221_v25 = vld [vmem:[%s335_s0] sm:$0xff] }
   0x8   :  { %69 = vmatpush.bf16.msra.mxu0 %v184_v16  ;;  %v146_v26 = vld [vmem:[%s336_s4] sm:$0x3] }
   0x9   :  { %83 = vmatpush.bf16.msra.mxu1 %v188_v17  ;;  %125 = vmatpush.bf16.msra.mxu2 %v206_v21  ;;  %v148_v29 = vperm.slane %v146_v26, 0  ;;  %v149_v31 = vperm.slane %v146_v26, 1 }
   0xa   :  { %139 = vmatpush.bf16.msra.mxu3 %v210_v23 }
   0xb   :  { %197 = vmatmul.msk.bf16.vlgmr.msra.gmra.mxu0 %vm58_vm0, %v226_v24 }
   0xc   :  { %198 = vmatmul.msk.bf16.vlgmr.msra.gmra.mxu1 %vm58_vm0, %v226_v24  ;;  %219 = vmatmul.msk.bf16.vlgmr.msra.gmra.mxu2 %vm58_vm0, %v221_v25 }
   0xd   :  { %220 = vmatmul.msk.bf16.vlgmr.msra.gmra.mxu3 %vm58_vm0, %v221_v25 }
  0x88   :  { %v71_v27 = vpop.f32.mrf.mxu0 }
  0x89   :  { %v85_v28 = vpop.f32.mrf.mxu1 }
  0x8f   :  { %v127_v30 = vpop.f32.mrf.mxu2 }
  0x90   :  { %v128_v32 = vadd.f32 %v127_v30, %v71_v27  ;;  %v141_v33 = vpop.f32.mrf.mxu3  ;;  %v73_v41 = vpop.f32.mrf.mxu0 }
  0x91   :  { %v142_v34 = vadd.f32 %v141_v33, %v85_v28  ;;  %v87_v43 = vpop.f32.mrf.mxu1 }
  0x92   :  { %v152_v35 = vadd.f32 %v148_v29, %v128_v32 }
  0x93   :  { %v153_v36 = vadd.f32 %v149_v31, %v142_v34 }
  0x94   :  { %vm156_vm1 = vcmp.gt.f32.partialorder %v152_v35, 0.0  ;;  %v160_v37 = vmul.f32 0.1, %v152_v35 }
  0x95   :  { %vm157_vm2 = vcmp.gt.f32.partialorder %v153_v36, 0.0  ;;  %v161_v38 = vmul.f32 0.1, %v153_v36 }
  0x96   :  { %v164_v39 = vsel %vm156_vm1, %v152_v35, %v160_v37 }
  0x97   :  { %168 = vst [vmem:[%s337_s5] sm:$0xff] %v164_v39  ;;  %v165_v40 = vsel %vm157_vm2, %v153_v36, %v161_v38  ;;  %v129_v42 = vpop.f32.mrf.mxu2 }
  0x98   :  { %170 = vst.msk [vmem:[%s337_s5 + $0x8] sm:$0xff] %vm169_vm3, %v165_v40  ;;  %v130_v44 = vadd.f32 %v129_v42, %v73_v41  ;;  %v143_v45 = vpop.f32.mrf.mxu3 }
  0x99   :  { %v144_v46 = vadd.f32 %v143_v45, %v87_v43 }
  0x9a   :  { %v154_v47 = vadd.f32 %v148_v29, %v130_v44 }
  0x9b   :  { %v155_v48 = vadd.f32 %v149_v31, %v144_v46 }
  0x9c   :  { %vm158_vm4 = vcmp.gt.f32.partialorder %v154_v47, 0.0  ;;  %v162_v49 = vmul.f32 0.1, %v154_v47 }
  0x9d   :  { %vm159_vm5 = vcmp.gt.f32.partialorder %v155_v48, 0.0  ;;  %v163_v50 = vmul.f32 0.1, %v155_v48 }
  0x9e   :  { %v166_v51 = vsel %vm158_vm4, %v154_v47, %v162_v49 }
  0x9f   :  { %171 = vst [vmem:[%s337_s5 + $0x10] sm:$0xff] %v166_v51  ;;  %v167_v52 = vsel %vm159_vm5, %v155_v48, %v163_v50 }
  0xa0   :  { %172 = vst.msk [vmem:[%s337_s5 + $0x18] sm:$0xff] %vm169_vm3, %v167_v52 }

// kernel: squeeze.7
= control target key start
LH: loop header
LB: loop body
LE: loop exit
PB: predicated region body
PF: predicated region fallthrough
CT: control target
= control target key end

     0   :  { %s37_s8 = smov 32   ;;  %s38_s9 = smov 64   ;;  %vm7_vm0 = vcmask 261120   ;;  %vm13_vm1 = vcmask 1048320   ;;  %vm19_vm2 = vcmask 785920   ;;  %vm25_vm3 = vcmask 523520   ;;  %s55_s0 = inlined_call_operand.vmem [shape: f32[4,1,32], index: 0, kind: input, shape index: {}]   ;;  %s56_s1 = inlined_call_operand.vmem [shape: f32[1,128], index: 1, kind: output, shape index: {}]  }
   0x1   :  { %v4_v0 = vld [vmem:[%s55_s0] sm:$0xf]  ;;  %s36_s0 = smov 96  }
   0x2   :  { %5 = vst [vmem:[#allocation1] sm:$0xf] %v4_v0 }
   0x9   :  { %v10_v1 = vld [vmem:[#allocation1 + $0x3] sm:$0x1]   ;;  %v22_v2 = vld [vmem:[#allocation1 + $0x1] sm:$0x1]   ;;  %v16_v3 = vld [vmem:[#allocation1 + $0x2] sm:$0x1]  }
   0xa   :  { %11 = vrot.lane.b32.xlu0 %v10_v1, %s36_s0  ;;  %23 = vrot.lane.b32.xlu1 %v22_v2, %s37_s8  ;;  %v6_v4 = vld [vmem:[#allocation1] sm:$0x1]  }
   0xb   :  { %8 = vst.msk [vmem:[#allocation0] sm:$0x1] %vm7_vm0, %v6_v4  }
  0x12   :  { %17 = vrot.lane.b32.xlu0 %v16_v3, %s38_s9 }
  0x7c   :  { %v12_v5 = vpop.permute.xlu0 %11   ;;  %v24_v6 = vpop.permute.xlu1 %23  }
  0x7d   :  { %14 = vst.msk [vmem:[#allocation0] sm:$0x1] %vm13_vm1, %v12_v5  }
  0x84   :  { %v18_v7 = vpop.permute.xlu0 %17  }
  0x85   :  { %20 = vst.msk [vmem:[#allocation0] sm:$0x1] %vm19_vm2, %v18_v7  }
  0x86   :  { %26 = vst.msk [vmem:[#allocation0] sm:$0x1] %vm25_vm3, %v24_v6  }
  0x8d   :  { %v29_v8 = vld [vmem:[#allocation0] sm:$0x1] }
  0x8e   :  { %32 = vst [vmem:[%s56_s1] sm:$0x1] %v29_v8 }

// kernel: word_parser_forward.11
= control target key start
LH: loop header
LB: loop body
LE: loop exit
PB: predicated region body
PF: predicated region fallthrough
CT: control target
= control target key end

     0   :  { %s1112_s0 = inlined_call_operand.vmem [shape: f32[2,8,192], index: 0, kind: input, shape index: {}]   ;;  %s1113_s1 = inlined_call_operand.vmem [shape: f32[2,1,8], index: 1, kind: input, shape index: {}]   ;;  %s1114_s2 = inlined_call_operand.vmem [shape: f32[64,64], index: 2, kind: input, shape index: {}]   ;;  %s1115_s3 = inlined_call_operand.vmem [shape: f32[1,64], index: 3, kind: input, shape index: {}]   ;;  %s1116_s4 = inlined_call_operand.vmem [shape: f32[32,128], index: 4, kind: input, shape index: {}]   ;;  %s1117_s5 = inlined_call_operand.vmem [shape: f32[1,128], index: 5, kind: input, shape index: {}]   ;;  %s1118_s6 = inlined_call_operand.vmem [shape: f32[32,4], index: 6, kind: input, shape index: {}]   ;;  %s1119_s7 = inlined_call_operand.vmem [shape: f32[1,4], index: 7, kind: input, shape index: {}]   ;;  %s1120_s8 = inlined_call_operand.hbm [shape: f32[2,8,8], index: 8, kind: output, shape index: {0}]   ;;  %s1121_s9 = inlined_call_operand.vmem [shape: f32[2,4,8,8], index: 9, kind: output, shape index: {1}]  }
   0x1   :  { %1122 = sst [smem:[#allocation6_spill]] %s1112_s0 }
   0x2   :  { %15 = vsyncpa [#allocation3], 0 }
   0x3   :  { %17 = vsyncpa [#allocation3 + $0x1], 0  ;;  %s937_s30 = smov 0   ;;  %s939_s10 = smov 0  }
   0x4   :  { %s941_s11 = smov 0   ;;  %s943_s12 = smov 0  }
   0x5 LB: > { %s958_s13 = sadd.s32 4294967295, %s878_s12   ;;  %s731_s14 = sadd.s32 4294967294, %s878_s12   ;;  %s878_s12 = sphi %s943_s12, %s1131_s12   ;;  %s874_s11 = sphi %s941_s11, %s1130_s11   ;;  %s870_s10 = sphi %s939_s10, %s1129_s10   ;;  %s866_s30 = sphi %s937_s30, %s1128_s30  }
   0x6   : > { %s962_s15 = sadd.s32 1, %s878_s12   ;;  %s208_s16 = sadd.s32 1, %s874_s11 }
   0x7   : > { %s205_s17 = ssub.s32 %s878_s12, %s962_s15  ;;  %p218_p0 = scmp.ne.s32.totalorder %s874_s11, %s870_s10 }
   0x8   : > { %p206_p1 = scmp.eq.s32.totalorder %s205_s17, 0  ;;  %p219_p2 = scmp.eq.s32.totalorder %s958_s13, 1 }
   0x9   : > { %p224_p3 = scmp.ne.s32.totalorder %s870_s10, %s866_s30  ;;  %p225_p4 = scmp.eq.s32.totalorder %s731_s14, 1 }
   0xa   : > { %s973_s18 = scalar_select %p206_p1, %s874_s11, %s208_s16  }
   0xb   : > { %p975_p5 = por %p219_p2, %p218_p0  ;;  %p979_p6 = por %p225_p4, %p224_p3 }
   0xc   : > { %1123 = sst [smem:[#allocation5_spill]] %s973_s18  ;;  %p734_p7 = scmp.ge.s32.totalorder %s878_s12, 1 }
   0xd   : > { %p301_p8 = scmp.lt.s32.totalorder %s878_s12, 3 }
   0xf   : > { %p302_p9 = pnand %p734_p7, %p301_p8 }
  0x10   : > { %p345_p10 = scmp.lt.s32.totalorder (!%p302_p9), %s958_s13, 1  ;;  %s1126_s0 = sld [smem:[#allocation6_spill]] (!%p302_p9) }
  0x11   : > { %305 = sbr.rel (%p302_p9) target bundleno = 535 (0x217), region = 52  ;;  %s880_s26 = smov (!%p302_p9), 96  }
  0x12   : > { %s881_s27 = smov (!%p302_p9), 64   ;;  %s885_s16 = smov (!%p302_p9), 32  }
  0x13   : > { %s757_s24 = sshll.u32 (!%p302_p9), %s958_s13, 3 }
  0x14   : > { %s630_s29 = scalar_lea.hbm (!%p302_p9), %s1120_s8, %s757_s24  ;;  %s836_s24 = scalar_lea.hbm (!%p302_p9), %s1120_s8, 16 }
  0x16   : > { %v368_v0 = vld [vmem:[%s1114_s2 + $0x38] sm:$0xff]  ;;  %v367_v3 = vld [vmem:[%s1114_s2 + $0x30] sm:$0xff]  ;;  %s1005_s21 = scalar_select %p345_p10, %s958_s13, 1  ;;  %v366_v6 = vld [vmem:[%s1114_s2 + $0x28] sm:$0xff]  ;;  %vm442_vm0 = vcmask 261120   ;;  %vm376_vm1 = vcmask 523264  }
  0x17   : > { %v434_v1 = vld [vmem:[%s1116_s4 + $0x18] sm:$0xff]  ;;  %387 = vmatpush.msra.mxu0 %v368_v0  ;;  %v433_v4 = vld [vmem:[%s1116_s4 + $0x10] sm:$0xff]  ;;  %v432_v7 = vld [vmem:[%s1116_s4 + $0x8] sm:$0xff]  ;;  %v882_v20 = vmov 1   ;;  %v883_v21 = vmov 0   ;;  %v884_v22 = vmov 2  }
  0x18   : > { %v468_v2 = vld [vmem:[%s1118_s6 + $0x18] sm:$0xff]  ;;  %457 = vmatpush.msra.mxu2 %v434_v1  ;;  %v467_v5 = vld [vmem:[%s1118_s6 + $0x10] sm:$0xff]  ;;  %v466_v8 = vld [vmem:[%s1118_s6 + $0x8] sm:$0xff]  ;;  %s760_s28 = sshll.u32 %s1005_s21, 4  ;;  %809 = vset.pattern.permute.xlu0 %v882_v20  ;;  %v886_v32 = vmov 3   ;;  %vm429_vm4 = vcmask 64512  }
  0x19   : > { %485 = vmatpush.msra.mxu3 %v468_v2  ;;  %388 = vmatpush.msra.mxu0 %v367_v3  ;;  %v365_v9 = vld [vmem:[%s1114_s2 + $0x20] sm:$0xff]  ;;  %s349_s22 = scalar_lea.vmem %s1126_s0, %s760_s28  ;;  %v364_v14 = vld [vmem:[%s1114_s2 + $0x18] sm:$0xff]  ;;  %v363_v15 = vld [vmem:[%s1114_s2 + $0x10] sm:$0xff] }
  0x1a   : > { %458 = vmatpush.msra.mxu2 %v433_v4  ;;  %v431_v10 = vld [vmem:[%s1116_s4] sm:$0xff]  ;;  %v359_v12 = vld [vmem:[%s349_s22 + $0x8] sm:$0xff]  ;;  %808 = vset.pattern.permute.xlu2 %v883_v21 }
  0x1b   : > { %486 = vmatpush.msra.mxu3 %v467_v5  ;;  %389 = vmatpush.msra.mxu0 %v366_v6  ;;  %v465_v11 = vld [vmem:[%s1118_s6] sm:$0xff]  ;;  %v362_v16 = vld [vmem:[%s1114_s2 + $0x8] sm:$0xff] }
  0x1c   : > { %459 = vmatpush.msra.mxu2 %v432_v7  ;;  %440 = vrot.lane.b32.xlu0 %v359_v12, %s880_s26  ;;  %v358_v13 = vld [vmem:[%s349_s22] sm:$0xff]  ;;  %s352_s22 = scalar_lea.vmem %s1113_s1, %s1005_s21 }
  0x1d   : > { %487 = vmatpush.msra.mxu3 %v466_v8  ;;  %390 = vmatpush.msra.mxu0 %v365_v9  ;;  %v361_v17 = vld [vmem:[%s1114_s2] sm:$0xff] }
  0x1e   : > { %460 = vmatpush.msra.mxu2 %v431_v10  ;;  %741 = vmatpush.xpose.msk.msra.mxu1 %vm376_vm1, %v358_v13  ;;  %v813_v23 = vld [vmem:[%s1117_s5] ss:$0 sm:$0xff] }
  0x1f   : > { %488 = vmatpush.msra.mxu3 %v465_v11  ;;  %391 = vmatpush.msra.mxu0 %v364_v14  ;;  %v814_v24 = vld [vmem:[%s1119_s7] ss:$0 sm:$0xff] }
  0x20   : > { %747 = vmatpush.xpose.msk.msrb.mxu2 %vm442_vm0, %v359_v12  ;;  %810 = vset.pattern.permute.xlu1 %v884_v22  ;;  %v815_v25 = vld [vmem:[%s1115_s3] ss:$0 sm:$0xff] }
  0x21   : > { %750 = vmatpush.xpose.msk.msrb.mxu3 %vm442_vm0, %v359_v12  ;;  %392 = vmatpush.msra.mxu0 %v363_v15  ;;  %v360_v34 = vld [vmem:[%s352_s22] sm:$0x1] }
  0x22   : > { %745 = vmatpush.xpose.msk.msrb.mxu1 %vm442_vm0, %v359_v12  ;;  %vm424_vm2 = vcmp.gt.f32.partialorder %v360_v34, 0.5 }
  0x23   : > { %393 = vmatpush.msra.mxu0 %v362_v16  ;;  %v425_v36 = vsel %vm424_vm2, 1, %v883_v21 }
  0x24   : > { %374 = vrot.lane.b32.xlu0 %v358_v13, %s881_s27  ;;  %v426_v37 = vperm.slane %v425_v36, 0 }
  0x25   : > { %394 = vmatpush.msra.mxu0 %v361_v17 }
  0x26   : > { %vm427_vm3 = vcmp.eq.s32.totalorder %v426_v37, 1 }
  0x8e   : > { %v441_v18 = vpop.permute.xlu0 %440 }
  0x8f   : > { %743 = vmatmul.msk.f32.vlgmr.msra.gmra.mxu2 %vm442_vm0, %v441_v18  ;;  %744 = vmatmul.msk.f32.vlgmr.msra.gmra.mxu3 %vm442_vm0, %v441_v18 }
  0x96   : > { %v375_v19 = vpop.permute.xlu0 %374 }
  0x97   : > { %740 = vmatmul.msk.f32.vlgmr.msra.gmra.mxu0 %vm376_vm1, %v375_v19 }
 0x112   : > { %v462_v26 = vpop.f32.mrf.mxu2  ;;  %v490_v27 = vpop.f32.mrf.mxu3 }
 0x113   : > { %v463_v28 = vadd.f32 %v813_v23, %v462_v26  ;;  %v491_v29 = vadd.f32 %v814_v24, %v490_v27 }
 0x114   : > { %v396_v30 = vpop.f32.mrf.mxu0 }
 0x115   : > { %v397_v31 = vadd.f32 %v815_v25, %v396_v30  ;;  %588 = vrot.lane.b32.xlu2 %v463_v28, %s885_s16  ;;  %528 = vrot.lane.b32.xlu1 %v463_v28, %s880_s26  ;;  %s634_s16 = sshll.u32 %s630_s29, 4  ;;  %s635_s16 = int_to_ptr.hbm [resolvable:$true] %s634_s16 }
 0x116   : > { %525 = vperm.xlu0 %809, %v491_v29   ;;  %s830_s17 = sshra.s32 %s635_s16, 4  ;;  %s831_s17 = int_to_ptr.hbm [resolvable:$true] %s830_s17 }
 0x117   : > { %742 = vmatmul.msk.f32.vlgmr.msra.gmra.mxu1 %vm376_vm1, %v397_v31  ;;  %s832_s22 = scalar_lea.hbm %s831_s17, 8  ;;  %p837_p0 = scmp.lt.s32.totalorder %s831_s17, %s1120_s8 }
 0x118   : > { %753 = vmatpush.xpose.msk.msra.mxu1 %vm442_vm0, %v359_v12  ;;  %p833_p11 = scmp.ne.s32.totalorder %s831_s17, %s832_s22  ;;  %p838_p1 = scmp.lt.s32.totalorder %s836_s24, %s832_s22 }
 0x11a   : > { %p834_p12 = pnand %p833_p11, %p975_p5  ;;  %p839_p2 = por %p838_p1, %p837_p0 }
 0x11c   : > { %p835_p13 = pneg %p834_p12 }
 0x11d   : > { %495 = vperm.xlu2 %808, %v491_v29   ;;  %558 = vrot.lane.b32.xlu1 %v463_v28, %s881_s27  ;;  %s335_s27 = sand.u32 1, %s870_s10  }
 0x11e   : > { %812 = vset.pattern.permute.xlu0 %v886_v32  ;;  %s735_s23 = sshll.u32 %s335_s27, 3  ;;  %s615_s26 = scalar_lea.sflag [#allocation3], %s335_s27 }
 0x11f   : > { %746 = vmatmul.msk.f32.vlgmr.msrb.gmra.mxu1 %vm442_vm0, %v463_v28  ;;  %s337_s14 = scalar_lea.vmem [#allocation2], %s735_s23  ;;  %p840_p3 = pnand %p839_p2, %p835_p13 }
 0x120   : > { %s632_s18 = sshll.u32 %s337_s14, 4  ;;  %s633_s18 = int_to_ptr.vmem [resolvable:$true] %s632_s18 }
 0x125   : > { %811 = vset.pattern.permute.xlu2 %v886_v32  ;;  %555 = vperm.xlu1 %810, %v491_v29  }
 0x126   : > { %585 = vperm.xlu2 %811, %v491_v29  }
 0x16f   : > { %v589_v33 = vpop.permute.xlu2 %588 }
 0x170   : > { %754 = vmatmul.msk.f32.vlgmr.msra.gmra.mxu1 %vm442_vm0, %v589_v33 }
 0x187   : > { %v529_v35 = vpop.permute.xlu1 %528 }
 0x188   : > { %748 = vmatmul.msk.f32.vlgmr.msrb.gmra.mxu2 %vm442_vm0, %v529_v35 }
 0x18f   : > { %v559_v38 = vpop.permute.xlu1 %558 }
 0x190   : > { %751 = vmatmul.msk.f32.vlgmr.msrb.gmra.mxu3 %vm442_vm0, %v559_v38 }
 0x194   : > { %v421_v39 = vpop.f32.mrf.mxu1 }
 0x195   : > { %v428_v40 = vsel %vm427_vm3, %v421_v39, -inf }
 0x196   : > { %430 = vst.msk [vmem:[%s337_s14] sm:$0xff] %vm429_vm4, %v428_v40 }
 0x197   : > { %843 = shalt.err (!%p840_p3)
}
 0x198   : > { %762 = dma.vmem_to_hbm [thread:$0]  (%p975_p5), %s633_s18, 128, %s635_s16, %s615_s26   ;;  %v496_v41 = vpop.permute.xlu2 %495  ;;  %v526_v47 = vpop.permute.xlu0 %525 }
 0x199   : > { %s761_s27 = sshll.u32 %s1005_s21, 5  ;;  %v556_v50 = vpop.permute.xlu1 %555 }
 0x19a   : > { %s357_s0 = scalar_lea.vmem %s1121_s9, %s761_s27 }
 0x19c   : > { %v520_v42 = vpop.f32.mrf.mxu1 }
 0x19d   : > { %v521_v43 = vadd.f32 %v520_v42, %v496_v41 }
 0x19f   : > { %523 = vst.msk [vmem:[%s357_s0] sm:$0xff] %vm429_vm4, %v521_v43 }
 0x1a0   : > { %v586_v44 = vpop.permute.xlu2 %585 }
 0x1ed   : > { %v609_v45 = vpop.f32.mrf.mxu1 }
 0x1ee   : > { %v610_v46 = vadd.f32 %v609_v45, %v586_v44 }
 0x1f0   : > { %755 = vst.msk [vmem:[%s357_s0 + $0x18] sm:$0xff] %vm429_vm4, %v610_v46 }
 0x20b   : > { %v549_v48 = vpop.f32.mrf.mxu2 }
 0x20c   : > { %v550_v49 = vadd.f32 %v549_v48, %v526_v47 }
 0x20e   : > { %749 = vst.msk [vmem:[%s357_s0 + $0x8] sm:$0xff] %vm429_vm4, %v550_v49 }
 0x213   : > { %v579_v51 = vpop.f32.mrf.mxu3 }
 0x214   : > { %v580_v52 = vadd.f32 %v579_v51, %v556_v50 }
 0x216   : > { %752 = vst.msk [vmem:[%s357_s0 + $0x10] sm:$0xff] %vm429_vm4, %v580_v52 }
 0x217 PF: > { %p768_p4 = scmp.ge.s32.totalorder %s878_s12, 2  ;;  %s649_s19 = sand.u32 1, %s866_s30  }
 0x218   : > { %s650_s21 = scalar_lea.sflag [#allocation3], %s649_s19 }
 0x219   : > { %p765_p5 = pnand %p768_p4, %p979_p6 }
 0x21b   : > { %p766_p7 = pneg %p765_p5 }
 0x21d   : > { %861 = dma.done.wait (%p766_p7), %s650_s21, 128  }
 0x21e   : > { %863 = vsyncadd (%p766_p7), %s650_s21, 4294967168  ;;  %s1127_s18 = sld [smem:[#allocation5_spill]]  ;;  %p20_p8 = scmp.ge.s32.totalorder %s962_s15, 4  }
 0x21f   : > { %s1128_s30 = smov %s870_s10  ;;  %s1129_s10 = smov %s874_s11 }
 0x220   : > { %s1131_s12 = smov %s962_s15  ;;  %22 = sbr.rel (!%p20_p8) target bundleno = 5 (0x5), region = 105 }
 0x224   : > { %s1130_s11 = smov %s1127_s18 }
 0x225   :  { %664 = vsyncpa [#allocation3], 1 }
 0x226   :  { %666 = vsyncpa [#allocation3 + $0x1], 1 }

// kernel: word_parser_forward.7
= control target key start
LH: loop header
LB: loop body
LE: loop exit
PB: predicated region body
PF: predicated region fallthrough
CT: control target
= control target key end

     0   :  { %vm85_vm0 = vcmask 254976   ;;  %v2230_v3 = vmov 0.0   ;;  %vm102_vm1 = vcmask 261120   ;;  %v2232_v17 = vmov 0   ;;  %s2233_s22 = smov 64   ;;  %s2234_s25 = smov 96   ;;  %s2963_s4 = inlined_call_operand.vmem [shape: f32[32,128], index: 4, kind: input, shape index: {}]   ;;  %s2964_s5 = inlined_call_operand.vmem [shape: f32[32,128], index: 5, kind: input, shape index: {}]   ;;  %s2965_s0 = inlined_call_operand.vmem [shape: f32[8,2,128], index: 0, kind: input, shape index: {}]   ;;  %s2966_s3 = inlined_call_operand.vmem [shape: f32[8,2,1], index: 3, kind: input, shape index: {}, may-alias: {2,3}]   ;;  %s2967_s1 = inlined_call_operand.vmem [shape: f32[8,2,128], index: 1, kind: input, shape index: {}]   ;;  %s2968_s2 = inlined_call_operand.vmem [shape: f32[8,2,1], index: 2, kind: input, shape index: {}, may-alias: {2,3}]   ;;  %s2969_s6 = inlined_call_operand.vmem [shape: bf16[8,2,32], index: 6, kind: output, shape index: {0}]   ;;  %s2970_s7 = inlined_call_operand.vmem [shape: bf16[8,2,32], index: 7, kind: output, shape index: {1}]  }
   0x1   :  { %v2278_v0 = vld [vmem:[%s2963_s4 + $0x18] sm:$0xff]  ;;  %v2288_v2 = vld [vmem:[%s2963_s4 + $0x10] sm:$0xff]  ;;  %86 = vst.msk [vmem:[#allocation2] sm:$0x3] %vm85_vm0, %v2230_v3  ;;  %v2302_v5 = vld [vmem:[%s2963_s4 + $0x8] sm:$0xff]  ;;  %2099 = vset.pattern.permute.xlu0 %v2232_v17  ;;  %2100 = vset.pattern.permute.xlu1 %v2232_v17 }
   0x2   :  { %v2283_v1 = vld [vmem:[%s2964_s5 + $0x18] sm:$0xff]  ;;  %118 = vmatpush.msra.mxu0 %v2278_v0  ;;  %v2296_v4 = vld [vmem:[%s2964_s5 + $0x10] sm:$0xff]  ;;  %87 = vst.msk [vmem:[#allocation3] sm:$0x3] %vm85_vm0, %v2230_v3  ;;  %v2307_v6 = vld [vmem:[%s2964_s5 + $0x8] sm:$0xff]  ;;  %356 = vmatpush.msra.mxu2 %v2278_v0 }
   0x3   :  { %238 = vmatpush.msra.mxu1 %v2283_v1  ;;  %88 = vst.msk [vmem:[#allocation4] sm:$0x3] %vm85_vm0, %v2230_v3  ;;  %474 = vmatpush.msra.mxu3 %v2283_v1  ;;  %v2318_v7 = vld [vmem:[%s2963_s4] sm:$0xff]  ;;  %s2231_s4 = smov 32   ;;  %v2023_v16 = vld [vmem:[%s2966_s3 + $0xe] sm:$0x3] }
   0x4   :  { %119 = vmatpush.msra.mxu0 %v2288_v2  ;;  %89 = vst.msk [vmem:[#allocation5] sm:$0x3] %vm85_vm0, %v2230_v3  ;;  %v2323_v8 = vld [vmem:[%s2964_s5] sm:$0xff]  ;;  %357 = vmatpush.msra.mxu2 %v2288_v2  ;;  %v294_v18 = vsub.f32 1.0, %v2023_v16  ;;  %v2022_v19 = vld [vmem:[%s2967_s1 + $0xe] sm:$0x3] }
   0x5   :  { %239 = vmatpush.msra.mxu1 %v2296_v4  ;;  %475 = vmatpush.msra.mxu3 %v2296_v4  ;;  %v98_v13 = vld [vmem:[%s2965_s0] sm:$0x3] }
   0x6   :  { %120 = vmatpush.msra.mxu0 %v2302_v5  ;;  %358 = vmatpush.msra.mxu2 %v2302_v5  ;;  %v99_v24 = vld [vmem:[%s2968_s2] sm:$0x3] }
   0x7   :  { %240 = vmatpush.msra.mxu1 %v2307_v6  ;;  %476 = vmatpush.msra.mxu3 %v2307_v6  ;;  %v174_v25 = vsub.f32 1.0, %v99_v24 }
   0x8   :  { %121 = vmatpush.msra.mxu0 %v2318_v7  ;;  %v2333_v9 = vld [vmem:[#allocation2] sm:$0x3]  ;;  %359 = vmatpush.msra.mxu2 %v2318_v7 }
   0x9   :  { %241 = vmatpush.msra.mxu1 %v2323_v8  ;;  %2020 = vmatmul.msk.f32.vlgmr.msra.gmra.mxu0 %vm102_vm1, %v2333_v9  ;;  %v2337_v10 = vld [vmem:[#allocation3] sm:$0x3] }
   0xa   :  { %477 = vmatpush.msra.mxu3 %v2323_v8  ;;  %v2340_v11 = vld [vmem:[#allocation4] sm:$0x3]  ;;  %148 = vrot.lane.b32.xlu1 %v2337_v10, %s2231_s4 }
   0xb   :  { %2024 = vmatmul.msk.f32.vlgmr.msra.gmra.mxu1 %vm102_vm1, %v2340_v11  ;;  %592 = vmatpush.msrb.mxu0 %v2278_v0  ;;  %v2354_v12 = vld [vmem:[#allocation5] sm:$0x3] }
   0xc   :  { %710 = vmatpush.msrb.mxu1 %v2283_v1  ;;  %946 = vmatpush.msrb.mxu3 %v2283_v1 }
   0xd   :  { %593 = vmatpush.msrb.mxu0 %v2288_v2  ;;  %828 = vmatpush.msrb.mxu2 %v2278_v0 }
   0xe   :  { %711 = vmatpush.msrb.mxu1 %v2296_v4  ;;  %947 = vmatpush.msrb.mxu3 %v2296_v4 }
   0xf   :  { %594 = vmatpush.msrb.mxu0 %v2302_v5  ;;  %829 = vmatpush.msrb.mxu2 %v2288_v2 }
  0x10   :  { %712 = vmatpush.msrb.mxu1 %v2307_v6  ;;  %948 = vmatpush.msrb.mxu3 %v2307_v6 }
  0x11   :  { %595 = vmatpush.msrb.mxu0 %v2318_v7  ;;  %830 = vmatpush.msrb.mxu2 %v2302_v5 }
  0x12   :  { %268 = vrot.lane.b32.xlu1 %v2354_v12, %s2231_s4  ;;  %713 = vmatpush.msrb.mxu1 %v2323_v8 }
  0x13   :  { %949 = vmatpush.msrb.mxu3 %v2323_v8  ;;  %831 = vmatpush.msrb.mxu2 %v2318_v7 }
  0x14   :  { %1064 = vmatpush.msra.mxu0 %v2278_v0  ;;  %1182 = vmatpush.msra.mxu1 %v2283_v1 }
  0x15   :  { %2101 = vset.pattern.permute.xlu2 %v2232_v17 }
  0x16   :  { %1065 = vmatpush.msra.mxu0 %v2288_v2  ;;  %1183 = vmatpush.msra.mxu1 %v2296_v4 }
  0x18   :  { %1066 = vmatpush.msra.mxu0 %v2302_v5  ;;  %1184 = vmatpush.msra.mxu1 %v2307_v6 }
  0x1a   :  { %1067 = vmatpush.msra.mxu0 %v2318_v7  ;;  %1185 = vmatpush.msra.mxu1 %v2323_v8 }
  0x1b   :  { %297 = vperm.xlu1 %2100, %v294_v18  }
  0x7c   :  { %v149_v56 = vpop.permute.xlu1 %148 }
  0x84   :  { %v269_v60 = vpop.permute.xlu1 %268 }
  0x86   :  { %v123_v14 = vpop.f32.mrf.mxu0 }
  0x87   :  { %v126_v15 = vadd.f32 %v123_v14, %v98_v13 }
  0x88   :  { %v243_v20 = vpop.f32.mrf.mxu1 }
  0x89   :  { %2102 = vtanh.f32 %v126_v15  ;;  %v246_v21 = vadd.f32 %v2022_v19, %v243_v20  ;;  %v2021_v26 = vmul.f32 -1.442695, %v126_v15 }
  0x8b   :  { %2104 = vtanh.f32 %v246_v21  ;;  %v2025_v27 = vmul.f32 -1.442695, %v246_v21 }
  0x8c   :  { %2106 = vpow2.f32 %v2021_v26 }
  0x8d   :  { %2108 = vpow2.f32 %v2025_v27  ;;  %v298_v13 = vpop.permute.xlu1 %297 }
  0x8e   :  { %v300_v14 = vmul.f32 %v298_v13, %v2340_v11 }
  0x8f   :  { %v2103_v22 = vpop.eup %2102 }
  0x90   :  { %153 = vrot.lane.b32.xlu0 %v2103_v22, %s2233_s22 }
  0x91   :  { %v2105_v23 = vpop.eup %2104 }
  0x92   :  { %v2107_v28 = vpop.eup %2106 }
  0x93   :  { %v130_v29 = vadd.f32 1.0, %v2107_v28  ;;  %v2109_v30 = vpop.eup %2108 }
  0x94   :  { %v250_v31 = vadd.f32 1.0, %v2109_v30 }
  0x95   :  { %2110 = vrcp.f32 %v130_v29  ;;  %v142_v40 = vand.u32 2147483648, %v130_v29  ;;  %vm136_vm3 = vweird.f32 %v130_v29  ;;  %v140_v41 = vand.u32 2147483647, %v130_v29 }
  0x96   :  { %2112 = vrcp.f32 %v250_v31  ;;  %vm256_vm6 = vweird.f32 %v250_v31  ;;  %v262_v49 = vand.u32 2147483648, %v250_v31  ;;  %v260_v50 = vand.u32 2147483647, %v250_v31 }
  0x97   :  { %v143_v44 = vor.u32 1.1754944e-38, %v142_v40  ;;  %vm141_vm5 = vcmp.eq.f32.partialorder %v140_v41, 8.507059e+37  ;;  %v2032_v41 = vld [vmem:[%s2967_s1 + $0xc] sm:$0x3] }
  0x98   :  { %273 = vrot.lane.b32.xlu0 %v2105_v23, %s2233_s22  ;;  %v263_v52 = vor.u32 1.1754944e-38, %v262_v49  ;;  %vm261_vm9 = vcmp.eq.f32.partialorder %v260_v50, 8.507059e+37  ;;  %v2028_v50 = vld [vmem:[%s2968_s2 + $0x2] sm:$0x3] }
  0x9b   :  { %v2111_v32 = vpop.eup %2110 }
  0x9c   :  { %v132_v33 = vmul.f32 %v2111_v32, %v130_v29  ;;  %v2113_v35 = vpop.eup %2112  ;;  %vm137_vm2 = vweird.f32 %v2111_v32 }
  0x9d   :  { %v252_v37 = vmul.f32 %v2113_v35, %v250_v31  ;;  %vm138_vm4 = vmor %vm136_vm3, %vm137_vm2  ;;  %vm257_vm7 = vweird.f32 %v2113_v35  ;;  %v307_v31 = vmul.f32 %v298_v13, %v2354_v12 }
  0x9e   :  { %v133_v34 = vsub.f32 1.0, %v132_v33  ;;  %vm258_vm8 = vmor %vm256_vm6, %vm257_vm7 }
  0x9f   :  { %v253_v39 = vsub.f32 1.0, %v252_v37 }
  0xa0   :  { %177 = vperm.xlu0 %2099, %v174_v25   ;;  %v134_v36 = vmul.f32 %v2111_v32, %v133_v34 }
  0xa1   :  { %v254_v43 = vmul.f32 %v2113_v35, %v253_v39 }
  0xa2   :  { %v135_v38 = vadd.f32 %v2111_v32, %v134_v36 }
  0xa3   :  { %v255_v47 = vadd.f32 %v2113_v35, %v254_v43 }
  0xa4   :  { %v139_v42 = vsel %vm138_vm4, %v2111_v32, %v135_v38 }
  0xa5   :  { %v144_v45 = vsel %vm141_vm5, %v143_v44, %v139_v42  ;;  %v259_v51 = vsel %vm258_vm8, %v2113_v35, %v255_v47  ;;  %v2027_v44 = vld [vmem:[%s2965_s0 + $0x2] sm:$0x3] }
  0xa6   :  { %v264_v53 = vsel %vm261_vm9, %v263_v52, %v259_v51  ;;  %v151_v57 = vmul.f32 %v149_v56, %v144_v45  ;;  %v412_v51 = vsub.f32 1.0, %v2028_v50 }
  0xa7   :  { %v271_v61 = vmul.f32 %v269_v60, %v264_v53 }
  0xa8   :  { %290 = vperm.xlu0 %2099, %v2023_v16  }
 0x102   :  { %v154_v46 = vpop.permute.xlu0 %153 }
 0x103   :  { %v156_v48 = vmul.f32 %v154_v46, %v144_v45 }
 0x105   :  { %158 = vrot.lane.b32.xlu2 %v156_v48, %s2231_s4 }
 0x10a   :  { %v274_v54 = vpop.permute.xlu0 %273 }
 0x10b   :  { %v276_v55 = vmul.f32 %v274_v54, %v264_v53 }
 0x10d   :  { %278 = vrot.lane.b32.xlu2 %v276_v55, %s2231_s4 }
 0x112   :  { %v178_v16 = vpop.permute.xlu0 %177 }
 0x113   :  { %v180_v17 = vmul.f32 %v178_v16, %v2333_v9  ;;  %v187_v18 = vmul.f32 %v178_v16, %v2337_v10 }
 0x115   :  { %170 = vperm.xlu2 %2101, %v99_v24  }
 0x11a   :  { %v291_v23 = vpop.permute.xlu0 %290 }
 0x15f   :  { %v159_v58 = vpop.permute.xlu2 %158 }
 0x160   :  { %v161_v59 = vadd.f32 %v159_v58, %v151_v57 }
 0x162   :  { %2114 = vtanh.f32 %v161_v59 }
 0x167   :  { %v279_v62 = vpop.permute.xlu2 %278 }
 0x168   :  { %v2115_v63 = vpop.eup %2114  ;;  %v281_v3 = vadd.f32 %v279_v62, %v271_v61 }
 0x169   :  { %164 = vrot.lane.b32.xlu2 %v2115_v63, %s2233_s22 }
 0x16a   :  { %2116 = vtanh.f32 %v281_v3  ;;  %v306_v36 = vmul.f32 %v291_v23, %v281_v3 }
 0x16f   :  { %v171_v19 = vpop.permute.xlu2 %170 }
 0x170   :  { %v2117_v15 = vpop.eup %2116  ;;  %v186_v29 = vmul.f32 %v171_v19, %v161_v59 }
 0x171   :  { %284 = vrot.lane.b32.xlu1 %v2117_v15, %s2233_s22  ;;  %302 = vrot.lane.b32.xlu2 %v300_v14, %s2234_s25 }
 0x179   :  { %182 = vrot.lane.b32.xlu1 %v180_v17, %s2234_s25  ;;  %189 = vrot.lane.b32.xlu2 %v187_v18, %s2231_s4 }
 0x1c3   :  { %v165_v20 = vpop.permute.xlu2 %164 }
 0x1c4   :  { %v167_v24 = vmul.f32 %v165_v20, %v144_v45 }
 0x1c6   :  { %v2403_v9 = vmul.f32 %v171_v19, %v167_v24 }
 0x1cb   :  { %v303_v21 = vpop.permute.xlu2 %302 }
 0x1d3   :  { %v190_v28 = vpop.permute.xlu2 %189 }
 0x1d4   :  { %v192_v30 = vadd.f32 %v190_v28, %v186_v29  ;;  %v2033_v29 = vld [vmem:[%s2966_s3 + $0xc] sm:$0x3] }
 0x1e3   :  { %v285_v22 = vpop.permute.xlu1 %284 }
 0x1e4   :  { %v287_v11 = vmul.f32 %v285_v22, %v264_v53 }
 0x1e6   :  { %v2399_v25 = vmul.f32 %v291_v23, %v287_v11 }
 0x1e8   :  { %v305_v26 = vadd.f32 %v303_v21, %v2399_v25 }
 0x1ea   :  { %314 = vrot.lane.b32.xlu1 %v305_v26, %s2231_s4 }
 0x1eb   :  { %v183_v10 = vpop.permute.xlu1 %182 }
 0x1ec   :  { %v185_v27 = vadd.f32 %v183_v10, %v2403_v9 }
 0x1ee   :  { %194 = vrot.lane.b32.xlu0 %v185_v27, %s2231_s4 }
 0x1f2   :  { %200 = vrot.lane.b32.xlu1 %v192_v30, %s2234_s25  ;;  %v530_v30 = vsub.f32 1.0, %v2033_v29 }
 0x1f6   :  { %309 = vrot.lane.b32.xlu0 %v307_v31, %s2231_s4 }
 0x25c   :  { %v315_v32 = vpop.permute.xlu1 %314 }
 0x25d   :  { %317 = vst.msk [vmem:[#allocation4] sm:$0x3] %vm85_vm0, %v315_v32 }
 0x260   :  { %v195_v33 = vpop.permute.xlu0 %194 }
 0x261   :  { %198 = vst.msk [vmem:[#allocation2] sm:$0x3] %vm85_vm0, %v195_v33 }
 0x264   :  { %v201_v34 = vpop.permute.xlu1 %200  ;;  %v2412_v35 = vld [vmem:[#allocation4] sm:$0x3] }
 0x265   :  { %203 = vst.msk [vmem:[#allocation3] sm:$0x3] %vm85_vm0, %v201_v34  ;;  %2034 = vmatmul.msk.f32.vlgmr.msra.gmra.mxu3 %vm102_vm1, %v2412_v35 }
 0x266   :  { %1418 = vmatpush.msra.mxu3 %v2283_v1 }
 0x268   :  { %v310_v12 = vpop.permute.xlu0 %309  ;;  %v2418_v37 = vld [vmem:[#allocation2] sm:$0x3]  ;;  %1419 = vmatpush.msra.mxu3 %v2296_v4 }
 0x269   :  { %v312_v38 = vadd.f32 %v310_v12, %v306_v36  ;;  %2029 = vmatmul.msk.f32.vlgmr.msra.gmra.mxu2 %vm102_vm1, %v2418_v37 }
 0x26a   :  { %1300 = vmatpush.msra.mxu2 %v2278_v0  ;;  %1420 = vmatpush.msra.mxu3 %v2307_v6 }
 0x26b   :  { %319 = vrot.lane.b32.xlu2 %v312_v38, %s2234_s25 }
 0x26c   :  { %1301 = vmatpush.msra.mxu2 %v2288_v2  ;;  %1421 = vmatpush.msra.mxu3 %v2323_v8  ;;  %v2430_v39 = vld [vmem:[#allocation3] sm:$0x3] }
 0x26e   :  { %1302 = vmatpush.msra.mxu2 %v2302_v5 }
 0x270   :  { %1303 = vmatpush.msra.mxu2 %v2318_v7 }
 0x273   :  { %386 = vrot.lane.b32.xlu2 %v2430_v39, %s2231_s4 }
 0x2c5   :  { %v320_v40 = vpop.permute.xlu2 %319 }
 0x2c6   :  { %322 = vst.msk [vmem:[#allocation5] sm:$0x3] %vm85_vm0, %v320_v40 }
 0x2cd   :  { %v2443_v49 = vld [vmem:[#allocation5] sm:$0x3]  ;;  %v387_v31 = vpop.permute.xlu2 %386 }
 0x2e8   :  { %v479_v42 = vpop.f32.mrf.mxu3 }
 0x2e9   :  { %v482_v43 = vadd.f32 %v2032_v41, %v479_v42 }
 0x2eb   :  { %2118 = vtanh.f32 %v482_v43  ;;  %v2035_v52 = vmul.f32 -1.442695, %v482_v43 }
 0x2ec   :  { %v361_v45 = vpop.f32.mrf.mxu2 }
 0x2ed   :  { %v364_v46 = vadd.f32 %v2027_v44, %v361_v45 }
 0x2ef   :  { %2120 = vtanh.f32 %v364_v46  ;;  %v2030_v53 = vmul.f32 -1.442695, %v364_v46 }
 0x2f0   :  { %2122 = vpow2.f32 %v2035_v52 }
 0x2f1   :  { %v2119_v47 = vpop.eup %2118  ;;  %2124 = vpow2.f32 %v2030_v53 }
 0x2f2   :  { %509 = vrot.lane.b32.xlu1 %v2119_v47, %s2233_s22 }
 0x2f5   :  { %v2121_v48 = vpop.eup %2120 }
 0x2f6   :  { %391 = vrot.lane.b32.xlu0 %v2121_v48, %s2233_s22  ;;  %v2123_v54 = vpop.eup %2122 }
 0x2f7   :  { %v486_v55 = vadd.f32 1.0, %v2123_v54  ;;  %v2125_v56 = vpop.eup %2124 }
 0x2f8   :  { %v368_v57 = vadd.f32 1.0, %v2125_v56 }
 0x2f9   :  { %2126 = vrcp.f32 %v486_v55  ;;  %v498_v15 = vand.u32 2147483648, %v486_v55  ;;  %vm492_vm11 = vweird.f32 %v486_v55  ;;  %v496_v16 = vand.u32 2147483647, %v486_v55 }
 0x2fa   :  { %2128 = vrcp.f32 %v368_v57  ;;  %v380_v20 = vand.u32 2147483648, %v368_v57  ;;  %vm374_vm15 = vweird.f32 %v368_v57  ;;  %v378_v21 = vand.u32 2147483647, %v368_v57 }
 0x2fb   :  { %v499_v19 = vor.u32 1.1754944e-38, %v498_v15  ;;  %vm497_vm14 = vcmp.eq.f32.partialorder %v496_v16, 8.507059e+37 }
 0x2fc   :  { %v381_v26 = vor.u32 1.1754944e-38, %v380_v20  ;;  %vm379_vm3 = vcmp.eq.f32.partialorder %v378_v21, 8.507059e+37 }
 0x2fe   :  { %504 = vrot.lane.b32.xlu0 %v2443_v49, %s2231_s4 }
 0x2ff   :  { %v2127_v58 = vpop.eup %2126 }
 0x300   :  { %v488_v59 = vmul.f32 %v2127_v58, %v486_v55  ;;  %v2129_v60 = vpop.eup %2128  ;;  %vm493_vm10 = vweird.f32 %v2127_v58 }
 0x301   :  { %v370_v62 = vmul.f32 %v2129_v60, %v368_v57  ;;  %vm494_vm12 = vmor %vm492_vm11, %vm493_vm10  ;;  %vm375_vm13 = vweird.f32 %v2129_v60 }
 0x302   :  { %v489_v61 = vsub.f32 1.0, %v488_v59  ;;  %vm376_vm2 = vmor %vm374_vm15, %vm375_vm13 }
 0x303   :  { %v371_v3 = vsub.f32 1.0, %v370_v62 }
 0x304   :  { %v490_v63 = vmul.f32 %v2127_v58, %v489_v61 }
 0x305   :  { %v372_v14 = vmul.f32 %v2129_v60, %v371_v3 }
 0x306   :  { %415 = vperm.xlu0 %2099, %v412_v51   ;;  %v491_v13 = vadd.f32 %v2127_v58, %v490_v63 }
 0x307   :  { %v373_v18 = vadd.f32 %v2129_v60, %v372_v14 }
 0x308   :  { %v495_v17 = vsel %vm494_vm12, %v2127_v58, %v491_v13 }
 0x309   :  { %v500_v22 = vsel %vm497_vm14, %v499_v19, %v495_v17  ;;  %v377_v24 = vsel %vm376_vm2, %v2129_v60, %v373_v18  ;;  %v2037_v19 = vld [vmem:[%s2965_s0 + $0x4] sm:$0x3] }
 0x30a   :  { %v382_v10 = vsel %vm379_vm3, %v381_v26, %v377_v24  ;;  %v2042_v26 = vld [vmem:[%s2967_s1 + $0xa] sm:$0x3] }
 0x30b   :  { %v389_v41 = vmul.f32 %v387_v31, %v382_v10 }
 0x364   :  { %v510_v11 = vpop.permute.xlu1 %509 }
 0x365   :  { %v512_v23 = vmul.f32 %v510_v11, %v500_v22 }
 0x367   :  { %514 = vrot.lane.b32.xlu2 %v512_v23, %s2231_s4  ;;  %v2038_v23 = vld [vmem:[%s2968_s2 + $0x4] sm:$0x3] }
 0x368   :  { %v392_v27 = vpop.permute.xlu0 %391  ;;  %v648_v24 = vsub.f32 1.0, %v2038_v23 }
 0x369   :  { %v394_v28 = vmul.f32 %v392_v27, %v382_v10 }
 0x36b   :  { %396 = vrot.lane.b32.xlu1 %v394_v28, %s2231_s4 }
 0x370   :  { %v505_v32 = vpop.permute.xlu0 %504 }
 0x371   :  { %v507_v33 = vmul.f32 %v505_v32, %v500_v22 }
 0x373   :  { %533 = vperm.xlu1 %2100, %v530_v30  }
 0x378   :  { %v416_v38 = vpop.permute.xlu0 %415 }
 0x379   :  { %v418_v40 = vmul.f32 %v416_v38, %v2418_v37  ;;  %v425_v47 = vmul.f32 %v416_v38, %v2430_v39 }
 0x37b   :  { %408 = vperm.xlu1 %2100, %v2028_v50  }
 0x3c1   :  { %v515_v34 = vpop.permute.xlu2 %514 }
 0x3c2   :  { %v517_v36 = vadd.f32 %v515_v34, %v507_v33 }
 0x3c4   :  { %2130 = vtanh.f32 %v517_v36 }
 0x3ca   :  { %v2131_v12 = vpop.eup %2130 }
 0x3cb   :  { %520 = vrot.lane.b32.xlu0 %v2131_v12, %s2233_s22 }
 0x3d3   :  { %420 = vrot.lane.b32.xlu0 %v418_v40, %s2234_s25 }
 0x3dd   :  { %v397_v42 = vpop.permute.xlu1 %396 }
 0x3de   :  { %v399_v43 = vadd.f32 %v397_v42, %v389_v41 }
 0x3e0   :  { %2132 = vtanh.f32 %v399_v43 }
 0x3e5   :  { %v534_v44 = vpop.permute.xlu1 %533 }
 0x3e6   :  { %v2133_v45 = vpop.eup %2132  ;;  %v536_v46 = vmul.f32 %v534_v44, %v2412_v35  ;;  %v543_v35 = vmul.f32 %v534_v44, %v2443_v49 }
 0x3e7   :  { %402 = vrot.lane.b32.xlu2 %v2133_v45, %s2233_s22 }
 0x3e8   :  { %538 = vrot.lane.b32.xlu1 %v536_v46, %s2234_s25  ;;  %v2043_v46 = vld [vmem:[%s2966_s3 + $0xa] sm:$0x3] }
 0x3ed   :  { %v409_v51 = vpop.permute.xlu1 %408 }
 0x3ee   :  { %v424_v59 = vmul.f32 %v409_v51, %v399_v43 }
 0x3ef   :  { %526 = vperm.xlu2 %2101, %v2033_v29  }
 0x3f0   :  { %427 = vrot.lane.b32.xlu1 %v425_v47, %s2231_s4  ;;  %v766_v47 = vsub.f32 1.0, %v2043_v46 }
 0x43d   :  { %v521_v37 = vpop.permute.xlu0 %520 }
 0x43e   :  { %v523_v39 = vmul.f32 %v521_v37, %v500_v22 }
 0x441   :  { %v403_v48 = vpop.permute.xlu2 %402 }
 0x442   :  { %v405_v50 = vmul.f32 %v403_v48, %v382_v10 }
 0x444   :  { %v2463_v52 = vmul.f32 %v409_v51, %v405_v50 }
 0x445   :  { %v421_v53 = vpop.permute.xlu0 %420 }
 0x446   :  { %v423_v54 = vadd.f32 %v421_v53, %v2463_v52 }
 0x448   :  { %432 = vrot.lane.b32.xlu2 %v423_v54, %s2231_s4 }
 0x449   :  { %v527_v55 = vpop.permute.xlu2 %526 }
 0x44a   :  { %v2469_v56 = vmul.f32 %v527_v55, %v523_v39  ;;  %v542_v49 = vmul.f32 %v527_v55, %v517_v36 }
 0x450   :  { %545 = vrot.lane.b32.xlu2 %v543_v35, %s2231_s4 }
 0x45a   :  { %v539_v57 = vpop.permute.xlu1 %538 }
 0x45b   :  { %v541_v58 = vadd.f32 %v539_v57, %v2469_v56 }
 0x45d   :  { %550 = vrot.lane.b32.xlu0 %v541_v58, %s2231_s4 }
 0x462   :  { %v428_v60 = vpop.permute.xlu1 %427 }
 0x463   :  { %v430_v61 = vadd.f32 %v428_v60, %v424_v59 }
 0x465   :  { %437 = vrot.lane.b32.xlu0 %v430_v61, %s2234_s25 }
 0x4a2   :  { %v433_v62 = vpop.permute.xlu2 %432 }
 0x4a3   :  { %435 = vst.msk [vmem:[#allocation2] sm:$0x3] %vm85_vm0, %v433_v62 }
 0x4aa   :  { %v546_v63 = vpop.permute.xlu2 %545  ;;  %v2475_v3 = vld [vmem:[#allocation2] sm:$0x3] }
 0x4ab   :  { %v548_v13 = vadd.f32 %v546_v63, %v542_v49  ;;  %2039 = vmatmul.msk.f32.vlgmr.msrb.gmra.mxu0 %vm102_vm1, %v2475_v3 }
 0x4ac   :  { %1536 = vmatpush.msrb.mxu0 %v2278_v0 }
 0x4ad   :  { %555 = vrot.lane.b32.xlu1 %v548_v13, %s2234_s25 }
 0x4ae   :  { %1537 = vmatpush.msrb.mxu0 %v2288_v2 }
 0x4b0   :  { %1538 = vmatpush.msrb.mxu0 %v2302_v5 }
 0x4b2   :  { %1539 = vmatpush.msrb.mxu0 %v2318_v7 }
 0x4cf   :  { %v551_v14 = vpop.permute.xlu0 %550 }
 0x4d0   :  { %553 = vst.msk [vmem:[#allocation4] sm:$0x3] %vm85_vm0, %v551_v14 }
 0x4d7   :  { %v438_v15 = vpop.permute.xlu0 %437  ;;  %v2485_v16 = vld [vmem:[#allocation4] sm:$0x3] }
 0x4d8   :  { %440 = vst.msk [vmem:[#allocation3] sm:$0x3] %vm85_vm0, %v438_v15  ;;  %2044 = vmatmul.msk.f32.vlgmr.msrb.gmra.mxu1 %vm102_vm1, %v2485_v16 }
 0x4d9   :  { %1654 = vmatpush.msrb.mxu1 %v2283_v1 }
 0x4db   :  { %1655 = vmatpush.msrb.mxu1 %v2296_v4 }
 0x4dd   :  { %1656 = vmatpush.msrb.mxu1 %v2307_v6 }
 0x4df   :  { %v2493_v17 = vld [vmem:[#allocation3] sm:$0x3]  ;;  %1657 = vmatpush.msrb.mxu1 %v2323_v8 }
 0x4e0   :  { %622 = vrot.lane.b32.xlu1 %v2493_v17, %s2231_s4 }
 0x51f   :  { %v556_v18 = vpop.permute.xlu1 %555 }
 0x520   :  { %558 = vst.msk [vmem:[#allocation5] sm:$0x3] %vm85_vm0, %v556_v18 }
 0x527   :  { %v2503_v11 = vld [vmem:[#allocation5] sm:$0x3] }
 0x528   :  { %v597_v20 = vpop.f32.mrf.mxu0 }
 0x529   :  { %v600_v21 = vadd.f32 %v2037_v19, %v597_v20 }
 0x52b   :  { %2134 = vtanh.f32 %v600_v21  ;;  %v2040_v29 = vmul.f32 -1.442695, %v600_v21 }
 0x531   :  { %v2135_v22 = vpop.eup %2134 }
 0x532   :  { %627 = vrot.lane.b32.xlu2 %v2135_v22, %s2233_s22 }
 0x53a   :  { %740 = vrot.lane.b32.xlu2 %v2503_v11, %s2231_s4 }
 0x542   :  { %651 = vperm.xlu2 %2101, %v648_v24  }
 0x552   :  { %v623_v49 = vpop.permute.xlu1 %622 }
 0x555   :  { %v715_v10 = vpop.f32.mrf.mxu1 }
 0x556   :  { %v718_v27 = vadd.f32 %v2042_v26, %v715_v10 }
 0x558   :  { %2136 = vtanh.f32 %v718_v27  ;;  %v2045_v37 = vmul.f32 -1.442695, %v718_v27 }
 0x559   :  { %2138 = vpow2.f32 %v2040_v29 }
 0x55e   :  { %v2137_v28 = vpop.eup %2136 }
 0x55f   :  { %745 = vrot.lane.b32.xlu0 %v2137_v28, %s2233_s22  ;;  %v2139_v30 = vpop.eup %2138 }
 0x560   :  { %v604_v31 = vadd.f32 1.0, %v2139_v30 }
 0x562   :  { %2140 = vrcp.f32 %v604_v31  ;;  %v616_v38 = vand.u32 2147483648, %v604_v31  ;;  %vm610_vm5 = vweird.f32 %v604_v31  ;;  %v614_v40 = vand.u32 2147483647, %v604_v31 }
 0x563   :  { %2142 = vpow2.f32 %v2045_v37 }
 0x564   :  { %v617_v42 = vor.u32 1.1754944e-38, %v616_v38  ;;  %vm615_vm7 = vcmp.eq.f32.partialorder %v614_v40, 8.507059e+37 }
 0x568   :  { %v2141_v32 = vpop.eup %2140 }
 0x569   :  { %v606_v33 = vmul.f32 %v2141_v32, %v604_v31  ;;  %vm611_vm4 = vweird.f32 %v2141_v32  ;;  %v2143_v48 = vpop.eup %2142 }
 0x56a   :  { %vm612_vm6 = vmor %vm610_vm5, %vm611_vm4  ;;  %v722_v50 = vadd.f32 1.0, %v2143_v48 }
 0x56b   :  { %v607_v34 = vsub.f32 1.0, %v606_v33 }
 0x56c   :  { %2144 = vrcp.f32 %v722_v50  ;;  %v734_v39 = vand.u32 2147483648, %v722_v50  ;;  %vm728_vm9 = vweird.f32 %v722_v50  ;;  %v732_v57 = vand.u32 2147483647, %v722_v50 }
 0x56d   :  { %v608_v36 = vmul.f32 %v2141_v32, %v607_v34 }
 0x56e   :  { %v735_v59 = vor.u32 1.1754944e-38, %v734_v39  ;;  %vm733_vm11 = vcmp.eq.f32.partialorder %v732_v57, 8.507059e+37 }
 0x56f   :  { %v609_v12 = vadd.f32 %v2141_v32, %v608_v36 }
 0x571   :  { %v613_v41 = vsel %vm612_vm6, %v2141_v32, %v609_v12 }
 0x572   :  { %v618_v43 = vsel %vm615_vm7, %v617_v42, %v613_v41  ;;  %v2145_v51 = vpop.eup %2144 }
 0x573   :  { %v724_v53 = vmul.f32 %v2145_v51, %v722_v50  ;;  %vm729_vm8 = vweird.f32 %v2145_v51  ;;  %v625_v63 = vmul.f32 %v623_v49, %v618_v43 }
 0x574   :  { %vm730_vm10 = vmor %vm728_vm9, %vm729_vm8 }
 0x575   :  { %v725_v54 = vsub.f32 1.0, %v724_v53 }
 0x577   :  { %v726_v35 = vmul.f32 %v2145_v51, %v725_v54  ;;  %v2048_v54 = vld [vmem:[%s2968_s2 + $0x6] sm:$0x3] }
 0x579   :  { %v727_v55 = vadd.f32 %v2145_v51, %v726_v35  ;;  %v884_v35 = vsub.f32 1.0, %v2048_v54 }
 0x57b   :  { %v731_v58 = vsel %vm730_vm10, %v2145_v51, %v727_v55 }
 0x57c   :  { %v736_v60 = vsel %vm733_vm11, %v735_v59, %v731_v58 }
 0x58c   :  { %v628_v44 = vpop.permute.xlu2 %627 }
 0x58d   :  { %v630_v45 = vmul.f32 %v628_v44, %v618_v43 }
 0x58f   :  { %632 = vrot.lane.b32.xlu0 %v630_v45, %s2231_s4 }
 0x594   :  { %v741_v15 = vpop.permute.xlu2 %740 }
 0x597   :  { %769 = vperm.xlu0 %2099, %v766_v47  }
 0x59c   :  { %v652_v21 = vpop.permute.xlu2 %651 }
 0x59d   :  { %v661_v22 = vmul.f32 %v652_v21, %v2493_v17  ;;  %v654_v27 = vmul.f32 %v652_v21, %v2475_v3 }
 0x59f   :  { %644 = vperm.xlu0 %2099, %v2038_v23   ;;  %v743_v23 = vmul.f32 %v741_v15, %v736_v60 }
 0x5d1   :  { %v746_v61 = vpop.permute.xlu0 %745 }
 0x5d2   :  { %v748_v62 = vmul.f32 %v746_v61, %v736_v60 }
 0x5d4   :  { %750 = vrot.lane.b32.xlu1 %v748_v62, %s2231_s4 }
 0x601   :  { %v633_v13 = vpop.permute.xlu0 %632 }
 0x602   :  { %v635_v14 = vadd.f32 %v633_v13, %v625_v63 }
 0x604   :  { %2146 = vtanh.f32 %v635_v14 }
 0x609   :  { %v770_v18 = vpop.permute.xlu0 %769 }
 0x60a   :  { %v2147_v19 = vpop.eup %2146  ;;  %v772_v20 = vmul.f32 %v770_v18, %v2485_v16  ;;  %v779_v42 = vmul.f32 %v770_v18, %v2503_v11 }
 0x60b   :  { %638 = vrot.lane.b32.xlu1 %v2147_v19, %s2233_s22 }
 0x60c   :  { %774 = vrot.lane.b32.xlu0 %v772_v20, %s2234_s25 }
 0x611   :  { %v645_v16 = vpop.permute.xlu0 %644 }
 0x612   :  { %v660_v40 = vmul.f32 %v645_v16, %v635_v14 }
 0x613   :  { %762 = vperm.xlu1 %2100, %v2043_v46  }
 0x614   :  { %663 = vrot.lane.b32.xlu0 %v661_v22, %s2231_s4 }
 0x646   :  { %v751_v24 = vpop.permute.xlu1 %750 }
 0x647   :  { %v753_v26 = vadd.f32 %v751_v24, %v743_v23 }
 0x649   :  { %2148 = vtanh.f32 %v753_v26 }
 0x64f   :  { %v2149_v10 = vpop.eup %2148 }
 0x650   :  { %756 = vrot.lane.b32.xlu2 %v2149_v10, %s2233_s22 }
 0x658   :  { %656 = vrot.lane.b32.xlu2 %v654_v27, %s2234_s25 }
 0x67d   :  { %v639_v28 = vpop.permute.xlu1 %638 }
 0x67e   :  { %v775_v29 = vpop.permute.xlu0 %774  ;;  %v641_v32 = vmul.f32 %v639_v28, %v618_v43 }
 0x680   :  { %v2531_v36 = vmul.f32 %v645_v16, %v641_v32 }
 0x685   :  { %v763_v17 = vpop.permute.xlu1 %762 }
 0x686   :  { %v664_v38 = vpop.permute.xlu0 %663  ;;  %v778_v46 = vmul.f32 %v763_v17, %v753_v26 }
 0x687   :  { %v666_v41 = vadd.f32 %v664_v38, %v660_v40 }
 0x6aa   :  { %v757_v30 = vpop.permute.xlu2 %756 }
 0x6ab   :  { %v759_v31 = vmul.f32 %v757_v30, %v736_v60 }
 0x6ad   :  { %v2527_v33 = vmul.f32 %v763_v17, %v759_v31 }
 0x6af   :  { %v777_v34 = vadd.f32 %v775_v29, %v2527_v33 }
 0x6b1   :  { %786 = vrot.lane.b32.xlu2 %v777_v34, %s2231_s4  ;;  %v2053_v34 = vld [vmem:[%s2966_s3 + $0x8] sm:$0x3] }
 0x6b2   :  { %v657_v12 = vpop.permute.xlu2 %656 }
 0x6b3   :  { %v659_v3 = vadd.f32 %v657_v12, %v2531_v36  ;;  %v1002_v12 = vsub.f32 1.0, %v2053_v34 }
 0x6b5   :  { %668 = vrot.lane.b32.xlu1 %v659_v3, %s2231_s4 }
 0x6b9   :  { %673 = vrot.lane.b32.xlu2 %v666_v41, %s2234_s25 }
 0x6bd   :  { %781 = vrot.lane.b32.xlu1 %v779_v42, %s2231_s4 }
 0x70b   :  { %v787_v43 = vpop.permute.xlu2 %786 }
 0x70c   :  { %789 = vst.msk [vmem:[#allocation4] sm:$0x3] %vm85_vm0, %v787_v43 }
 0x713   :  { %v674_v44 = vpop.permute.xlu2 %673  ;;  %v2539_v45 = vld [vmem:[#allocation4] sm:$0x3] }
 0x714   :  { %676 = vst.msk [vmem:[#allocation3] sm:$0x3] %vm85_vm0, %v674_v44  ;;  %2054 = vmatmul.msk.f32.vlgmr.msrb.gmra.mxu3 %vm102_vm1, %v2539_v45 }
 0x715   :  { %1888 = vmatpush.msrb.mxu3 %v2283_v1 }
 0x717   :  { %1889 = vmatpush.msrb.mxu3 %v2296_v4  ;;  %v2052_v4 = vld [vmem:[%s2967_s1 + $0x8] sm:$0x3] }
 0x719   :  { %1890 = vmatpush.msrb.mxu3 %v2307_v6 }
 0x71b   :  { %1891 = vmatpush.msrb.mxu3 %v2323_v8  ;;  %v2558_v1 = vld [vmem:[#allocation3] sm:$0x3] }
 0x727   :  { %v669_v11 = vpop.permute.xlu1 %668 }
 0x728   :  { %671 = vst.msk [vmem:[#allocation2] sm:$0x3] %vm85_vm0, %v669_v11 }
 0x72f   :  { %v782_v47 = vpop.permute.xlu1 %781  ;;  %v2549_v37 = vld [vmem:[#allocation2] sm:$0x3] }
 0x730   :  { %v784_v48 = vadd.f32 %v782_v47, %v778_v46  ;;  %2049 = vmatmul.msk.f32.vlgmr.msrb.gmra.mxu2 %vm102_vm1, %v2549_v37 }
 0x731   :  { %1772 = vmatpush.msrb.mxu2 %v2278_v0 }
 0x732   :  { %791 = vrot.lane.b32.xlu0 %v784_v48, %s2234_s25 }
 0x733   :  { %1773 = vmatpush.msrb.mxu2 %v2288_v2 }
 0x735   :  { %1774 = vmatpush.msrb.mxu2 %v2302_v5  ;;  %v2047_v5 = vld [vmem:[%s2965_s0 + $0x6] sm:$0x3] }
 0x737   :  { %1775 = vmatpush.msrb.mxu2 %v2318_v7 }
 0x73a   :  { %858 = vrot.lane.b32.xlu0 %v2558_v1, %s2231_s4 }
 0x797   :  { %v951_v6 = vpop.f32.mrf.mxu3 }
 0x798   :  { %v954_v8 = vadd.f32 %v2052_v4, %v951_v6 }
 0x79a   :  { %2150 = vtanh.f32 %v954_v8  ;;  %v2055_v55 = vmul.f32 -1.442695, %v954_v8 }
 0x7a0   :  { %v2151_v0 = vpop.eup %2150 }
 0x7a1   :  { %981 = vrot.lane.b32.xlu2 %v2151_v0, %s2233_s22 }
 0x7a4   :  { %v792_v2 = vpop.permute.xlu0 %791 }
 0x7a5   :  { %794 = vst.msk [vmem:[#allocation5] sm:$0x3] %vm85_vm0, %v792_v2 }
 0x7ac   :  { %v2571_v53 = vld [vmem:[#allocation5] sm:$0x3]  ;;  %v859_v3 = vpop.permute.xlu0 %858 }
 0x7b3   :  { %v833_v7 = vpop.f32.mrf.mxu2 }
 0x7b4   :  { %v836_v50 = vadd.f32 %v2047_v5, %v833_v7 }
 0x7b6   :  { %2152 = vtanh.f32 %v836_v50  ;;  %v2050_v20 = vmul.f32 -1.442695, %v836_v50 }
 0x7b7   :  { %2154 = vpow2.f32 %v2055_v55 }
 0x7bc   :  { %v2153_v51 = vpop.eup %2152 }
 0x7bd   :  { %863 = vrot.lane.b32.xlu1 %v2153_v51, %s2233_s22  ;;  %v2155_v39 = vpop.eup %2154 }
 0x7be   :  { %v958_v57 = vadd.f32 1.0, %v2155_v39 }
 0x7c0   :  { %2156 = vrcp.f32 %v958_v57  ;;  %v970_v49 = vand.u32 2147483648, %v958_v57  ;;  %vm964_vm13 = vweird.f32 %v958_v57  ;;  %v968_v63 = vand.u32 2147483647, %v958_v57 }
 0x7c1   :  { %2158 = vpow2.f32 %v2050_v20  ;;  %v2057_v20 = vld [vmem:[%s2965_s0 + $0x8] sm:$0x3] }
 0x7c2   :  { %v971_v14 = vor.u32 1.1754944e-38, %v970_v49  ;;  %vm969_vm15 = vcmp.eq.f32.partialorder %v968_v63, 8.507059e+37 }
 0x7c5   :  { %976 = vrot.lane.b32.xlu1 %v2571_v53, %s2231_s4 }
 0x7c6   :  { %v2157_v58 = vpop.eup %2156 }
 0x7c7   :  { %v960_v59 = vmul.f32 %v2157_v58, %v958_v57  ;;  %vm965_vm12 = vweird.f32 %v2157_v58  ;;  %v2159_v21 = vpop.eup %2158 }
 0x7c8   :  { %vm966_vm14 = vmor %vm964_vm13, %vm965_vm12  ;;  %v840_v22 = vadd.f32 1.0, %v2159_v21 }
 0x7c9   :  { %v961_v60 = vsub.f32 1.0, %v960_v59 }
 0x7ca   :  { %2160 = vrcp.f32 %v840_v22  ;;  %v852_v16 = vand.u32 2147483648, %v840_v22  ;;  %vm846_vm3 = vweird.f32 %v840_v22  ;;  %v850_v28 = vand.u32 2147483647, %v840_v22 }
 0x7cb   :  { %v962_v61 = vmul.f32 %v2157_v58, %v961_v60 }
 0x7cc   :  { %v853_v30 = vor.u32 1.1754944e-38, %v852_v16  ;;  %vm851_vm5 = vcmp.eq.f32.partialorder %v850_v28, 8.507059e+37  ;;  %v2058_v28 = vld [vmem:[%s2968_s2 + $0x8] sm:$0x3] }
 0x7cd   :  { %887 = vperm.xlu1 %2100, %v884_v35   ;;  %v963_v62 = vadd.f32 %v2157_v58, %v962_v61 }
 0x7cf   :  { %v967_v13 = vsel %vm966_vm14, %v2157_v58, %v963_v62 }
 0x7d0   :  { %v972_v15 = vsel %vm969_vm15, %v971_v14, %v967_v13  ;;  %v2161_v23 = vpop.eup %2160 }
 0x7d1   :  { %v842_v24 = vmul.f32 %v2161_v23, %v840_v22  ;;  %vm847_vm2 = vweird.f32 %v2161_v23 }
 0x7d2   :  { %vm848_vm4 = vmor %vm846_vm3, %vm847_vm2 }
 0x7d3   :  { %v843_v26 = vsub.f32 1.0, %v842_v24 }
 0x7d5   :  { %v844_v10 = vmul.f32 %v2161_v23, %v843_v26 }
 0x7d7   :  { %v845_v27 = vadd.f32 %v2161_v23, %v844_v10 }
 0x7d9   :  { %v849_v29 = vsel %vm848_vm4, %v2161_v23, %v845_v27  ;;  %v2062_v23 = vld [vmem:[%s2967_s1 + $0x6] sm:$0x3] }
 0x7da   :  { %v854_v31 = vsel %vm851_vm5, %v853_v30, %v849_v29  ;;  %v1120_v29 = vsub.f32 1.0, %v2058_v28 }
 0x7db   :  { %v861_v46 = vmul.f32 %v859_v3, %v854_v31 }
 0x7fb   :  { %v982_v18 = vpop.permute.xlu2 %981 }
 0x7fc   :  { %v984_v19 = vmul.f32 %v982_v18, %v972_v15 }
 0x7fe   :  { %986 = vrot.lane.b32.xlu0 %v984_v19, %s2231_s4 }
 0x82f   :  { %v864_v17 = vpop.permute.xlu1 %863 }
 0x830   :  { %v866_v32 = vmul.f32 %v864_v17, %v854_v31 }
 0x832   :  { %868 = vrot.lane.b32.xlu2 %v866_v32, %s2231_s4 }
 0x837   :  { %v977_v38 = vpop.permute.xlu1 %976 }
 0x838   :  { %v979_v40 = vmul.f32 %v977_v38, %v972_v15 }
 0x83a   :  { %1005 = vperm.xlu2 %2101, %v1002_v12  }
 0x83f   :  { %v888_v44 = vpop.permute.xlu1 %887 }
 0x840   :  { %v890_v11 = vmul.f32 %v888_v44, %v2549_v37  ;;  %v897_v0 = vmul.f32 %v888_v44, %v2558_v1 }
 0x842   :  { %880 = vperm.xlu2 %2101, %v2048_v54  }
 0x870   :  { %v987_v41 = vpop.permute.xlu0 %986 }
 0x871   :  { %v989_v42 = vadd.f32 %v987_v41, %v979_v40 }
 0x873   :  { %2162 = vtanh.f32 %v989_v42 }
 0x879   :  { %v2163_v43 = vpop.eup %2162 }
 0x87a   :  { %992 = vrot.lane.b32.xlu1 %v2163_v43, %s2233_s22 }
 0x882   :  { %892 = vrot.lane.b32.xlu1 %v890_v11, %s2234_s25 }
 0x88c   :  { %v869_v47 = vpop.permute.xlu2 %868 }
 0x88d   :  { %v871_v48 = vadd.f32 %v869_v47, %v861_v46 }
 0x88f   :  { %2164 = vtanh.f32 %v871_v48 }
 0x894   :  { %v1006_v4 = vpop.permute.xlu2 %1005 }
 0x895   :  { %v2165_v6 = vpop.eup %2164  ;;  %v1008_v8 = vmul.f32 %v1006_v4, %v2539_v45  ;;  %v1015_v57 = vmul.f32 %v1006_v4, %v2571_v53 }
 0x896   :  { %874 = vrot.lane.b32.xlu0 %v2165_v6, %s2233_s22 }
 0x897   :  { %1010 = vrot.lane.b32.xlu2 %v1008_v8, %s2234_s25 }
 0x89c   :  { %v881_v2 = vpop.permute.xlu2 %880 }
 0x89d   :  { %v896_v59 = vmul.f32 %v881_v2, %v871_v48 }
 0x89e   :  { %998 = vperm.xlu0 %2099, %v2053_v34  }
 0x89f   :  { %899 = vrot.lane.b32.xlu2 %v897_v0, %s2231_s4 }
 0x8ec   :  { %v993_v37 = vpop.permute.xlu1 %992 }
 0x8ed   :  { %v995_v45 = vmul.f32 %v993_v37, %v972_v15 }
 0x8f1   :  { %v1011_v35 = vpop.permute.xlu2 %1010 }
 0x8f4   :  { %v893_v51 = vpop.permute.xlu1 %892 }
 0x8f9   :  { %v900_v58 = vpop.permute.xlu2 %899 }
 0x8fa   :  { %v902_v60 = vadd.f32 %v900_v58, %v896_v59 }
 0x908   :  { %v875_v5 = vpop.permute.xlu0 %874 }
 0x909   :  { %v877_v7 = vmul.f32 %v875_v5, %v854_v31 }
 0x90b   :  { %v2591_v50 = vmul.f32 %v881_v2, %v877_v7 }
 0x90d   :  { %v895_v54 = vadd.f32 %v893_v51, %v2591_v50 }
 0x90f   :  { %904 = vrot.lane.b32.xlu0 %v895_v54, %s2231_s4 }
 0x910   :  { %v999_v55 = vpop.permute.xlu0 %998 }
 0x911   :  { %v2595_v39 = vmul.f32 %v999_v55, %v995_v45  ;;  %v1014_v49 = vmul.f32 %v999_v55, %v989_v42 }
 0x913   :  { %v1013_v1 = vadd.f32 %v1011_v35, %v2595_v39  ;;  %v2063_v35 = vld [vmem:[%s2966_s3 + $0x6] sm:$0x3] }
 0x915   :  { %1022 = vrot.lane.b32.xlu1 %v1013_v1, %s2231_s4 }
 0x917   :  { %1017 = vrot.lane.b32.xlu0 %v1015_v57, %s2231_s4  ;;  %v1238_v57 = vsub.f32 1.0, %v2063_v35 }
 0x91d   :  { %909 = vrot.lane.b32.xlu1 %v902_v60, %s2234_s25 }
 0x981   :  { %v905_v61 = vpop.permute.xlu0 %904 }
 0x982   :  { %907 = vst.msk [vmem:[#allocation2] sm:$0x3] %vm85_vm0, %v905_v61 }
 0x987   :  { %v1023_v62 = vpop.permute.xlu1 %1022 }
 0x988   :  { %1025 = vst.msk [vmem:[#allocation4] sm:$0x3] %vm85_vm0, %v1023_v62 }
 0x989   :  { %v1018_v63 = vpop.permute.xlu0 %1017  ;;  %v2604_v13 = vld [vmem:[#allocation2] sm:$0x3] }
 0x98a   :  { %v1020_v53 = vadd.f32 %v1018_v63, %v1014_v49  ;;  %2059 = vmatmul.msk.f32.vlgmr.msra.gmra.mxu0 %vm102_vm1, %v2604_v13 }
 0x98c   :  { %1027 = vrot.lane.b32.xlu2 %v1020_v53, %s2234_s25 }
 0x98f   :  { %v910_v14 = vpop.permute.xlu1 %909  ;;  %v2609_v15 = vld [vmem:[#allocation4] sm:$0x3] }
 0x990   :  { %912 = vst.msk [vmem:[#allocation3] sm:$0x3] %vm85_vm0, %v910_v14  ;;  %2064 = vmatmul.msk.f32.vlgmr.msra.gmra.mxu1 %vm102_vm1, %v2609_v15 }
 0x997   :  { %v2614_v18 = vld [vmem:[#allocation3] sm:$0x3] }
 0x998   :  { %1094 = vrot.lane.b32.xlu2 %v2614_v18, %s2231_s4 }
 0x9e6   :  { %v1028_v19 = vpop.permute.xlu2 %1027 }
 0x9e7   :  { %1030 = vst.msk [vmem:[#allocation5] sm:$0x3] %vm85_vm0, %v1028_v19 }
 0x9ee   :  { %v2627_v16 = vld [vmem:[#allocation5] sm:$0x3] }
 0x9f2   :  { %v1095_v58 = vpop.permute.xlu2 %1094 }
 0xa07   :  { %v1069_v21 = vpop.f32.mrf.mxu0 }
 0xa08   :  { %v1072_v22 = vadd.f32 %v2057_v20, %v1069_v21 }
 0xa0a   :  { %2166 = vtanh.f32 %v1072_v22  ;;  %v2060_v30 = vmul.f32 -1.442695, %v1072_v22 }
 0xa0d   :  { %v1187_v24 = vpop.f32.mrf.mxu1 }
 0xa0e   :  { %v1190_v26 = vadd.f32 %v2062_v23, %v1187_v24 }
 0xa10   :  { %v2167_v10 = vpop.eup %2166  ;;  %2168 = vtanh.f32 %v1190_v26  ;;  %v2065_v31 = vmul.f32 -1.442695, %v1190_v26 }
 0xa11   :  { %1099 = vrot.lane.b32.xlu0 %v2167_v10, %s2233_s22  ;;  %2170 = vpow2.f32 %v2060_v30 }
 0xa12   :  { %2172 = vpow2.f32 %v2065_v31 }
 0xa16   :  { %v2169_v27 = vpop.eup %2168 }
 0xa17   :  { %1217 = vrot.lane.b32.xlu1 %v2169_v27, %s2233_s22  ;;  %v2171_v17 = vpop.eup %2170 }
 0xa18   :  { %v1076_v32 = vadd.f32 1.0, %v2171_v17  ;;  %v2173_v34 = vpop.eup %2172 }
 0xa19   :  { %1212 = vrot.lane.b32.xlu0 %v2627_v16, %s2231_s4  ;;  %v1194_v12 = vadd.f32 1.0, %v2173_v34 }
 0xa1a   :  { %2174 = vrcp.f32 %v1076_v32  ;;  %v1088_v46 = vand.u32 2147483648, %v1076_v32  ;;  %vm1082_vm7 = vweird.f32 %v1076_v32  ;;  %v1086_v47 = vand.u32 2147483647, %v1076_v32 }
 0xa1b   :  { %2176 = vrcp.f32 %v1194_v12  ;;  %v1206_v2 = vand.u32 2147483648, %v1194_v12  ;;  %vm1200_vm11 = vweird.f32 %v1194_v12  ;;  %v1204_v7 = vand.u32 2147483647, %v1194_v12 }
 0xa1c   :  { %v1089_v6 = vor.u32 1.1754944e-38, %v1088_v46  ;;  %vm1087_vm9 = vcmp.eq.f32.partialorder %v1086_v47, 8.507059e+37 }
 0xa1d   :  { %v1207_v54 = vor.u32 1.1754944e-38, %v1206_v2  ;;  %vm1205_vm13 = vcmp.eq.f32.partialorder %v1204_v7, 8.507059e+37  ;;  %v2068_v2 = vld [vmem:[%s2968_s2 + $0xa] sm:$0x3]  ;;  %v2072_v7 = vld [vmem:[%s2967_s1 + $0x4] sm:$0x3] }
 0xa20   :  { %v2175_v3 = vpop.eup %2174 }
 0xa21   :  { %1123 = vperm.xlu0 %2099, %v1120_v29   ;;  %v1078_v38 = vmul.f32 %v2175_v3, %v1076_v32  ;;  %v2177_v40 = vpop.eup %2176  ;;  %vm1083_vm6 = vweird.f32 %v2175_v3 }
 0xa22   :  { %v1196_v42 = vmul.f32 %v2177_v40, %v1194_v12  ;;  %vm1084_vm8 = vmor %vm1082_vm7, %vm1083_vm6  ;;  %vm1201_vm10 = vweird.f32 %v2177_v40 }
 0xa23   :  { %v1079_v41 = vsub.f32 1.0, %v1078_v38  ;;  %vm1202_vm12 = vmor %vm1200_vm11, %vm1201_vm10 }
 0xa24   :  { %v1197_v44 = vsub.f32 1.0, %v1196_v42 }
 0xa25   :  { %v1080_v43 = vmul.f32 %v2175_v3, %v1079_v41 }
 0xa26   :  { %v1198_v48 = vmul.f32 %v2177_v40, %v1197_v44 }
 0xa27   :  { %v1081_v11 = vadd.f32 %v2175_v3, %v1080_v43 }
 0xa28   :  { %v1199_v8 = vadd.f32 %v2177_v40, %v1198_v48 }
 0xa29   :  { %v1085_v4 = vsel %vm1084_vm8, %v2175_v3, %v1081_v11 }
 0xa2a   :  { %v1090_v0 = vsel %vm1087_vm9, %v1089_v6, %v1085_v4  ;;  %v1203_v51 = vsel %vm1202_vm12, %v2177_v40, %v1199_v8  ;;  %v2067_v4 = vld [vmem:[%s2965_s0 + $0xa] sm:$0x3] }
 0xa2b   :  { %v1208_v45 = vsel %vm1205_vm13, %v1207_v54, %v1203_v51  ;;  %v1097_v14 = vmul.f32 %v1095_v58, %v1090_v0 }
 0xa83   :  { %v1100_v37 = vpop.permute.xlu0 %1099 }
 0xa84   :  { %v1102_v5 = vmul.f32 %v1100_v37, %v1090_v0 }
 0xa86   :  { %1104 = vrot.lane.b32.xlu1 %v1102_v5, %s2231_s4  ;;  %v1356_v5 = vsub.f32 1.0, %v2068_v2 }
 0xa89   :  { %v1218_v55 = vpop.permute.xlu1 %1217 }
 0xa8a   :  { %v1220_v1 = vmul.f32 %v1218_v55, %v1208_v45 }
 0xa8b   :  { %v1213_v59 = vpop.permute.xlu0 %1212 }
 0xa8c   :  { %1222 = vrot.lane.b32.xlu2 %v1220_v1, %s2231_s4  ;;  %v1215_v60 = vmul.f32 %v1213_v59, %v1208_v45 }
 0xa8e   :  { %1241 = vperm.xlu1 %2100, %v1238_v57  }
 0xa93   :  { %v1124_v63 = vpop.permute.xlu0 %1123 }
 0xa94   :  { %v1126_v53 = vmul.f32 %v1124_v63, %v2604_v13  ;;  %v1133_v24 = vmul.f32 %v1124_v63, %v2614_v18 }
 0xa96   :  { %1116 = vperm.xlu1 %2100, %v2058_v28  }
 0xae6   :  { %v1223_v61 = vpop.permute.xlu2 %1222 }
 0xae7   :  { %v1225_v62 = vadd.f32 %v1223_v61, %v1215_v60 }
 0xae9   :  { %2178 = vtanh.f32 %v1225_v62 }
 0xaef   :  { %v2179_v49 = vpop.eup %2178 }
 0xaf0   :  { %1228 = vrot.lane.b32.xlu0 %v2179_v49, %s2233_s22 }
 0xaf8   :  { %v1105_v19 = vpop.permute.xlu1 %1104  ;;  %1128 = vrot.lane.b32.xlu0 %v1126_v53, %s2234_s25 }
 0xaf9   :  { %v1107_v20 = vadd.f32 %v1105_v19, %v1097_v14 }
 0xafb   :  { %2180 = vtanh.f32 %v1107_v20 }
 0xb00   :  { %v1242_v21 = vpop.permute.xlu1 %1241 }
 0xb01   :  { %v2181_v22 = vpop.eup %2180  ;;  %v1244_v23 = vmul.f32 %v1242_v21, %v2609_v15  ;;  %v1251_v17 = vmul.f32 %v1242_v21, %v2627_v16  ;;  %v2073_v21 = vld [vmem:[%s2966_s3 + $0x4] sm:$0x3] }
 0xb02   :  { %1110 = vrot.lane.b32.xlu2 %v2181_v22, %s2233_s22  ;;  %v1474_v22 = vsub.f32 1.0, %v2073_v21 }
 0xb03   :  { %1246 = vrot.lane.b32.xlu1 %v1244_v23, %s2234_s25 }
 0xb08   :  { %v1117_v27 = vpop.permute.xlu1 %1116 }
 0xb09   :  { %v1132_v12 = vmul.f32 %v1117_v27, %v1107_v20 }
 0xb0a   :  { %1234 = vperm.xlu2 %2101, %v2063_v35  }
 0xb0b   :  { %1135 = vrot.lane.b32.xlu1 %v1133_v24, %s2231_s4 }
 0xb5c   :  { %v1111_v13 = vpop.permute.xlu2 %1110 }
 0xb5d   :  { %v1113_v10 = vmul.f32 %v1111_v13, %v1090_v0 }
 0xb5f   :  { %v2647_v28 = vmul.f32 %v1117_v27, %v1113_v10 }
 0xb62   :  { %v1229_v26 = vpop.permute.xlu0 %1228 }
 0xb63   :  { %v1231_v15 = vmul.f32 %v1229_v26, %v1208_v45 }
 0xb64   :  { %v1235_v31 = vpop.permute.xlu2 %1234 }
 0xb65   :  { %v2652_v32 = vmul.f32 %v1235_v31, %v1231_v15  ;;  %v1250_v41 = vmul.f32 %v1235_v31, %v1225_v62 }
 0xb6a   :  { %v1129_v29 = vpop.permute.xlu0 %1128 }
 0xb6b   :  { %v1131_v30 = vadd.f32 %v1129_v29, %v2647_v28 }
 0xb6d   :  { %1140 = vrot.lane.b32.xlu2 %v1131_v30, %s2231_s4 }
 0xb75   :  { %v1247_v18 = vpop.permute.xlu1 %1246  ;;  %1253 = vrot.lane.b32.xlu2 %v1251_v17, %s2231_s4 }
 0xb76   :  { %v1249_v34 = vadd.f32 %v1247_v18, %v2652_v32 }
 0xb78   :  { %1258 = vrot.lane.b32.xlu0 %v1249_v34, %s2231_s4 }
 0xb7d   :  { %v1136_v3 = vpop.permute.xlu1 %1135 }
 0xb7e   :  { %v1138_v38 = vadd.f32 %v1136_v3, %v1132_v12 }
 0xb80   :  { %1145 = vrot.lane.b32.xlu0 %v1138_v38, %s2234_s25 }
 0xbc7   :  { %v1141_v40 = vpop.permute.xlu2 %1140 }
 0xbc8   :  { %1143 = vst.msk [vmem:[#allocation2] sm:$0x3] %vm85_vm0, %v1141_v40 }
 0xbcf   :  { %v1254_v42 = vpop.permute.xlu2 %1253  ;;  %v2659_v16 = vld [vmem:[#allocation2] sm:$0x3] }
 0xbd0   :  { %v1256_v43 = vadd.f32 %v1254_v42, %v1250_v41  ;;  %2069 = vmatmul.msk.f32.vlgmr.msra.gmra.mxu2 %vm102_vm1, %v2659_v16 }
 0xbd2   :  { %1263 = vrot.lane.b32.xlu1 %v1256_v43, %s2234_s25 }
 0xbea   :  { %v1259_v44 = vpop.permute.xlu0 %1258 }
 0xbeb   :  { %1261 = vst.msk [vmem:[#allocation4] sm:$0x3] %vm85_vm0, %v1259_v44 }
 0xbf2   :  { %v1146_v11 = vpop.permute.xlu0 %1145  ;;  %v2665_v46 = vld [vmem:[#allocation4] sm:$0x3] }
 0xbf3   :  { %1148 = vst.msk [vmem:[#allocation3] sm:$0x3] %vm85_vm0, %v1146_v11  ;;  %2074 = vmatmul.msk.f32.vlgmr.msra.gmra.mxu3 %vm102_vm1, %v2665_v46 }
 0xbfa   :  { %v2670_v47 = vld [vmem:[#allocation3] sm:$0x3] }
 0xbfb   :  { %1330 = vrot.lane.b32.xlu1 %v2670_v47, %s2231_s4 }
 0xc44   :  { %v1264_v48 = vpop.permute.xlu1 %1263 }
 0xc45   :  { %1266 = vst.msk [vmem:[#allocation5] sm:$0x3] %vm85_vm0, %v1264_v48 }
 0xc4c   :  { %v2679_v37 = vld [vmem:[#allocation5] sm:$0x3] }
 0xc53   :  { %v1305_v6 = vpop.f32.mrf.mxu2 }
 0xc54   :  { %v1308_v8 = vadd.f32 %v2067_v4, %v1305_v6 }
 0xc56   :  { %2182 = vtanh.f32 %v1308_v8  ;;  %v2070_v45 = vmul.f32 -1.442695, %v1308_v8 }
 0xc5c   :  { %v2183_v0 = vpop.eup %2182 }
 0xc5d   :  { %1335 = vrot.lane.b32.xlu2 %v2183_v0, %s2233_s22 }
 0xc65   :  { %1448 = vrot.lane.b32.xlu2 %v2679_v37, %s2231_s4 }
 0xc6d   :  { %1359 = vperm.xlu2 %2101, %v1356_v5   ;;  %v1331_v38 = vpop.permute.xlu1 %1330 }
 0xc76   :  { %v1423_v51 = vpop.f32.mrf.mxu3 }
 0xc77   :  { %v1426_v54 = vadd.f32 %v2072_v7, %v1423_v51 }
 0xc79   :  { %2184 = vtanh.f32 %v1426_v54  ;;  %v2075_v23 = vmul.f32 -1.442695, %v1426_v54 }
 0xc7a   :  { %2186 = vpow2.f32 %v2070_v45 }
 0xc7f   :  { %v2185_v35 = vpop.eup %2184 }
 0xc80   :  { %1453 = vrot.lane.b32.xlu0 %v2185_v35, %s2233_s22  ;;  %v2187_v55 = vpop.eup %2186 }
 0xc81   :  { %v1312_v1 = vadd.f32 1.0, %v2187_v55 }
 0xc83   :  { %2188 = vrcp.f32 %v1312_v1  ;;  %v1324_v62 = vand.u32 2147483648, %v1312_v1  ;;  %vm1318_vm15 = vweird.f32 %v1312_v1  ;;  %v1322_v49 = vand.u32 2147483647, %v1312_v1 }
 0xc84   :  { %2190 = vpow2.f32 %v2075_v23 }
 0xc85   :  { %v1325_v53 = vor.u32 1.1754944e-38, %v1324_v62  ;;  %vm1323_vm3 = vcmp.eq.f32.partialorder %v1322_v49, 8.507059e+37 }
 0xc89   :  { %v2189_v57 = vpop.eup %2188 }
 0xc8a   :  { %v1314_v58 = vmul.f32 %v2189_v57, %v1312_v1  ;;  %vm1319_vm14 = vweird.f32 %v2189_v57  ;;  %v2191_v24 = vpop.eup %2190 }
 0xc8b   :  { %vm1320_vm2 = vmor %vm1318_vm15, %vm1319_vm14  ;;  %v1430_v13 = vadd.f32 1.0, %v2191_v24  ;;  %v2082_v24 = vld [vmem:[%s2967_s1 + $0x2] sm:$0x3] }
 0xc8c   :  { %v1315_v59 = vsub.f32 1.0, %v1314_v58 }
 0xc8d   :  { %2192 = vrcp.f32 %v1430_v13  ;;  %v1442_v15 = vand.u32 2147483648, %v1430_v13  ;;  %vm1436_vm5 = vweird.f32 %v1430_v13  ;;  %v1440_v31 = vand.u32 2147483647, %v1430_v13 }
 0xc8e   :  { %v1316_v60 = vmul.f32 %v2189_v57, %v1315_v59 }
 0xc8f   :  { %v1443_v18 = vor.u32 1.1754944e-38, %v1442_v15  ;;  %vm1441_vm7 = vcmp.eq.f32.partialorder %v1440_v31, 8.507059e+37 }
 0xc90   :  { %v1317_v61 = vadd.f32 %v2189_v57, %v1316_v60 }
 0xc92   :  { %v1321_v63 = vsel %vm1320_vm2, %v2189_v57, %v1317_v61 }
 0xc93   :  { %v1326_v14 = vsel %vm1323_vm3, %v1325_v53, %v1321_v63  ;;  %v2193_v26 = vpop.eup %2192 }
 0xc94   :  { %v1432_v10 = vmul.f32 %v2193_v26, %v1430_v13  ;;  %vm1437_vm4 = vweird.f32 %v2193_v26  ;;  %v1333_v40 = vmul.f32 %v1331_v38, %v1326_v14 }
 0xc95   :  { %vm1438_vm6 = vmor %vm1436_vm5, %vm1437_vm4 }
 0xc96   :  { %v1433_v27 = vsub.f32 1.0, %v1432_v10 }
 0xc98   :  { %v1434_v29 = vmul.f32 %v2193_v26, %v1433_v27 }
 0xc9a   :  { %v1435_v30 = vadd.f32 %v2193_v26, %v1434_v29  ;;  %v2077_v29 = vld [vmem:[%s2965_s0 + $0xc] sm:$0x3] }
 0xc9c   :  { %v1439_v17 = vsel %vm1438_vm6, %v2193_v26, %v1435_v30 }
 0xc9d   :  { %v1444_v34 = vsel %vm1441_vm7, %v1443_v18, %v1439_v17  ;;  %v2078_v18 = vld [vmem:[%s2968_s2 + $0xc] sm:$0x3] }
 0xcb7   :  { %v1336_v19 = vpop.permute.xlu2 %1335 }
 0xcb8   :  { %v1338_v20 = vmul.f32 %v1336_v19, %v1326_v14 }
 0xcba   :  { %1340 = vrot.lane.b32.xlu0 %v1338_v20, %s2231_s4 }
 0xcbf   :  { %v1449_v43 = vpop.permute.xlu2 %1448 }
 0xcc0   :  { %v1451_v8 = vmul.f32 %v1449_v43, %v1444_v34 }
 0xcc2   :  { %1477 = vperm.xlu0 %2099, %v1474_v22  }
 0xcc7   :  { %v1360_v4 = vpop.permute.xlu2 %1359 }
 0xcc8   :  { %v1369_v6 = vmul.f32 %v1360_v4, %v2670_v47  ;;  %v1362_v7 = vmul.f32 %v1360_v4, %v2659_v16 }
 0xcca   :  { %1352 = vperm.xlu0 %2099, %v2068_v2  }
 0xcf2   :  { %v1454_v12 = vpop.permute.xlu0 %1453 }
 0xcf3   :  { %v1456_v3 = vmul.f32 %v1454_v12, %v1444_v34 }
 0xcf5   :  { %1458 = vrot.lane.b32.xlu1 %v1456_v3, %s2231_s4 }
 0xd2c   :  { %v1341_v41 = vpop.permute.xlu0 %1340 }
 0xd2d   :  { %v1343_v42 = vadd.f32 %v1341_v41, %v1333_v40 }
 0xd2f   :  { %2194 = vtanh.f32 %v1343_v42 }
 0xd34   :  { %v1478_v44 = vpop.permute.xlu0 %1477 }
 0xd35   :  { %v2195_v11 = vpop.eup %2194  ;;  %v1480_v48 = vmul.f32 %v1478_v44, %v2665_v46  ;;  %v1487_v49 = vmul.f32 %v1478_v44, %v2679_v37 }
 0xd36   :  { %1346 = vrot.lane.b32.xlu1 %v2195_v11, %s2233_s22 }
 0xd37   :  { %1482 = vrot.lane.b32.xlu0 %v1480_v48, %s2234_s25 }
 0xd3c   :  { %v1353_v46 = vpop.permute.xlu0 %1352 }
 0xd3d   :  { %v1368_v61 = vmul.f32 %v1353_v46, %v1343_v42 }
 0xd3e   :  { %1470 = vperm.xlu1 %2100, %v2073_v21  }
 0xd3f   :  { %1371 = vrot.lane.b32.xlu0 %v1369_v6, %s2231_s4 }
 0xd67   :  { %v1459_v0 = vpop.permute.xlu1 %1458 }
 0xd68   :  { %v1461_v2 = vadd.f32 %v1459_v0, %v1451_v8 }
 0xd6a   :  { %2196 = vtanh.f32 %v1461_v2 }
 0xd70   :  { %v2197_v5 = vpop.eup %2196 }
 0xd71   :  { %1464 = vrot.lane.b32.xlu2 %v2197_v5, %s2233_s22 }
 0xd79   :  { %1364 = vrot.lane.b32.xlu2 %v1362_v7, %s2234_s25 }
 0xda8   :  { %v1347_v51 = vpop.permute.xlu1 %1346 }
 0xda9   :  { %v1483_v54 = vpop.permute.xlu0 %1482  ;;  %v1349_v55 = vmul.f32 %v1347_v51, %v1326_v14 }
 0xdab   :  { %v2707_v58 = vmul.f32 %v1353_v46, %v1349_v55 }
 0xdb0   :  { %v1471_v47 = vpop.permute.xlu1 %1470 }
 0xdb1   :  { %v1372_v60 = vpop.permute.xlu0 %1371  ;;  %v1486_v20 = vmul.f32 %v1471_v47, %v1461_v2 }
 0xdb2   :  { %v1374_v62 = vadd.f32 %v1372_v60, %v1368_v61 }
 0xdcb   :  { %v1465_v35 = vpop.permute.xlu2 %1464 }
 0xdcc   :  { %v1467_v45 = vmul.f32 %v1465_v35, %v1444_v34  ;;  %v1592_v34 = vsub.f32 1.0, %v2078_v18 }
 0xdce   :  { %v2703_v1 = vmul.f32 %v1471_v47, %v1467_v45 }
 0xdd0   :  { %v1485_v57 = vadd.f32 %v1483_v54, %v2703_v1 }
 0xdd2   :  { %1494 = vrot.lane.b32.xlu2 %v1485_v57, %s2231_s4 }
 0xdd3   :  { %v1365_v59 = vpop.permute.xlu2 %1364 }
 0xdd4   :  { %v1367_v16 = vadd.f32 %v1365_v59, %v2707_v58 }
 0xdd6   :  { %1376 = vrot.lane.b32.xlu1 %v1367_v16, %s2231_s4 }
 0xdda   :  { %1381 = vrot.lane.b32.xlu2 %v1374_v62, %s2234_s25 }
 0xdde   :  { %1489 = vrot.lane.b32.xlu1 %v1487_v49, %s2231_s4  ;;  %v2083_v49 = vld [vmem:[%s2966_s3 + $0x2] sm:$0x3] }
 0xe2c   :  { %v1495_v63 = vpop.permute.xlu2 %1494 }
 0xe2d   :  { %1497 = vst.msk [vmem:[#allocation4] sm:$0x3] %vm85_vm0, %v1495_v63  ;;  %v1710_v63 = vsub.f32 1.0, %v2083_v49 }
 0xe34   :  { %v1382_v53 = vpop.permute.xlu2 %1381  ;;  %v2715_v14 = vld [vmem:[#allocation4] sm:$0x3] }
 0xe35   :  { %1384 = vst.msk [vmem:[#allocation3] sm:$0x3] %vm85_vm0, %v1382_v53  ;;  %2084 = vmatmul.msk.f32.vlgmr.msrb.gmra.mxu1 %vm102_vm1, %v2715_v14 }
 0xe3c   :  { %v2726_v23 = vld [vmem:[#allocation3] sm:$0x3] }
 0xe48   :  { %v1377_v19 = vpop.permute.xlu1 %1376 }
 0xe49   :  { %1379 = vst.msk [vmem:[#allocation2] sm:$0x3] %vm85_vm0, %v1377_v19 }
 0xe50   :  { %v1490_v21 = vpop.permute.xlu1 %1489  ;;  %v2721_v22 = vld [vmem:[#allocation2] sm:$0x3] }
 0xe51   :  { %v1492_v37 = vadd.f32 %v1490_v21, %v1486_v20  ;;  %2079 = vmatmul.msk.f32.vlgmr.msrb.gmra.mxu0 %vm102_vm1, %v2721_v22 }
 0xe53   :  { %1499 = vrot.lane.b32.xlu0 %v1492_v37, %s2234_s25 }
 0xe5b   :  { %1566 = vrot.lane.b32.xlu0 %v2726_v23, %s2231_s4 }
 0xeb2   :  { %v1659_v13 = vpop.f32.mrf.mxu1 }
 0xeb3   :  { %v1662_v26 = vadd.f32 %v2082_v24, %v1659_v13 }
 0xeb5   :  { %2198 = vtanh.f32 %v1662_v26  ;;  %v2085_v12 = vmul.f32 -1.442695, %v1662_v26 }
 0xebb   :  { %v2199_v10 = vpop.eup %2198 }
 0xebc   :  { %1689 = vrot.lane.b32.xlu2 %v2199_v10, %s2233_s22 }
 0xec5   :  { %v1500_v27 = vpop.permute.xlu0 %1499 }
 0xec6   :  { %1502 = vst.msk [vmem:[#allocation5] sm:$0x3] %vm85_vm0, %v1500_v27 }
 0xecd   :  { %v2739_v17 = vld [vmem:[#allocation5] sm:$0x3]  ;;  %v1567_v53 = vpop.permute.xlu0 %1566 }
 0xece   :  { %v1541_v30 = vpop.f32.mrf.mxu0 }
 0xecf   :  { %v1544_v15 = vadd.f32 %v2077_v29, %v1541_v30 }
 0xed1   :  { %2200 = vtanh.f32 %v1544_v15  ;;  %v2080_v5 = vmul.f32 -1.442695, %v1544_v15 }
 0xed2   :  { %2202 = vpow2.f32 %v2085_v12 }
 0xed7   :  { %v2201_v31 = vpop.eup %2200 }
 0xed8   :  { %1571 = vrot.lane.b32.xlu1 %v2201_v31, %s2233_s22  ;;  %v2203_v3 = vpop.eup %2202 }
 0xed9   :  { %v1666_v38 = vadd.f32 1.0, %v2203_v3 }
 0xedb   :  { %2204 = vrcp.f32 %v1666_v38  ;;  %v1678_v11 = vand.u32 2147483648, %v1666_v38  ;;  %vm1672_vm9 = vweird.f32 %v1666_v38  ;;  %v1676_v48 = vand.u32 2147483647, %v1666_v38 }
 0xedc   :  { %2206 = vpow2.f32 %v2080_v5 }
 0xedd   :  { %v1679_v6 = vor.u32 1.1754944e-38, %v1678_v11  ;;  %vm1677_vm11 = vcmp.eq.f32.partialorder %v1676_v48, 8.507059e+37 }
 0xee0   :  { %1684 = vrot.lane.b32.xlu1 %v2739_v17, %s2231_s4 }
 0xee1   :  { %v2205_v40 = vpop.eup %2204 }
 0xee2   :  { %v1668_v41 = vmul.f32 %v2205_v40, %v1666_v38  ;;  %vm1673_vm8 = vweird.f32 %v2205_v40  ;;  %v2207_v7 = vpop.eup %2206 }
 0xee3   :  { %vm1674_vm10 = vmor %vm1672_vm9, %vm1673_vm8  ;;  %v1548_v46 = vadd.f32 1.0, %v2207_v7  ;;  %vm207_vm9 = vcmask 1040384  }
 0xee4   :  { %v1669_v42 = vsub.f32 1.0, %v1668_v41 }
 0xee5   :  { %2208 = vrcp.f32 %v1548_v46  ;;  %v1560_v55 = vand.u32 2147483648, %v1548_v46  ;;  %vm1554_vm13 = vweird.f32 %v1548_v46  ;;  %v1558_v57 = vand.u32 2147483647, %v1548_v46 }
 0xee6   :  { %v1670_v43 = vmul.f32 %v2205_v40, %v1669_v42 }
 0xee7   :  { %v1561_v16 = vor.u32 1.1754944e-38, %v1560_v55  ;;  %vm1559_vm15 = vcmp.eq.f32.partialorder %v1558_v57, 8.507059e+37  ;;  %v1869_v57 = vld [vmem:[%s2967_s1] sm:$0x3] }
 0xee8   :  { %1595 = vperm.xlu1 %2100, %v1592_v34   ;;  %v1671_v44 = vadd.f32 %v2205_v40, %v1670_v43 }
 0xeea   :  { %v1675_v4 = vsel %vm1674_vm10, %v2205_v40, %v1671_v44  ;;  %vm215_vm10 = vcmask 253952  }
 0xeeb   :  { %v1680_v8 = vsel %vm1677_vm11, %v1679_v6, %v1675_v4  ;;  %v2209_v51 = vpop.eup %2208 }
 0xeec   :  { %v1550_v54 = vmul.f32 %v2209_v51, %v1548_v46  ;;  %vm1555_vm12 = vweird.f32 %v2209_v51 }
 0xeed   :  { %vm1556_vm14 = vmor %vm1554_vm13, %vm1555_vm12 }
 0xeee   :  { %v1551_v35 = vsub.f32 1.0, %v1550_v54 }
 0xef0   :  { %v1552_v45 = vmul.f32 %v2209_v51, %v1551_v35 }
 0xef2   :  { %v1553_v47 = vadd.f32 %v2209_v51, %v1552_v45  ;;  %v2087_v45 = vld [vmem:[%s2965_s0 + $0xe] sm:$0x3] }
 0xef4   :  { %v1557_v59 = vsel %vm1556_vm14, %v2209_v51, %v1553_v47 }
 0xef5   :  { %v1562_v60 = vsel %vm1559_vm15, %v1561_v16, %v1557_v59 }
 0xef6   :  { %v1569_v10 = vmul.f32 %v1567_v53, %v1562_v60  ;;  %v1870_v53 = vld [vmem:[%s2966_s3] sm:$0x3] }
 0xf16   :  { %v1690_v0 = vpop.permute.xlu2 %1689 }
 0xf17   :  { %v1692_v2 = vmul.f32 %v1690_v0, %v1680_v8 }
 0xf19   :  { %1694 = vrot.lane.b32.xlu0 %v1692_v2, %s2231_s4 }
 0xf4a   :  { %v1572_v61 = vpop.permute.xlu1 %1571 }
 0xf4b   :  { %v1574_v62 = vmul.f32 %v1572_v61, %v1562_v60 }
 0xf4d   :  { %1576 = vrot.lane.b32.xlu2 %v1574_v62, %s2231_s4 }
 0xf52   :  { %v1685_v19 = vpop.permute.xlu1 %1684 }
 0xf53   :  { %v1687_v20 = vmul.f32 %v1685_v19, %v1680_v8 }
 0xf55   :  { %1713 = vperm.xlu2 %2101, %v1710_v63  }
 0xf5a   :  { %v1596_v13 = vpop.permute.xlu1 %1595 }
 0xf5b   :  { %v1598_v26 = vmul.f32 %v1596_v13, %v2721_v22 }
 0xf5d   :  { %1588 = vperm.xlu2 %2101, %v2078_v18   ;;  %v1605_v18 = vmul.f32 %v1596_v13, %v2726_v23 }
 0xf8b   :  { %v1695_v21 = vpop.permute.xlu0 %1694 }
 0xf8c   :  { %v1697_v37 = vadd.f32 %v1695_v21, %v1687_v20 }
 0xf8e   :  { %2210 = vtanh.f32 %v1697_v37 }
 0xf94   :  { %v2211_v24 = vpop.eup %2210 }
 0xf95   :  { %1700 = vrot.lane.b32.xlu1 %v2211_v24, %s2233_s22 }
 0xf9d   :  { %1600 = vrot.lane.b32.xlu1 %v1598_v26, %s2234_s25 }
 0xfa7   :  { %v1577_v27 = vpop.permute.xlu2 %1576 }
 0xfa8   :  { %v1579_v29 = vadd.f32 %v1577_v27, %v1569_v10 }
 0xfaa   :  { %2212 = vtanh.f32 %v1579_v29 }
 0xfaf   :  { %v1714_v30 = vpop.permute.xlu2 %1713 }
 0xfb0   :  { %v2213_v15 = vpop.eup %2212  ;;  %v1716_v31 = vmul.f32 %v1714_v30, %v2715_v14  ;;  %v1723_v11 = vmul.f32 %v1714_v30, %v2739_v17 }
 0xfb1   :  { %1582 = vrot.lane.b32.xlu0 %v2213_v15, %s2233_s22 }
 0xfb2   :  { %1718 = vrot.lane.b32.xlu2 %v1716_v31, %s2234_s25 }
 0xfb7   :  { %v1589_v34 = vpop.permute.xlu2 %1588 }
 0xfb8   :  { %v1604_v4 = vmul.f32 %v1589_v34, %v1579_v29 }
 0xfb9   :  { %1706 = vperm.xlu0 %2099, %v2083_v49   ;;  %v2088_v49 = vld [vmem:[%s2968_s2 + $0xe] sm:$0x3] }
 0xfba   :  { %1607 = vrot.lane.b32.xlu2 %v1605_v18, %s2231_s4  ;;  %v1828_v63 = vsub.f32 1.0, %v2088_v49 }
0x1007   :  { %v1701_v22 = vpop.permute.xlu1 %1700 }
0x1008   :  { %v1703_v14 = vmul.f32 %v1701_v22, %v1680_v8 }
0x100c   :  { %v1719_v42 = vpop.permute.xlu2 %1718 }
0x100f   :  { %v1601_v40 = vpop.permute.xlu1 %1600 }
0x1014   :  { %v1608_v48 = vpop.permute.xlu2 %1607 }
0x1015   :  { %v1610_v6 = vadd.f32 %v1608_v48, %v1604_v4 }
0x1023   :  { %v1583_v12 = vpop.permute.xlu0 %1582 }
0x1024   :  { %v1585_v3 = vmul.f32 %v1583_v12, %v1562_v60 }
0x1026   :  { %v2759_v38 = vmul.f32 %v1589_v34, %v1585_v3 }
0x1028   :  { %v1603_v41 = vadd.f32 %v1601_v40, %v2759_v38 }
0x102a   :  { %1612 = vrot.lane.b32.xlu0 %v1603_v41, %s2231_s4 }
0x102b   :  { %v1707_v43 = vpop.permute.xlu0 %1706 }
0x102c   :  { %v2763_v44 = vmul.f32 %v1707_v43, %v1703_v14  ;;  %v1722_v2 = vmul.f32 %v1707_v43, %v1697_v37 }
0x102e   :  { %v1721_v23 = vadd.f32 %v1719_v42, %v2763_v44 }
0x1030   :  { %1730 = vrot.lane.b32.xlu1 %v1721_v23, %s2231_s4 }
0x1032   :  { %1725 = vrot.lane.b32.xlu0 %v1723_v11, %s2231_s4 }
0x1038   :  { %1617 = vrot.lane.b32.xlu1 %v1610_v6, %s2234_s25 }
0x109c   :  { %v1613_v0 = vpop.permute.xlu0 %1612 }
0x109d   :  { %1615 = vst.msk [vmem:[#allocation2] sm:$0x3] %vm85_vm0, %v1613_v0 }
0x10a2   :  { %v1731_v8 = vpop.permute.xlu1 %1730 }
0x10a3   :  { %1733 = vst.msk [vmem:[#allocation4] sm:$0x3] %vm85_vm0, %v1731_v8  ;;  %v1944_v8 = vsub.f32 1.0, %v1870_v53 }
0x10a4   :  { %v1726_v5 = vpop.permute.xlu0 %1725  ;;  %v2772_v7 = vld [vmem:[#allocation2] sm:$0x3] }
0x10a5   :  { %v1728_v17 = vadd.f32 %v1726_v5, %v1722_v2  ;;  %2089 = vmatmul.msk.f32.vlgmr.msrb.gmra.mxu2 %vm102_vm1, %v2772_v7  ;;  %v204_v5 = vpack.c.bf16 %v2403_v9, %v2403_v9  ;;  %v323_v9 = vpack.c.bf16 %v2399_v25, %v2399_v25  ;;  %v1385_v25 = vpack.c.bf16 %v2707_v58, %v2707_v58 }
0x10a7   :  { %1735 = vrot.lane.b32.xlu2 %v1728_v17, %s2234_s25 }
0x10aa   :  { %v1618_v46 = vpop.permute.xlu1 %1617  ;;  %v2777_v51 = vld [vmem:[#allocation4] sm:$0x3] }
0x10ab   :  { %1620 = vst.msk [vmem:[#allocation3] sm:$0x3] %vm85_vm0, %v1618_v46  ;;  %2092 = vmatmul.msk.f32.vlgmr.msrb.gmra.mxu3 %vm102_vm1, %v2777_v51  ;;  %v206_v46 = vrot.slane %v204_v5, 3 }
0x10b2   :  { %v2782_v54 = vld [vmem:[#allocation3] sm:$0x3] }
0x10b3   :  { %1802 = vrot.lane.b32.xlu2 %v2782_v54, %s2231_s4 }
0x1101   :  { %v1736_v35 = vpop.permute.xlu2 %1735 }
0x1102   :  { %1738 = vst.msk [vmem:[#allocation5] sm:$0x3] %vm85_vm0, %v1736_v35 }
0x1109   :  { %v2795_v62 = vld [vmem:[#allocation5] sm:$0x3] }
0x1128   :  { %v1777_v47 = vpop.f32.mrf.mxu2 }
0x1129   :  { %v1780_v55 = vadd.f32 %v2087_v45, %v1777_v47  ;;  %v210_v45 = vsel %vm207_vm9, %v204_v5, %v206_v46 }
0x112b   :  { %2214 = vtanh.f32 %v1780_v55  ;;  %v2090_v19 = vmul.f32 -1.442695, %v1780_v55 }
0x112e   :  { %v1893_v59 = vpop.f32.mrf.mxu3 }
0x112f   :  { %v1896_v16 = vadd.f32 %v1893_v59, %v1869_v57  ;;  %v325_v57 = vrot.slane %v323_v9, 3  ;;  %v677_v59 = vpack.c.bf16 %v2531_v36, %v2531_v36  ;;  %v1387_v36 = vrot.slane %v1385_v25, 3 }
0x1131   :  { %v2215_v60 = vpop.eup %2214  ;;  %2216 = vtanh.f32 %v1896_v16  ;;  %v2093_v20 = vmul.f32 -1.442695, %v1896_v16  ;;  %v328_v16 = vsel %vm207_vm9, %v323_v9, %v325_v57 }
0x1132   :  { %1807 = vrot.lane.b32.xlu0 %v2215_v60, %s2233_s22  ;;  %2218 = vpow2.f32 %v2090_v19  ;;  %v1031_v60 = vpack.c.bf16 %v2595_v39, %v2595_v39 }
0x1133   :  { %2220 = vpow2.f32 %v2093_v20  ;;  %v1803_v20 = vpop.permute.xlu2 %1802 }
0x1137   :  { %v2217_v61 = vpop.eup %2216 }
0x1138   :  { %1923 = vrot.lane.b32.xlu1 %v2217_v61, %s2233_s22  ;;  %v2219_v21 = vpop.eup %2218 }
0x1139   :  { %v1784_v37 = vadd.f32 1.0, %v2219_v21  ;;  %v2221_v24 = vpop.eup %2220 }
0x113a   :  { %1918 = vrot.lane.b32.xlu0 %v2795_v62, %s2231_s4  ;;  %v1900_v13 = vadd.f32 1.0, %v2221_v24 }
0x113b   :  { %2222 = vrcp.f32 %v1784_v37  ;;  %v1796_v22 = vand.u32 2147483648, %v1784_v37  ;;  %vm1790_vm2 = vweird.f32 %v1784_v37  ;;  %v1794_v34 = vand.u32 2147483647, %v1784_v37 }
0x113c   :  { %2224 = vrcp.f32 %v1900_v13  ;;  %v1912_v43 = vand.u32 2147483648, %v1900_v13  ;;  %vm1906_vm6 = vweird.f32 %v1900_v13  ;;  %v1910_v11 = vand.u32 2147483647, %v1900_v13 }
0x113d   :  { %v1797_v40 = vor.u32 1.1754944e-38, %v1796_v22  ;;  %vm1795_vm4 = vcmp.eq.f32.partialorder %v1794_v34, 8.507059e+37  ;;  %v441_v34 = vpack.c.bf16 %v2463_v52, %v2463_v52  ;;  %v913_v52 = vpack.c.bf16 %v2591_v50, %v2591_v50 }
0x113e   :  { %v1913_v4 = vor.u32 1.1754944e-38, %v1912_v43  ;;  %vm1911_vm8 = vcmp.eq.f32.partialorder %v1910_v11, 8.507059e+37  ;;  %v1149_v50 = vpack.c.bf16 %v2647_v28, %v2647_v28  ;;  %v1621_v28 = vpack.c.bf16 %v2759_v38, %v2759_v38 }
0x113f   :  { %v915_v43 = vrot.slane %v913_v52, 3 }
0x1140   :  { %v1623_v46 = vrot.slane %v1621_v28, 3 }
0x1141   :  { %v2223_v26 = vpop.eup %2222 }
0x1142   :  { %1831 = vperm.xlu0 %2099, %v1828_v63   ;;  %v1786_v10 = vmul.f32 %v2223_v26, %v1784_v37  ;;  %v2225_v27 = vpop.eup %2224  ;;  %vm1791_vm1 = vweird.f32 %v2223_v26  ;;  %v1739_v63 = vpack.c.bf16 %v2763_v44, %v2763_v44  ;;  %v1626_v38 = vsel %vm207_vm9, %v1621_v28, %v1623_v46 }
0x1143   :  { %v1902_v30 = vmul.f32 %v2225_v27, %v1900_v13  ;;  %vm1792_vm3 = vmor %vm1790_vm2, %vm1791_vm1  ;;  %vm1907_vm5 = vweird.f32 %v2225_v27 }
0x1144   :  { %v1787_v29 = vsub.f32 1.0, %v1786_v10  ;;  %vm1908_vm7 = vmor %vm1906_vm6, %vm1907_vm5  ;;  %v1741_v39 = vrot.slane %v1739_v63, 3 }
0x1145   :  { %v1903_v31 = vsub.f32 1.0, %v1902_v30 }
0x1146   :  { %v1788_v15 = vmul.f32 %v2223_v26, %v1787_v29  ;;  %v1744_v19 = vsel %vm207_vm9, %v1739_v63, %v1741_v39 }
0x1147   :  { %v1904_v12 = vmul.f32 %v2225_v27, %v1903_v31 }
0x1148   :  { %v1789_v18 = vadd.f32 %v2223_v26, %v1788_v15 }
0x1149   :  { %v1905_v41 = vadd.f32 %v2225_v27, %v1904_v12 }
0x114a   :  { %1940 = vperm.xlu0 %2099, %v1870_v53   ;;  %v1793_v3 = vsel %vm1792_vm3, %v2223_v26, %v1789_v18  ;;  %v1390_v53 = vsel %vm207_vm9, %v1385_v25, %v1387_v36 }
0x114b   :  { %v2805_v42 = vsel %vm1795_vm4, %v1797_v40, %v1793_v3  ;;  %v1909_v48 = vsel %vm1908_vm7, %v2225_v27, %v1905_v41  ;;  %v795_v40 = vpack.c.bf16 %v2527_v33, %v2527_v33  ;;  %v1267_v33 = vpack.c.bf16 %v2652_v32, %v2652_v32 }
0x114c   :  { %v2809_v6 = vsel %vm1911_vm8, %v1913_v4, %v1909_v48  ;;  %v1805_v13 = vmul.f32 %v1803_v20, %v2805_v42  ;;  %v918_v48 = vsel %vm207_vm9, %v913_v52, %v915_v43  ;;  %v1503_v32 = vpack.c.bf16 %v2703_v1, %v2703_v1 }
0x114d   :  { %v1269_v4 = vrot.slane %v1267_v33, 3 }
0x114f   :  { %v1272_v5 = vsel %vm207_vm9, %v1267_v33, %v1269_v4 }
0x11a4   :  { %v1808_v14 = vpop.permute.xlu0 %1807 }
0x11a5   :  { %v1810_v23 = vmul.f32 %v1808_v14, %v2805_v42  ;;  %v797_v14 = vrot.slane %v795_v40, 3 }
0x11a7   :  { %1812 = vrot.lane.b32.xlu1 %v1810_v23, %s2231_s4  ;;  %v800_v11 = vsel %vm207_vm9, %v795_v40, %v797_v14 }
0x11aa   :  { %v1924_v0 = vpop.permute.xlu1 %1923 }
0x11ab   :  { %v1926_v2 = vmul.f32 %v1924_v0, %v2809_v6  ;;  %v1151_v0 = vrot.slane %v1149_v50, 3 }
0x11ac   :  { %v1919_v17 = vpop.permute.xlu0 %1918 }
0x11ad   :  { %1928 = vrot.lane.b32.xlu2 %v1926_v2, %s2231_s4  ;;  %v1921_v24 = vmul.f32 %v1919_v17, %v2809_v6  ;;  %v1154_v2 = vsel %vm207_vm9, %v1149_v50, %v1151_v0  ;;  %v1505_v17 = vrot.slane %v1503_v32, 3 }
0x11af   :  { %1947 = vperm.xlu1 %2100, %v1944_v8   ;;  %v1508_v1 = vsel %vm207_vm9, %v1503_v32, %v1505_v17 }
0x11b4   :  { %v1832_v35 = vpop.permute.xlu0 %1831 }
0x11b5   :  { %v1834_v47 = vmul.f32 %v1832_v35, %v2772_v7  ;;  %212 = vrot.lane.b32.xlu2 %v210_v45, %s2231_s4  ;;  %v1841_v55 = vmul.f32 %v1832_v35, %v2782_v54  ;;  %v679_v7 = vrot.slane %v677_v59, 3  ;;  %v1033_v54 = vrot.slane %v1031_v60, 3 }
0x11b7   :  { %1836 = vrot.lane.b32.xlu1 %v1834_v47, %s2234_s25  ;;  %v682_v61 = vsel %vm207_vm9, %v677_v59, %v679_v7 }
0x11bd   :  { %1824 = vperm.xlu2 %2101, %v2088_v49   ;;  %v1036_v49 = vsel %vm207_vm9, %v1031_v60, %v1033_v54 }
0x11c5   :  { %1843 = vrot.lane.b32.xlu2 %v1841_v55, %s2231_s4  ;;  %v1941_v55 = vpop.permute.xlu0 %1940 }
0x11cd   :  { %330 = vrot.lane.b32.xlu2 %v328_v16, %s2231_s4 }
0x11d5   :  { %684 = vrot.lane.b32.xlu2 %v682_v61, %s2231_s4 }
0x11dd   :  { %1038 = vrot.lane.b32.xlu2 %v1036_v49, %s2231_s4 }
0x11e5   :  { %1392 = vrot.lane.b32.xlu2 %v1390_v53, %s2231_s4 }
0x11ed   :  { %1746 = vrot.lane.b32.xlu2 %v1744_v19, %s2231_s4 }
0x1207   :  { %v1929_v21 = vpop.permute.xlu2 %1928 }
0x1208   :  { %v1931_v10 = vadd.f32 %v1929_v21, %v1921_v24 }
0x120a   :  { %2226 = vtanh.f32 %v1931_v10  ;;  %v1956_v57 = vmul.f32 %v1941_v55, %v1931_v10 }
0x120f   :  { %v213_v58 = vpop.permute.xlu2 %212 }
0x1210   :  { %216 = vst.msk [vmem:[%s2969_s6] sm:$0x1] %vm215_vm10, %v213_v58  ;;  %v2227_v18 = vpop.eup %2226 }
0x1217   :  { %v2845_v37 = vpop.permute.xlu2 %1824 }
0x1219   :  { %v1813_v44 = vpop.permute.xlu1 %1812 }
0x121a   :  { %v1815_v27 = vadd.f32 %v1813_v44, %v1805_v13 }
0x121c   :  { %2228 = vtanh.f32 %v1815_v27  ;;  %v1840_v45 = vmul.f32 %v2845_v37, %v1815_v27 }
0x121f   :  { %v1844_v26 = vpop.permute.xlu2 %1843 }
0x1220   :  { %v1846_v47 = vadd.f32 %v1844_v26, %v1840_v45 }
0x1221   :  { %v1948_v29 = vpop.permute.xlu1 %1947 }
0x1222   :  { %v1950_v30 = vmul.f32 %v1948_v29, %v2777_v51  ;;  %v1957_v15 = vmul.f32 %v1948_v29, %v2795_v62  ;;  %v2229_v22 = vpop.eup %2228  ;;  %v559_v51 = vpack.c.bf16 %v2469_v56, %v2469_v56  ;;  %v443_v62 = vrot.slane %v441_v34, 3 }
0x1224   :  { %1952 = vrot.lane.b32.xlu0 %v1950_v30, %s2234_s25  ;;  %1959 = vrot.lane.b32.xlu1 %v1957_v15, %s2231_s4  ;;  %v561_v12 = vrot.slane %v559_v51, 3  ;;  %v446_v56 = vsel %vm207_vm9, %v441_v34, %v443_v62 }
0x1226   :  { %v564_v41 = vsel %vm207_vm9, %v559_v51, %v561_v12 }
0x1227   :  { %v331_v31 = vpop.permute.xlu2 %330 }
0x1228   :  { %2026 = vst.msk [vmem:[%s2970_s7 + $0x7] sm:$0x1] %vm215_vm10, %v331_v31 }
0x1229   :  { %v1837_v9 = vpop.permute.xlu1 %1836 }
0x122c   :  { %1818 = vrot.lane.b32.xlu0 %v2229_v22, %s2233_s22  ;;  %1934 = vrot.lane.b32.xlu1 %v2227_v18, %s2233_s22 }
0x122f   :  { %v685_v3 = vpop.permute.xlu2 %684 }
0x1230   :  { %2041 = vst.msk [vmem:[%s2969_s6 + $0x2] sm:$0x1] %vm215_vm10, %v685_v3 }
0x1234   :  { %448 = vrot.lane.b32.xlu0 %v446_v56, %s2231_s4  ;;  %566 = vrot.lane.b32.xlu1 %v564_v41, %s2231_s4 }
0x1237   :  { %v1039_v23 = vpop.permute.xlu2 %1038 }
0x1238   :  { %2056 = vst.msk [vmem:[%s2970_s7 + $0x4] sm:$0x1] %vm215_vm10, %v1039_v23 }
0x123c   :  { %802 = vrot.lane.b32.xlu0 %v800_v11, %s2231_s4  ;;  %920 = vrot.lane.b32.xlu1 %v918_v48, %s2231_s4 }
0x123f   :  { %v1393_v8 = vpop.permute.xlu2 %1392 }
0x1240   :  { %2071 = vst.msk [vmem:[%s2969_s6 + $0x5] sm:$0x1] %vm215_vm10, %v1393_v8 }
0x1244   :  { %1156 = vrot.lane.b32.xlu0 %v1154_v2, %s2231_s4  ;;  %1274 = vrot.lane.b32.xlu1 %v1272_v5, %s2231_s4 }
0x1247   :  { %v1747_v35 = vpop.permute.xlu2 %1746 }
0x1248   :  { %2086 = vst.msk [vmem:[%s2970_s7 + $0x1] sm:$0x1] %vm215_vm10, %v1747_v35 }
0x124c   :  { %1510 = vrot.lane.b32.xlu0 %v1508_v1, %s2231_s4  ;;  %1628 = vrot.lane.b32.xlu1 %v1626_v38, %s2231_s4 }
0x1254   :  { %1853 = vrot.lane.b32.xlu1 %v1846_v47, %s2234_s25 }
0x1296   :  { %v1953_v59 = vpop.permute.xlu0 %1952  ;;  %v1960_v16 = vpop.permute.xlu1 %1959 }
0x1297   :  { %v1962_v7 = vadd.f32 %v1960_v16, %v1956_v57 }
0x1299   :  { %1969 = vrot.lane.b32.xlu1 %v1962_v7, %s2234_s25 }
0x129e   :  { %v1819_v60 = vpop.permute.xlu0 %1818  ;;  %v1935_v61 = vpop.permute.xlu1 %1934 }
0x129f   :  { %v1821_v54 = vmul.f32 %v1819_v60, %v2805_v42  ;;  %v1937_v25 = vmul.f32 %v1935_v61, %v2809_v6 }
0x12a1   :  { %v1827_v49 = vmul.f32 %v2845_v37, %v1821_v54  ;;  %v1943_v53 = vmul.f32 %v1941_v55, %v1937_v25 }
0x12a3   :  { %v1839_v36 = vadd.f32 %v1837_v9, %v1827_v49  ;;  %v1857_v63 = vpack.c.bf16 %v1827_v49, %v1827_v49  ;;  %v1973_v21 = vpack.c.bf16 %v1943_v53, %v1943_v53  ;;  %v1955_v6 = vadd.f32 %v1953_v59, %v1943_v53 }
0x12a5   :  { %v1859_v39 = vrot.slane %v1857_v63, 3  ;;  %1848 = vrot.lane.b32.xlu0 %v1839_v36, %s2231_s4  ;;  %v1975_v58 = vrot.slane %v1973_v21, 3 }
0x12a6   :  { %v449_v19 = vpop.permute.xlu0 %448  ;;  %v567_v20 = vpop.permute.xlu1 %566 }
0x12a7   :  { %2031 = vst.msk [vmem:[%s2969_s6 + $0x1] sm:$0x1] %vm215_vm10, %v449_v19  ;;  %v1862_v42 = vsel %vm207_vm9, %v1857_v63, %v1859_v39  ;;  %v1978_v24 = vsel %vm207_vm9, %v1973_v21, %v1975_v58 }
0x12a8   :  { %2036 = vst.msk [vmem:[%s2970_s7 + $0x6] sm:$0x1] %vm215_vm10, %v567_v20  ;;  %1864 = vrot.lane.b32.xlu2 %v1862_v42, %s2231_s4 }
0x12ad   :  { %1964 = vrot.lane.b32.xlu0 %v1955_v6, %s2231_s4 }
0x12ae   :  { %v803_v37 = vpop.permute.xlu0 %802  ;;  %v921_v44 = vpop.permute.xlu1 %920 }
0x12af   :  { %2046 = vst.msk [vmem:[%s2970_s7 + $0x5] sm:$0x1] %vm215_vm10, %v803_v37 }
0x12b0   :  { %2051 = vst.msk [vmem:[%s2969_s6 + $0x3] sm:$0x1] %vm215_vm10, %v921_v44  ;;  %1980 = vrot.lane.b32.xlu2 %v1978_v24, %s2231_s4 }
0x12b6   :  { %v1157_v13 = vpop.permute.xlu0 %1156  ;;  %v1275_v26 = vpop.permute.xlu1 %1274 }
0x12b7   :  { %2061 = vst.msk [vmem:[%s2969_s6 + $0x4] sm:$0x1] %vm215_vm10, %v1157_v13 }
0x12b8   :  { %2066 = vst.msk [vmem:[%s2970_s7 + $0x3] sm:$0x1] %vm215_vm10, %v1275_v26 }
0x12be   :  { %v1511_v10 = vpop.permute.xlu0 %1510  ;;  %v1629_v27 = vpop.permute.xlu1 %1628 }
0x12bf   :  { %2076 = vst.msk [vmem:[%s2970_s7 + $0x2] sm:$0x1] %vm215_vm10, %v1511_v10 }
0x12c0   :  { %2081 = vst.msk [vmem:[%s2969_s6 + $0x6] sm:$0x1] %vm215_vm10, %v1629_v27 }
0x12c6   :  { %v1854_v29 = vpop.permute.xlu1 %1853 }
0x12c7   :  { %1856 = vst.msk [vmem:[#allocation3] sm:$0x3] %vm85_vm0, %v1854_v29 }
0x1302   :  { %v1865_v30 = vpop.permute.xlu2 %1864 }
0x1303   :  { %2091 = vst.msk [vmem:[%s2969_s6 + $0x7] sm:$0x1] %vm215_vm10, %v1865_v30 }
0x130a   :  { %v1981_v15 = vpop.permute.xlu2 %1980 }
0x130b   :  { %1983 = vst.msk [vmem:[%s2970_s7] sm:$0x1] %vm215_vm10, %v1981_v15  ;;  %v1970_v31 = vpop.permute.xlu1 %1969 }
0x130c   :  { %1972 = vst.msk [vmem:[#allocation5] sm:$0x3] %vm85_vm0, %v1970_v31 }
0x1317   :  { %v1849_v18 = vpop.permute.xlu0 %1848 }
0x1318   :  { %1851 = vst.msk [vmem:[#allocation2] sm:$0x3] %vm85_vm0, %v1849_v18 }
0x131f   :  { %v1965_v22 = vpop.permute.xlu0 %1964 }
0x1320   :  { %1967 = vst.msk [vmem:[#allocation4] sm:$0x3] %vm85_vm0, %v1965_v22 }

</bundles_post_ra>
